<compile_context>
chip_gen: v5e
topology: v5e:2x2
jax: 0.10.0
libtpu: 0.0.40
codegen_flags: <defaults>
</compile_context>

<pallas_src>
import functools

import jax
import jax.numpy as jnp
from jax import lax
from jax.experimental import pallas as pl
from jax.experimental.pallas import tpu as pltpu


_NEG_BIG = -1e30  # finite "minus infinity": no inf/NaN propagation hazards


def _layernorm(x, gamma, beta, eps=1e-5):
    mu = jnp.mean(x, axis=-1, keepdims=True)
    var = jnp.mean((x - mu) ** 2, axis=-1, keepdims=True)
    return (x - mu) * lax.rsqrt(var + eps) * gamma + beta


def _block_kernel(x_ref,
                  ln1_g_ref, ln1_b_ref,
                  wqkv_ref, wp_ref, bp_ref,
                  ln2_g_ref, ln2_b_ref,
                  w1_ref, b1_ref, w2_ref, b2_ref,
                  out_ref,
                  *, head_count, head_size):
    Bb, T, E = x_ref.shape
    xf = x_ref[...].reshape(Bb * T, E)                  # (Bb*T, E) f32, cheap merge

    # ---- attention branch ---------------------------------------------------
    n1 = _layernorm(xf, ln1_g_ref[0], ln1_b_ref[0])     # f32
    # fused QKV projection: one MXU call, M = Bb*T, N = 3E (Wq pre-scaled by 1/sqrt(hs))
    qkv = jnp.dot(n1.astype(jnp.bfloat16), wqkv_ref[...],
                  preferred_element_type=jnp.float32)   # (Bb*T, 3E) f32
    qkv = qkv.astype(jnp.bfloat16)                      # single cast pass
    q = qkv[:, :E].reshape(Bb, T, E)
    k = qkv[:, E:2 * E].reshape(Bb, T, E)
    v = qkv[:, 2 * E:].reshape(Bb, T, E)

    # causal additive bias, built once per grid step
    rows = lax.broadcasted_iota(jnp.int32, (T, T), 0)
    cols = lax.broadcasted_iota(jnp.int32, (T, T), 1)
    causal_bias = jnp.where(rows >= cols,
                            jnp.float32(0.0), jnp.float32(_NEG_BIG))  # (T, T)

    head_outs = []
    for h in range(head_count):                         # static, small unroll
        lo = h * head_size
        hi = lo + head_size
        s = jnp.einsum('bqd,bkd->bqk', q[:, :, lo:hi], k[:, :, lo:hi],
                       preferred_element_type=jnp.float32)            # (Bb, T, T)
        s = s + causal_bias[None, :, :]
        s = s - jnp.max(s, axis=-1, keepdims=True)
        e = jnp.exp(s)                                                 # <= 1, safe in bf16
        inv = pl.reciprocal(jnp.sum(e, axis=-1, keepdims=True), approx=True)  # (Bb, T, 1)
        o = jnp.einsum('bqk,bkd->bqd', e.astype(jnp.bfloat16), v[:, :, lo:hi],
                       preferred_element_type=jnp.float32)             # (Bb, T, hs)
        # deferred softmax normalization: multiply on (T, hs), not (T, T)
        head_outs.append(o * inv)

    # one layout op per grid step, then a single full-K (E) output projection
    o_all = jnp.concatenate(head_outs, axis=-1).reshape(Bb * T, E)
    attn = jnp.dot(o_all.astype(jnp.bfloat16), wp_ref[...],
                   preferred_element_type=jnp.float32)                 # (Bb*T, E)

    x2 = xf + attn + bp_ref[0]                          # residual 1

    # ---- feed-forward branch ------------------------------------------------
    n2 = _layernorm(x2, ln2_g_ref[0], ln2_b_ref[0])
    h1 = jnp.maximum(
        jnp.dot(n2.astype(jnp.bfloat16), w1_ref[...],
                preferred_element_type=jnp.float32) + b1_ref[0], 0.0)
    ffn = jnp.dot(h1.astype(jnp.bfloat16), w2_ref[...],
                  preferred_element_type=jnp.float32) + b2_ref[0]

    out_ref[...] = (x2 + ffn).reshape(Bb, T, E).astype(out_ref.dtype)  # residual 2


def _vmem_budget():
    """(vmem_limit_bytes, target_rows) sized per TPU generation."""
    try:
        cap = int(pltpu.get_tpu_info().vmem_capacity_bytes)
    except Exception:
        # Unknown generation: stay conservative enough for v7x (64 MiB / core).
        return 48 * 1024 * 1024, 256
    limit = min((cap * 3) // 4, 96 * 1024 * 1024)       # ~75% of capacity, capped
    rows = 256 if cap <= 64 * 1024 * 1024 else 512       # v7x: 256; v5e/v6e: 512
    return limit, rows


def _pick_block_b(B, T, target_rows, min_steps=2):
    """Largest batch tile with block_b*T <= target_rows rows while keeping at least
    `min_steps` grid steps (parallel axis feeds both v7x TensorCores)."""
    min_steps = min(min_steps, B)
    best = 1
    for d in range(1, B + 1):
        if B % d == 0 and d * T <= target_rows and B // d >= min_steps:
            best = d
    return best


def _const_spec(shape):
    """Constant-index (weight/bias/LN) input: single-buffered when supported."""
    index_map = lambda b: (0,) * len(shape)
    try:
        return pl.BlockSpec(shape, index_map, pipeline_mode=pl.Buffered(1))
    except Exception:   # older JAX without pipeline_mode / Buffered
        return pl.BlockSpec(shape, index_map)


def prepare_block_params(params, head_count):
    """One-time weight fusion / cast (kept OUT of the per-call path):
      * Wq, Wk, Wv fused into one (E, 3E) matrix (single MXU push for QKV);
      * 1/sqrt(head_size) folded into the Wq columns (no per-step activation scale);
      * all matmul weights shipped to the kernel in bf16 (f32 MXU accumulation)."""
    E = params["wq"].shape[0]
    scale = (E // head_count) ** (-0.5)
    fused = dict(params)
    fused["wqkv"] = jnp.concatenate(
        [params["wq"] * scale, params["wk"], params["wv"]], axis=1
    ).astype(jnp.bfloat16)
    fused["wp_bf16"] = params["wp"].astype(jnp.bfloat16)
    fused["w1_bf16"] = params["w1"].astype(jnp.bfloat16)
    fused["w2_bf16"] = params["w2"].astype(jnp.bfloat16)
    return fused


def attention_thinking_block(x, fused_params, head_count, block_b=None):
    B, T, E = x.shape
    assert E % head_count == 0
    head_size = E // head_count
    H4 = 4 * E

    vmem_limit, target_rows = _vmem_budget()
    if block_b is None:
        block_b = _pick_block_b(B, T, target_rows=target_rows)
    assert B % block_b == 0

    kernel = functools.partial(_block_kernel,
                               head_count=head_count, head_size=head_size)

    in_specs = [
        pl.BlockSpec((block_b, T, E), lambda b: (b, 0, 0)),   # x (double-buffered)
        _const_spec((1, E)), _const_spec((1, E)),             # ln1 gamma / beta
        _const_spec((E, 3 * E)),                              # fused Wqkv (bf16)
        _const_spec((E, E)), _const_spec((1, E)),             # proj W (bf16), b
        _const_spec((1, E)), _const_spec((1, E)),             # ln2 gamma / beta
        _const_spec((E, H4)), _const_spec((1, H4)),           # FFN W1 (bf16), b1
        _const_spec((H4, E)), _const_spec((1, E)),            # FFN W2 (bf16), b2
    ]

    flops = int(24 * B * T * E * E + 4 * B * T * T * E)
    transcendentals = int(B * head_count * T * T)
    bytes_accessed = int(2 * B * T * E * 4                    # x in + out (f32)
                         + 12 * E * E * 2                     # bf16 weights
                         + 10 * E * 4)                        # biases / LN params

    return pl.pallas_call(
        kernel,
        out_shape=jax.ShapeDtypeStruct((B, T, E), x.dtype),
        grid_spec=pltpu.PrefetchScalarGridSpec(
            num_scalar_prefetch=0,
            grid=(B // block_b,),
            in_specs=in_specs,
            out_specs=pl.BlockSpec((block_b, T, E), lambda b: (b, 0, 0)),
        ),
        compiler_params=pltpu.CompilerParams(
            dimension_semantics=("parallel",),
            vmem_limit_bytes=vmem_limit),
        cost_estimate=pl.CostEstimate(flops=flops,
                                      transcendentals=transcendentals,
                                      bytes_accessed=bytes_accessed),
    )(x,
      fused_params["ln1_g"], fused_params["ln1_b"],
      fused_params["wqkv"], fused_params["wp_bf16"], fused_params["bp"],
      fused_params["ln2_g"], fused_params["ln2_b"],
      fused_params["w1_bf16"], fused_params["b1"],
      fused_params["w2_bf16"], fused_params["b2"])


# ---------------- pure-JAX f32 reference (for correctness check) ----------------
def _reference(x, p, head_count):
    E = x.shape[-1]
    hs = E // head_count

    def ln(v, g, b, eps=1e-5):
        mu = v.mean(-1, keepdims=True)
        var = ((v - mu) ** 2).mean(-1, keepdims=True)
        return (v - mu) / jnp.sqrt(var + eps) * g + b

    n1 = ln(x, p["ln1_g"][0], p["ln1_b"][0])
    Q = n1 @ p["wq"]; K = n1 @ p["wk"]; V = n1 @ p["wv"]
    T = x.shape[1]
    mask = jnp.tril(jnp.ones((T, T), bool))
    outs = []
    for h in range(head_count):
        sl = slice(h * hs, (h + 1) * hs)
        s = (Q[..., sl] @ jnp.swapaxes(K[..., sl], -1, -2)) * hs ** -0.5
        s = jnp.where(mask, s, -jnp.inf)
        a = jax.nn.softmax(s, axis=-1)
        outs.append(a @ V[..., sl])
    attn = jnp.concatenate(outs, -1) @ p["wp"] + p["bp"][0]
    x2 = x + attn
    n2 = ln(x2, p["ln2_g"][0], p["ln2_b"][0])
    ffn = jnp.maximum(n2 @ p["w1"] + p["b1"][0], 0.0) @ p["w2"] + p["b2"][0]
    return x2 + ffn


if __name__ == "__main__":
    # small shapes consistent with the module's forward
    B, T, E, H = 4, 64, 128, 4
    H4 = 4 * E

    key = jax.random.PRNGKey(0)
    ks = jax.random.split(key, 10)
    sc = 0.02

    params = {
        "ln1_g": jnp.ones((1, E), jnp.float32),
        "ln1_b": jnp.zeros((1, E), jnp.float32),
        # q/k/v weights stored as (in, out); fused into bf16 Wqkv once below
        "wq": sc * jax.random.normal(ks[0], (E, E), jnp.float32),
        "wk": sc * jax.random.normal(ks[1], (E, E), jnp.float32),
        "wv": sc * jax.random.normal(ks[2], (E, E), jnp.float32),
        "wp": sc * jax.random.normal(ks[3], (E, E), jnp.float32),
        "bp": sc * jax.random.normal(ks[4], (1, E), jnp.float32),
        "ln2_g": jnp.ones((1, E), jnp.float32),
        "ln2_b": jnp.zeros((1, E), jnp.float32),
        "w1": sc * jax.random.normal(ks[5], (E, H4), jnp.float32),
        "b1": sc * jax.random.normal(ks[6], (1, H4), jnp.float32),
        "w2": sc * jax.random.normal(ks[7], (H4, E), jnp.float32),
        "b2": sc * jax.random.normal(ks[8], (1, E), jnp.float32),
    }

    x = jax.random.normal(ks[9], (B, T, E), jnp.float32)

    fused = prepare_block_params(params, H)     # one-time fusion / bf16 cast
    out = attention_thinking_block(x, fused, head_count=H)
    out = jax.block_until_ready(out)

    ref = _reference(x, params, H)
    assert out.shape == (B, T, E)
    # kernel uses bf16 matmul operands (f32 accumulation) vs. the f32 reference,
    # so the tolerance is looser than a pure-f32 comparison.
    err = float(jnp.max(jnp.abs(out - ref)))
    assert jnp.allclose(out, ref, atol=2e-2, rtol=2e-2), err

    print("KERNEL_OK")
</pallas_src>

<mosaic_0001>
module attributes {stable_mosaic.version = 11 : i64} {
  func.func @_block_kernel(%arg0: i32, %arg1: memref<2x64x128xf32, #tpu.memory_space<vmem>>, %arg2: memref<1x128xf32, #tpu.memory_space<vmem>>, %arg3: memref<1x128xf32, #tpu.memory_space<vmem>>, %arg4: memref<128x384xbf16, #tpu.memory_space<vmem>>, %arg5: memref<128x128xbf16, #tpu.memory_space<vmem>>, %arg6: memref<1x128xf32, #tpu.memory_space<vmem>>, %arg7: memref<1x128xf32, #tpu.memory_space<vmem>>, %arg8: memref<1x128xf32, #tpu.memory_space<vmem>>, %arg9: memref<128x512xbf16, #tpu.memory_space<vmem>>, %arg10: memref<1x512xf32, #tpu.memory_space<vmem>>, %arg11: memref<512x128xbf16, #tpu.memory_space<vmem>>, %arg12: memref<1x128xf32, #tpu.memory_space<vmem>>, %arg13: memref<2x64x128xf32, #tpu.memory_space<vmem>>) attributes {dimension_semantics = [#tpu.dimension_semantics<parallel>], iteration_bounds = array<i64: 2>, scalar_prefetch = 0 : i64, scratch_operands = 0 : i64, tpu.core_type = #tpu.core_type<tc>, window_params = [{transform_indices = @transform_0, window_bounds = array<i64: 2, 64, 128>}, {pipeline_mode = #tpu.pipeline_mode<synchronous>, transform_indices = @transform_1, window_bounds = array<i64: 1, 128>}, {pipeline_mode = #tpu.pipeline_mode<synchronous>, transform_indices = @transform_2, window_bounds = array<i64: 1, 128>}, {pipeline_mode = #tpu.pipeline_mode<synchronous>, transform_indices = @transform_3, window_bounds = array<i64: 128, 384>}, {pipeline_mode = #tpu.pipeline_mode<synchronous>, transform_indices = @transform_4, window_bounds = array<i64: 128, 128>}, {pipeline_mode = #tpu.pipeline_mode<synchronous>, transform_indices = @transform_5, window_bounds = array<i64: 1, 128>}, {pipeline_mode = #tpu.pipeline_mode<synchronous>, transform_indices = @transform_6, window_bounds = array<i64: 1, 128>}, {pipeline_mode = #tpu.pipeline_mode<synchronous>, transform_indices = @transform_7, window_bounds = array<i64: 1, 128>}, {pipeline_mode = #tpu.pipeline_mode<synchronous>, transform_indices = @transform_8, window_bounds = array<i64: 128, 512>}, {pipeline_mode = #tpu.pipeline_mode<synchronous>, transform_indices = @transform_9, window_bounds = array<i64: 1, 512>}, {pipeline_mode = #tpu.pipeline_mode<synchronous>, transform_indices = @transform_10, window_bounds = array<i64: 512, 128>}, {pipeline_mode = #tpu.pipeline_mode<synchronous>, transform_indices = @transform_11, window_bounds = array<i64: 1, 128>}, {transform_indices = @transform_12, window_bounds = array<i64: 2, 64, 128>}]} {
    %c0 = arith.constant 0 : index
    %c0_0 = arith.constant 0 : index
    %c0_1 = arith.constant 0 : index
    %0 = vector.load %arg1[%c0, %c0_0, %c0_1] : memref<2x64x128xf32, #tpu.memory_space<vmem>>, vector<2x64x128xf32>
    %1 = vector.shape_cast %0 : vector<2x64x128xf32> to vector<128x128xf32>
    %c0_2 = arith.constant 0 : index
    %c0_3 = arith.constant 0 : index
    %2 = vector.load %arg2[%c0_2, %c0_3] : memref<1x128xf32, #tpu.memory_space<vmem>>, vector<1x128xf32>
    %3 = vector.shape_cast %2 : vector<1x128xf32> to vector<128xf32>
    %c0_4 = arith.constant 0 : index
    %c0_5 = arith.constant 0 : index
    %4 = vector.load %arg3[%c0_4, %c0_5] : memref<1x128xf32, #tpu.memory_space<vmem>>, vector<1x128xf32>
    %5 = vector.shape_cast %4 : vector<1x128xf32> to vector<128xf32>
    %cst = arith.constant dense<0.000000e+00> : vector<128xf32>
    %6 = vector.multi_reduction <add>, %1, %cst [1] : vector<128x128xf32> to vector<128xf32>
    %7 = vector.shape_cast %6 : vector<128xf32> to vector<128x1xf32>
    %cst_6 = arith.constant 1.280000e+02 : f32
    %8 = vector.broadcast %cst_6 : f32 to vector<128x1xf32>
    %9 = arith.divf %7, %8 : vector<128x1xf32>
    %10 = vector.broadcast %9 : vector<128x1xf32> to vector<128x128xf32>
    %11 = arith.subf %1, %10 : vector<128x128xf32>
    %12 = arith.mulf %11, %11 : vector<128x128xf32>
    %cst_7 = arith.constant dense<0.000000e+00> : vector<128xf32>
    %13 = vector.multi_reduction <add>, %12, %cst_7 [1] : vector<128x128xf32> to vector<128xf32>
    %14 = vector.shape_cast %13 : vector<128xf32> to vector<128x1xf32>
    %cst_8 = arith.constant 1.280000e+02 : f32
    %15 = vector.broadcast %cst_8 : f32 to vector<128x1xf32>
    %16 = arith.divf %14, %15 : vector<128x1xf32>
    %17 = vector.broadcast %9 : vector<128x1xf32> to vector<128x128xf32>
    %18 = arith.subf %1, %17 : vector<128x128xf32>
    %cst_9 = arith.constant 9.99999974E-6 : f32
    %19 = vector.broadcast %cst_9 : f32 to vector<128x1xf32>
    %20 = arith.addf %16, %19 : vector<128x1xf32>
    %21 = math.rsqrt %20 : vector<128x1xf32>
    %22 = vector.broadcast %21 : vector<128x1xf32> to vector<128x128xf32>
    %23 = arith.mulf %18, %22 : vector<128x128xf32>
    %24 = vector.shape_cast %3 : vector<128xf32> to vector<1x128xf32>
    %25 = vector.broadcast %24 : vector<1x128xf32> to vector<128x128xf32>
    %26 = arith.mulf %23, %25 : vector<128x128xf32>
    %27 = vector.shape_cast %5 : vector<128xf32> to vector<1x128xf32>
    %28 = vector.broadcast %27 : vector<1x128xf32> to vector<128x128xf32>
    %29 = arith.addf %26, %28 : vector<128x128xf32>
    %30 = arith.truncf %29 : vector<128x128xf32> to vector<128x128xbf16>
    %c0_10 = arith.constant 0 : index
    %c0_11 = arith.constant 0 : index
    %31 = vector.load %arg4[%c0_10, %c0_11] : memref<128x384xbf16, #tpu.memory_space<vmem>>, vector<128x384xbf16>
    %cst_12 = arith.constant dense<0.000000e+00> : vector<128x384xf32>
    %32 = tpu.matmul %30, %31, %cst_12 {dimension_numbers = #tpu.dot_dimension_numbers<[1], [0], [0], [1], [0, 0, 1, 1], [], []>} : vector<128x128xbf16>, vector<128x384xbf16>, vector<128x384xf32> -> vector<128x384xf32>
    %33 = arith.truncf %32 : vector<128x384xf32> to vector<128x384xbf16>
    %34 = vector.extract_strided_slice %33 {offsets = [0, 0], sizes = [128, 128], strides = [1, 1]} : vector<128x384xbf16> to vector<128x128xbf16>
    %35 = vector.shape_cast %34 : vector<128x128xbf16> to vector<2x64x128xbf16>
    %36 = vector.extract_strided_slice %33 {offsets = [0, 128], sizes = [128, 128], strides = [1, 1]} : vector<128x384xbf16> to vector<128x128xbf16>
    %37 = vector.shape_cast %36 : vector<128x128xbf16> to vector<2x64x128xbf16>
    %38 = vector.extract_strided_slice %33 {offsets = [0, 256], sizes = [128, 128], strides = [1, 1]} : vector<128x384xbf16> to vector<128x128xbf16>
    %39 = vector.shape_cast %38 : vector<128x128xbf16> to vector<2x64x128xbf16>
    %40 = tpu.iota {dimensions = array<i32: 0>} : vector<64x64xi32>
    %41 = tpu.iota {dimensions = array<i32: 1>} : vector<64x64xi32>
    %42 = arith.cmpi sge, %40, %41 : vector<64x64xi32>
    %cst_13 = arith.constant 0.000000e+00 : f32
    %cst_14 = arith.constant -1.000000e+30 : f32
    %43 = vector.broadcast %cst_13 : f32 to vector<64x64xf32>
    %44 = vector.broadcast %cst_14 : f32 to vector<64x64xf32>
    %45 = arith.select %42, %43, %44 : vector<64x64xi1>, vector<64x64xf32>
    %46 = vector.extract_strided_slice %35 {offsets = [0, 0, 0], sizes = [2, 64, 32], strides = [1, 1, 1]} : vector<2x64x128xbf16> to vector<2x64x32xbf16>
    %47 = vector.extract_strided_slice %37 {offsets = [0, 0, 0], sizes = [2, 64, 32], strides = [1, 1, 1]} : vector<2x64x128xbf16> to vector<2x64x32xbf16>
    "tpu.trace_start"() <{level = 10 : i32, message = "bqd,bkd->bqk"}> : () -> ()
    %cst_15 = arith.constant dense<0.000000e+00> : vector<2x64x64xf32>
    %48 = tpu.matmul %46, %47, %cst_15 {dimension_numbers = #tpu.dot_dimension_numbers<[2], [2], [1], [1], [0, 0, 0, 1, 1, 1], [0], [0]>} : vector<2x64x32xbf16>, vector<2x64x32xbf16>, vector<2x64x64xf32> -> vector<2x64x64xf32>
    "tpu.trace_stop"() : () -> ()
    %49 = vector.shape_cast %45 : vector<64x64xf32> to vector<1x64x64xf32>
    %50 = vector.broadcast %49 : vector<1x64x64xf32> to vector<2x64x64xf32>
    %51 = arith.addf %48, %50 : vector<2x64x64xf32>
    %cst_16 = arith.constant dense<0xFF800000> : vector<2x64xf32>
    %52 = vector.multi_reduction <maximumf>, %51, %cst_16 [2] : vector<2x64x64xf32> to vector<2x64xf32>
    %53 = vector.shape_cast %52 : vector<2x64xf32> to vector<2x64x1xf32>
    %54 = vector.broadcast %53 : vector<2x64x1xf32> to vector<2x64x64xf32>
    %55 = arith.subf %51, %54 : vector<2x64x64xf32>
    %56 = math.exp %55 : vector<2x64x64xf32>
    %cst_17 = arith.constant dense<0.000000e+00> : vector<2x64xf32>
    %57 = vector.multi_reduction <add>, %56, %cst_17 [2] : vector<2x64x64xf32> to vector<2x64xf32>
    %58 = vector.shape_cast %57 : vector<2x64xf32> to vector<2x64x1xf32>
    %59 = tpu.reciprocal %58 {approx = true} : vector<2x64x1xf32> -> vector<2x64x1xf32>
    %60 = arith.truncf %56 : vector<2x64x64xf32> to vector<2x64x64xbf16>
    %61 = vector.extract_strided_slice %39 {offsets = [0, 0, 0], sizes = [2, 64, 32], strides = [1, 1, 1]} : vector<2x64x128xbf16> to vector<2x64x32xbf16>
    "tpu.trace_start"() <{level = 10 : i32, message = "bqk,bkd->bqd"}> : () -> ()
    %cst_18 = arith.constant dense<0.000000e+00> : vector<2x64x32xf32>
    %62 = tpu.matmul %60, %61, %cst_18 {dimension_numbers = #tpu.dot_dimension_numbers<[2], [1], [1], [2], [0, 0, 0, 1, 1, 2], [0], [0]>} : vector<2x64x64xbf16>, vector<2x64x32xbf16>, vector<2x64x32xf32> -> vector<2x64x32xf32>
    "tpu.trace_stop"() : () -> ()
    %63 = vector.broadcast %59 : vector<2x64x1xf32> to vector<2x64x32xf32>
    %64 = arith.mulf %62, %63 : vector<2x64x32xf32>
    %65 = vector.extract_strided_slice %35 {offsets = [0, 0, 32], sizes = [2, 64, 32], strides = [1, 1, 1]} : vector<2x64x128xbf16> to vector<2x64x32xbf16>
    %66 = vector.extract_strided_slice %37 {offsets = [0, 0, 32], sizes = [2, 64, 32], strides = [1, 1, 1]} : vector<2x64x128xbf16> to vector<2x64x32xbf16>
    "tpu.trace_start"() <{level = 10 : i32, message = "bqd,bkd->bqk"}> : () -> ()
    %cst_19 = arith.constant dense<0.000000e+00> : vector<2x64x64xf32>
    %67 = tpu.matmul %65, %66, %cst_19 {dimension_numbers = #tpu.dot_dimension_numbers<[2], [2], [1], [1], [0, 0, 0, 1, 1, 1], [0], [0]>} : vector<2x64x32xbf16>, vector<2x64x32xbf16>, vector<2x64x64xf32> -> vector<2x64x64xf32>
    "tpu.trace_stop"() : () -> ()
    %68 = vector.shape_cast %45 : vector<64x64xf32> to vector<1x64x64xf32>
    %69 = vector.broadcast %68 : vector<1x64x64xf32> to vector<2x64x64xf32>
    %70 = arith.addf %67, %69 : vector<2x64x64xf32>
    %cst_20 = arith.constant dense<0xFF800000> : vector<2x64xf32>
    %71 = vector.multi_reduction <maximumf>, %70, %cst_20 [2] : vector<2x64x64xf32> to vector<2x64xf32>
    %72 = vector.shape_cast %71 : vector<2x64xf32> to vector<2x64x1xf32>
    %73 = vector.broadcast %72 : vector<2x64x1xf32> to vector<2x64x64xf32>
    %74 = arith.subf %70, %73 : vector<2x64x64xf32>
    %75 = math.exp %74 : vector<2x64x64xf32>
    %cst_21 = arith.constant dense<0.000000e+00> : vector<2x64xf32>
    %76 = vector.multi_reduction <add>, %75, %cst_21 [2] : vector<2x64x64xf32> to vector<2x64xf32>
    %77 = vector.shape_cast %76 : vector<2x64xf32> to vector<2x64x1xf32>
    %78 = tpu.reciprocal %77 {approx = true} : vector<2x64x1xf32> -> vector<2x64x1xf32>
    %79 = arith.truncf %75 : vector<2x64x64xf32> to vector<2x64x64xbf16>
    %80 = vector.extract_strided_slice %39 {offsets = [0, 0, 32], sizes = [2, 64, 32], strides = [1, 1, 1]} : vector<2x64x128xbf16> to vector<2x64x32xbf16>
    "tpu.trace_start"() <{level = 10 : i32, message = "bqk,bkd->bqd"}> : () -> ()
    %cst_22 = arith.constant dense<0.000000e+00> : vector<2x64x32xf32>
    %81 = tpu.matmul %79, %80, %cst_22 {dimension_numbers = #tpu.dot_dimension_numbers<[2], [1], [1], [2], [0, 0, 0, 1, 1, 2], [0], [0]>} : vector<2x64x64xbf16>, vector<2x64x32xbf16>, vector<2x64x32xf32> -> vector<2x64x32xf32>
    "tpu.trace_stop"() : () -> ()
    %82 = vector.broadcast %78 : vector<2x64x1xf32> to vector<2x64x32xf32>
    %83 = arith.mulf %81, %82 : vector<2x64x32xf32>
    %84 = vector.extract_strided_slice %35 {offsets = [0, 0, 64], sizes = [2, 64, 32], strides = [1, 1, 1]} : vector<2x64x128xbf16> to vector<2x64x32xbf16>
    %85 = vector.extract_strided_slice %37 {offsets = [0, 0, 64], sizes = [2, 64, 32], strides = [1, 1, 1]} : vector<2x64x128xbf16> to vector<2x64x32xbf16>
    "tpu.trace_start"() <{level = 10 : i32, message = "bqd,bkd->bqk"}> : () -> ()
    %cst_23 = arith.constant dense<0.000000e+00> : vector<2x64x64xf32>
    %86 = tpu.matmul %84, %85, %cst_23 {dimension_numbers = #tpu.dot_dimension_numbers<[2], [2], [1], [1], [0, 0, 0, 1, 1, 1], [0], [0]>} : vector<2x64x32xbf16>, vector<2x64x32xbf16>, vector<2x64x64xf32> -> vector<2x64x64xf32>
    "tpu.trace_stop"() : () -> ()
    %87 = vector.shape_cast %45 : vector<64x64xf32> to vector<1x64x64xf32>
    %88 = vector.broadcast %87 : vector<1x64x64xf32> to vector<2x64x64xf32>
    %89 = arith.addf %86, %88 : vector<2x64x64xf32>
    %cst_24 = arith.constant dense<0xFF800000> : vector<2x64xf32>
    %90 = vector.multi_reduction <maximumf>, %89, %cst_24 [2] : vector<2x64x64xf32> to vector<2x64xf32>
    %91 = vector.shape_cast %90 : vector<2x64xf32> to vector<2x64x1xf32>
    %92 = vector.broadcast %91 : vector<2x64x1xf32> to vector<2x64x64xf32>
    %93 = arith.subf %89, %92 : vector<2x64x64xf32>
    %94 = math.exp %93 : vector<2x64x64xf32>
    %cst_25 = arith.constant dense<0.000000e+00> : vector<2x64xf32>
    %95 = vector.multi_reduction <add>, %94, %cst_25 [2] : vector<2x64x64xf32> to vector<2x64xf32>
    %96 = vector.shape_cast %95 : vector<2x64xf32> to vector<2x64x1xf32>
    %97 = tpu.reciprocal %96 {approx = true} : vector<2x64x1xf32> -> vector<2x64x1xf32>
    %98 = arith.truncf %94 : vector<2x64x64xf32> to vector<2x64x64xbf16>
    %99 = vector.extract_strided_slice %39 {offsets = [0, 0, 64], sizes = [2, 64, 32], strides = [1, 1, 1]} : vector<2x64x128xbf16> to vector<2x64x32xbf16>
    "tpu.trace_start"() <{level = 10 : i32, message = "bqk,bkd->bqd"}> : () -> ()
    %cst_26 = arith.constant dense<0.000000e+00> : vector<2x64x32xf32>
    %100 = tpu.matmul %98, %99, %cst_26 {dimension_numbers = #tpu.dot_dimension_numbers<[2], [1], [1], [2], [0, 0, 0, 1, 1, 2], [0], [0]>} : vector<2x64x64xbf16>, vector<2x64x32xbf16>, vector<2x64x32xf32> -> vector<2x64x32xf32>
    "tpu.trace_stop"() : () -> ()
    %101 = vector.broadcast %97 : vector<2x64x1xf32> to vector<2x64x32xf32>
    %102 = arith.mulf %100, %101 : vector<2x64x32xf32>
    %103 = vector.extract_strided_slice %35 {offsets = [0, 0, 96], sizes = [2, 64, 32], strides = [1, 1, 1]} : vector<2x64x128xbf16> to vector<2x64x32xbf16>
    %104 = vector.extract_strided_slice %37 {offsets = [0, 0, 96], sizes = [2, 64, 32], strides = [1, 1, 1]} : vector<2x64x128xbf16> to vector<2x64x32xbf16>
    "tpu.trace_start"() <{level = 10 : i32, message = "bqd,bkd->bqk"}> : () -> ()
    %cst_27 = arith.constant dense<0.000000e+00> : vector<2x64x64xf32>
    %105 = tpu.matmul %103, %104, %cst_27 {dimension_numbers = #tpu.dot_dimension_numbers<[2], [2], [1], [1], [0, 0, 0, 1, 1, 1], [0], [0]>} : vector<2x64x32xbf16>, vector<2x64x32xbf16>, vector<2x64x64xf32> -> vector<2x64x64xf32>
    "tpu.trace_stop"() : () -> ()
    %106 = vector.shape_cast %45 : vector<64x64xf32> to vector<1x64x64xf32>
    %107 = vector.broadcast %106 : vector<1x64x64xf32> to vector<2x64x64xf32>
    %108 = arith.addf %105, %107 : vector<2x64x64xf32>
    %cst_28 = arith.constant dense<0xFF800000> : vector<2x64xf32>
    %109 = vector.multi_reduction <maximumf>, %108, %cst_28 [2] : vector<2x64x64xf32> to vector<2x64xf32>
    %110 = vector.shape_cast %109 : vector<2x64xf32> to vector<2x64x1xf32>
    %111 = vector.broadcast %110 : vector<2x64x1xf32> to vector<2x64x64xf32>
    %112 = arith.subf %108, %111 : vector<2x64x64xf32>
    %113 = math.exp %112 : vector<2x64x64xf32>
    %cst_29 = arith.constant dense<0.000000e+00> : vector<2x64xf32>
    %114 = vector.multi_reduction <add>, %113, %cst_29 [2] : vector<2x64x64xf32> to vector<2x64xf32>
    %115 = vector.shape_cast %114 : vector<2x64xf32> to vector<2x64x1xf32>
    %116 = tpu.reciprocal %115 {approx = true} : vector<2x64x1xf32> -> vector<2x64x1xf32>
    %117 = arith.truncf %113 : vector<2x64x64xf32> to vector<2x64x64xbf16>
    %118 = vector.extract_strided_slice %39 {offsets = [0, 0, 96], sizes = [2, 64, 32], strides = [1, 1, 1]} : vector<2x64x128xbf16> to vector<2x64x32xbf16>
    "tpu.trace_start"() <{level = 10 : i32, message = "bqk,bkd->bqd"}> : () -> ()
    %cst_30 = arith.constant dense<0.000000e+00> : vector<2x64x32xf32>
    %119 = tpu.matmul %117, %118, %cst_30 {dimension_numbers = #tpu.dot_dimension_numbers<[2], [1], [1], [2], [0, 0, 0, 1, 1, 2], [0], [0]>} : vector<2x64x64xbf16>, vector<2x64x32xbf16>, vector<2x64x32xf32> -> vector<2x64x32xf32>
    "tpu.trace_stop"() : () -> ()
    %120 = vector.broadcast %116 : vector<2x64x1xf32> to vector<2x64x32xf32>
    %121 = arith.mulf %119, %120 : vector<2x64x32xf32>
    %122 = tpu.concatenate %64, %83, %102, %121 in 2 : vector<2x64x32xf32>, vector<2x64x32xf32>, vector<2x64x32xf32>, vector<2x64x32xf32> -> vector<2x64x128xf32>
    %123 = vector.shape_cast %122 : vector<2x64x128xf32> to vector<128x128xf32>
    %124 = arith.truncf %123 : vector<128x128xf32> to vector<128x128xbf16>
    %c0_31 = arith.constant 0 : index
    %c0_32 = arith.constant 0 : index
    %125 = vector.load %arg5[%c0_31, %c0_32] : memref<128x128xbf16, #tpu.memory_space<vmem>>, vector<128x128xbf16>
    %cst_33 = arith.constant dense<0.000000e+00> : vector<128x128xf32>
    %126 = tpu.matmul %124, %125, %cst_33 {dimension_numbers = #tpu.dot_dimension_numbers<[1], [0], [0], [1], [0, 0, 1, 1], [], []>} : vector<128x128xbf16>, vector<128x128xbf16>, vector<128x128xf32> -> vector<128x128xf32>
    %127 = arith.addf %1, %126 : vector<128x128xf32>
    %c0_34 = arith.constant 0 : index
    %c0_35 = arith.constant 0 : index
    %128 = vector.load %arg6[%c0_34, %c0_35] : memref<1x128xf32, #tpu.memory_space<vmem>>, vector<1x128xf32>
    %129 = vector.shape_cast %128 : vector<1x128xf32> to vector<128xf32>
    %130 = vector.shape_cast %129 : vector<128xf32> to vector<1x128xf32>
    %131 = vector.broadcast %130 : vector<1x128xf32> to vector<128x128xf32>
    %132 = arith.addf %127, %131 : vector<128x128xf32>
    %c0_36 = arith.constant 0 : index
    %c0_37 = arith.constant 0 : index
    %133 = vector.load %arg7[%c0_36, %c0_37] : memref<1x128xf32, #tpu.memory_space<vmem>>, vector<1x128xf32>
    %134 = vector.shape_cast %133 : vector<1x128xf32> to vector<128xf32>
    %c0_38 = arith.constant 0 : index
    %c0_39 = arith.constant 0 : index
    %135 = vector.load %arg8[%c0_38, %c0_39] : memref<1x128xf32, #tpu.memory_space<vmem>>, vector<1x128xf32>
    %136 = vector.shape_cast %135 : vector<1x128xf32> to vector<128xf32>
    %cst_40 = arith.constant dense<0.000000e+00> : vector<128xf32>
    %137 = vector.multi_reduction <add>, %132, %cst_40 [1] : vector<128x128xf32> to vector<128xf32>
    %138 = vector.shape_cast %137 : vector<128xf32> to vector<128x1xf32>
    %cst_41 = arith.constant 1.280000e+02 : f32
    %139 = vector.broadcast %cst_41 : f32 to vector<128x1xf32>
    %140 = arith.divf %138, %139 : vector<128x1xf32>
    %141 = vector.broadcast %140 : vector<128x1xf32> to vector<128x128xf32>
    %142 = arith.subf %132, %141 : vector<128x128xf32>
    %143 = arith.mulf %142, %142 : vector<128x128xf32>
    %cst_42 = arith.constant dense<0.000000e+00> : vector<128xf32>
    %144 = vector.multi_reduction <add>, %143, %cst_42 [1] : vector<128x128xf32> to vector<128xf32>
    %145 = vector.shape_cast %144 : vector<128xf32> to vector<128x1xf32>
    %cst_43 = arith.constant 1.280000e+02 : f32
    %146 = vector.broadcast %cst_43 : f32 to vector<128x1xf32>
    %147 = arith.divf %145, %146 : vector<128x1xf32>
    %148 = vector.broadcast %140 : vector<128x1xf32> to vector<128x128xf32>
    %149 = arith.subf %132, %148 : vector<128x128xf32>
    %cst_44 = arith.constant 9.99999974E-6 : f32
    %150 = vector.broadcast %cst_44 : f32 to vector<128x1xf32>
    %151 = arith.addf %147, %150 : vector<128x1xf32>
    %152 = math.rsqrt %151 : vector<128x1xf32>
    %153 = vector.broadcast %152 : vector<128x1xf32> to vector<128x128xf32>
    %154 = arith.mulf %149, %153 : vector<128x128xf32>
    %155 = vector.shape_cast %134 : vector<128xf32> to vector<1x128xf32>
    %156 = vector.broadcast %155 : vector<1x128xf32> to vector<128x128xf32>
    %157 = arith.mulf %154, %156 : vector<128x128xf32>
    %158 = vector.shape_cast %136 : vector<128xf32> to vector<1x128xf32>
    %159 = vector.broadcast %158 : vector<1x128xf32> to vector<128x128xf32>
    %160 = arith.addf %157, %159 : vector<128x128xf32>
    %161 = arith.truncf %160 : vector<128x128xf32> to vector<128x128xbf16>
    %c0_45 = arith.constant 0 : index
    %c0_46 = arith.constant 0 : index
    %162 = vector.load %arg9[%c0_45, %c0_46] : memref<128x512xbf16, #tpu.memory_space<vmem>>, vector<128x512xbf16>
    %cst_47 = arith.constant dense<0.000000e+00> : vector<128x512xf32>
    %163 = tpu.matmul %161, %162, %cst_47 {dimension_numbers = #tpu.dot_dimension_numbers<[1], [0], [0], [1], [0, 0, 1, 1], [], []>} : vector<128x128xbf16>, vector<128x512xbf16>, vector<128x512xf32> -> vector<128x512xf32>
    %c0_48 = arith.constant 0 : index
    %c0_49 = arith.constant 0 : index
    %164 = vector.load %arg10[%c0_48, %c0_49] : memref<1x512xf32, #tpu.memory_space<vmem>>, vector<1x512xf32>
    %165 = vector.shape_cast %164 : vector<1x512xf32> to vector<512xf32>
    %166 = vector.shape_cast %165 : vector<512xf32> to vector<1x512xf32>
    %167 = vector.broadcast %166 : vector<1x512xf32> to vector<128x512xf32>
    %168 = arith.addf %163, %167 : vector<128x512xf32>
    %cst_50 = arith.constant 0.000000e+00 : f32
    %169 = vector.broadcast %cst_50 : f32 to vector<128x512xf32>
    %170 = arith.maximumf %168, %169 : vector<128x512xf32>
    %171 = arith.truncf %170 : vector<128x512xf32> to vector<128x512xbf16>
    %c0_51 = arith.constant 0 : index
    %c0_52 = arith.constant 0 : index
    %172 = vector.load %arg11[%c0_51, %c0_52] : memref<512x128xbf16, #tpu.memory_space<vmem>>, vector<512x128xbf16>
    %cst_53 = arith.constant dense<0.000000e+00> : vector<128x128xf32>
    %173 = tpu.matmul %171, %172, %cst_53 {dimension_numbers = #tpu.dot_dimension_numbers<[1], [0], [0], [1], [0, 0, 1, 1], [], []>} : vector<128x512xbf16>, vector<512x128xbf16>, vector<128x128xf32> -> vector<128x128xf32>
    %c0_54 = arith.constant 0 : index
    %c0_55 = arith.constant 0 : index
    %174 = vector.load %arg12[%c0_54, %c0_55] : memref<1x128xf32, #tpu.memory_space<vmem>>, vector<1x128xf32>
    %175 = vector.shape_cast %174 : vector<1x128xf32> to vector<128xf32>
    %176 = vector.shape_cast %175 : vector<128xf32> to vector<1x128xf32>
    %177 = vector.broadcast %176 : vector<1x128xf32> to vector<128x128xf32>
    %178 = arith.addf %173, %177 : vector<128x128xf32>
    %179 = arith.addf %132, %178 : vector<128x128xf32>
    %180 = vector.shape_cast %179 : vector<128x128xf32> to vector<2x64x128xf32>
    %c0_56 = arith.constant 0 : index
    %c0_57 = arith.constant 0 : index
    %c0_58 = arith.constant 0 : index
    %181 = vector.load %arg13[%c0_56, %c0_57, %c0_58] : memref<2x64x128xf32, #tpu.memory_space<vmem>>, vector<2x64x128xf32>
    tpu.vector_store %arg13[%c0_56, %c0_57, %c0_58], %180 {strides = array<i32>} : memref<2x64x128xf32, #tpu.memory_space<vmem>>, vector<2x64x128xf32>,
    return
  }
  func.func @transform_0(%arg0: i32) -> (i32, i32, i32) {
    %c0_i32 = arith.constant 0 : i32
    %c0_i32_0 = arith.constant 0 : i32
    %c0_i32_1 = arith.constant 0 : i32
    return %arg0, %c0_i32, %c0_i32_0 : i32, i32, i32
  }
  func.func @transform_1(%arg0: i32) -> (i32, i32) {
    %c0_i32 = arith.constant 0 : i32
    %c0_i32_0 = arith.constant 0 : i32
    %c0_i32_1 = arith.constant 0 : i32
    return %c0_i32, %c0_i32_0 : i32, i32
  }
  func.func @transform_2(%arg0: i32) -> (i32, i32) {
    %c0_i32 = arith.constant 0 : i32
    %c0_i32_0 = arith.constant 0 : i32
    %c0_i32_1 = arith.constant 0 : i32
    return %c0_i32, %c0_i32_0 : i32, i32
  }
  func.func @transform_3(%arg0: i32) -> (i32, i32) {
    %c0_i32 = arith.constant 0 : i32
    %c0_i32_0 = arith.constant 0 : i32
    %c0_i32_1 = arith.constant 0 : i32
    return %c0_i32, %c0_i32_0 : i32, i32
  }
  func.func @transform_4(%arg0: i32) -> (i32, i32) {
    %c0_i32 = arith.constant 0 : i32
    %c0_i32_0 = arith.constant 0 : i32
    %c0_i32_1 = arith.constant 0 : i32
    return %c0_i32, %c0_i32_0 : i32, i32
  }
  func.func @transform_5(%arg0: i32) -> (i32, i32) {
    %c0_i32 = arith.constant 0 : i32
    %c0_i32_0 = arith.constant 0 : i32
    %c0_i32_1 = arith.constant 0 : i32
    return %c0_i32, %c0_i32_0 : i32, i32
  }
  func.func @transform_6(%arg0: i32) -> (i32, i32) {
    %c0_i32 = arith.constant 0 : i32
    %c0_i32_0 = arith.constant 0 : i32
    %c0_i32_1 = arith.constant 0 : i32
    return %c0_i32, %c0_i32_0 : i32, i32
  }
  func.func @transform_7(%arg0: i32) -> (i32, i32) {
    %c0_i32 = arith.constant 0 : i32
    %c0_i32_0 = arith.constant 0 : i32
    %c0_i32_1 = arith.constant 0 : i32
    return %c0_i32, %c0_i32_0 : i32, i32
  }
  func.func @transform_8(%arg0: i32) -> (i32, i32) {
    %c0_i32 = arith.constant 0 : i32
    %c0_i32_0 = arith.constant 0 : i32
    %c0_i32_1 = arith.constant 0 : i32
    return %c0_i32, %c0_i32_0 : i32, i32
  }
  func.func @transform_9(%arg0: i32) -> (i32, i32) {
    %c0_i32 = arith.constant 0 : i32
    %c0_i32_0 = arith.constant 0 : i32
    %c0_i32_1 = arith.constant 0 : i32
    return %c0_i32, %c0_i32_0 : i32, i32
  }
  func.func @transform_10(%arg0: i32) -> (i32, i32) {
    %c0_i32 = arith.constant 0 : i32
    %c0_i32_0 = arith.constant 0 : i32
    %c0_i32_1 = arith.constant 0 : i32
    return %c0_i32, %c0_i32_0 : i32, i32
  }
  func.func @transform_11(%arg0: i32) -> (i32, i32) {
    %c0_i32 = arith.constant 0 : i32
    %c0_i32_0 = arith.constant 0 : i32
    %c0_i32_1 = arith.constant 0 : i32
    return %c0_i32, %c0_i32_0 : i32, i32
  }
  func.func @transform_12(%arg0: i32) -> (i32, i32, i32) {
    %c0_i32 = arith.constant 0 : i32
    %c0_i32_0 = arith.constant 0 : i32
    %c0_i32_1 = arith.constant 0 : i32
    return %arg0, %c0_i32, %c0_i32_0 : i32, i32, i32
  }
}

</mosaic_0001>

<bundles_post_ra>
// kernel: tpu_custom_call.1
= control target key start
LH: loop header
LB: loop body
LE: loop exit
PB: predicated region body
PF: predicated region fallthrough
CT: control target
= control target key end

     0   :  { %s9078_s0 = inlined_call_operand.hbm [shape: f32[4,64,128], index: 0, kind: input, shape index: {}]   ;;  %s9079_s1 = inlined_call_operand.hbm [shape: f32[1,128], index: 1, kind: input, shape index: {}]   ;;  %s9080_s2 = inlined_call_operand.vmem [shape: f32[1,128], index: 2, kind: input, shape index: {}]   ;;  %s9081_s3 = inlined_call_operand.hbm [shape: bf16[128,384], index: 3, kind: input, shape index: {}]   ;;  %s9082_s4 = inlined_call_operand.hbm [shape: bf16[128,128], index: 4, kind: input, shape index: {}]   ;;  %s9083_s5 = inlined_call_operand.vmem [shape: f32[1,128], index: 5, kind: input, shape index: {}]   ;;  %s9084_s6 = inlined_call_operand.vmem [shape: f32[1,128], index: 6, kind: input, shape index: {}]   ;;  %s9085_s7 = inlined_call_operand.hbm [shape: f32[1,128], index: 7, kind: input, shape index: {}]   ;;  %s9086_s8 = inlined_call_operand.hbm [shape: bf16[128,512], index: 8, kind: input, shape index: {}]   ;;  %s9087_s9 = inlined_call_operand.vmem [shape: f32[1,512], index: 9, kind: input, shape index: {}]   ;;  %s9088_s10 = inlined_call_operand.hbm [shape: bf16[512,128], index: 10, kind: input, shape index: {}]   ;;  %s9089_s11 = inlined_call_operand.vmem [shape: f32[1,128], index: 11, kind: input, shape index: {}]   ;;  %s9090_s12 = inlined_call_operand.hbm [shape: f32[4,64,128], index: 12, kind: output, shape index: {}]  }
   0x1   :  { %9102 = sst [smem:[#allocation35_spill]] %s9079_s1 }
   0x2   :  { %9103 = sst [smem:[#allocation36_spill]] %s9081_s3 }
   0x3   :  { %9104 = sst [smem:[#allocation37_spill]] %s9082_s4 }
   0x4   :  { %9105 = sst [smem:[#allocation38_spill]] %s9085_s7 }
   0x5   :  { %9106 = sst [smem:[#allocation39_spill]] %s9086_s8 }
   0x6   :  { %9107 = sst [smem:[#allocation40_spill]] %s9088_s10 }
   0x7   :  { %9108 = sst [smem:[#allocation41_spill]] %s9090_s12 }
   0x8   :  { %17 = vsyncpa [#allocation3], 0 }
   0x9   :  { %19 = vsyncpa [#allocation3 + $0x1], 0 }
   0xa   :  { %20 = vsyncpa [#allocation6], 0 }
   0xb   :  { %21 = vsyncpa [#allocation9], 0 }
   0xc   :  { %22 = vsyncpa [#allocation12], 0 }
   0xd   :  { %23 = vsyncpa [#allocation4], 0 }
   0xe   :  { %25 = vsyncpa [#allocation4 + $0x1], 0  ;;  %s6709_s21 = smov 0   ;;  %s6711_s22 = smov 0  }
   0xf   :  { %s6713_s23 = smov 0   ;;  %s6715_s24 = smov 0  }
  0x10 LB: > { %s9109_s1 = sld [smem:[#allocation35_spill]]  ;;  %s6733_s28 = sadd.s32 4294967295, %s6621_s24   ;;  %s6621_s24 = sphi %s6715_s24, %s9173_s24   ;;  %s6617_s23 = sphi %s6713_s23, %s9172_s23   ;;  %s6613_s22 = sphi %s6711_s22, %s9171_s22   ;;  %s6609_s21 = sphi %s6709_s21, %s9170_s21  }
  0x11   : > { %p5164_p0 = scmp.ge.s32.totalorder %s6621_s24, 1  ;;  %p52_p1 = scmp.eq.s32.totalorder %s6733_s28, 0 }
  0x12   : > { %p319_p2 = scmp.lt.s32.totalorder %s6621_s24, 3  ;;  %s6623_s30 = smov [#allocation5]  }
  0x13   : > { %s333_s13 = sshll.u32 %s6623_s30, 4  ;;  %s9111_s4 = sld [smem:[#allocation37_spill]]  ;;  %s334_s13 = int_to_ptr.vmem [resolvable:$true] %s333_s13 }
  0x14   : > { %p6738_p3 = pnand %p5164_p0, %p319_p2  ;;  %s6624_s18 = smov [#allocation8]  }
  0x15   : > { %s361_s19 = sshll.u32 %s6624_s18, 4  ;;  %s6625_s20 = smov 64   ;;  %s362_s19 = int_to_ptr.vmem [resolvable:$true] %s361_s19 }
  0x16   : > { %s331_s27 = sshll.u32 %s9109_s1, 4  ;;  %p5775_p5 = pneg %p6738_p3  ;;  %s332_s27 = int_to_ptr.hbm [resolvable:$true] %s331_s27 }
  0x17   : > { %s6626_s25 = smov 4   ;;  %s9113_s8 = sld [smem:[#allocation39_spill]] }
  0x18   : > { %p6750_p6 = pnand %p5775_p5, %p52_p1  ;;  %s6627_s15 = smov [#allocation11]  }
  0x19   : > { %s359_s16 = sshll.u32 %s9111_s4, 4  ;;  %s393_s1 = sshll.u32 %s6627_s15, 4  ;;  %s360_s16 = int_to_ptr.hbm [resolvable:$true] %s359_s16  ;;  %s394_s1 = int_to_ptr.vmem [resolvable:$true] %s393_s1 }
  0x1a   : > { %5778 = dma.hbm_to_vmem [thread:$0]  (!%p6750_p6), %s332_s27, 16, %s334_s13, [#allocation6]  }
  0x1b   : > { %5784 = dma.hbm_to_vmem [thread:$0]  (!%p6750_p6), %s360_s16, 1024, %s362_s19, [#allocation9], %s6625_s20, %s6625_s20, %s6626_s25  }
  0x1c   : > { %s9114_s3 = sld [smem:[#allocation36_spill]]  ;;  %s6628_s13 = smov 256  }
  0x1d   : > { %s391_s14 = sshll.u32 %s9113_s8, 4  ;;  %s6629_s12 = smov 16   ;;  %s392_s14 = int_to_ptr.hbm [resolvable:$true] %s391_s14 }
  0x1e   : > { %5790 = dma.hbm_to_vmem [thread:$0]  (!%p6750_p6), %s392_s14, 4096, %s394_s1, [#allocation12], %s6628_s13, %s6628_s13, %s6629_s12  }
  0x1f   : > { %s6630_s16 = smov [#allocation7]   ;;  %s6631_s26 = smov 192  }
  0x20   : > { %s347_s19 = sshll.u32 %s6630_s16, 4  ;;  %s6632_s30 = smov 12   ;;  %s348_s19 = int_to_ptr.vmem [resolvable:$true] %s347_s19 }
  0x21   : > { %s9115_s7 = sld [smem:[#allocation38_spill]]  ;;  %s6633_s1 = smov [#allocation10]  }
  0x22   : > { %s345_s27 = sshll.u32 %s9114_s3, 4  ;;  %s382_s12 = sshll.u32 %s6633_s1, 4  ;;  %s346_s27 = int_to_ptr.hbm [resolvable:$true] %s345_s27  ;;  %s383_s12 = int_to_ptr.vmem [resolvable:$true] %s382_s12 }
  0x23   : > { %5781 = dma.hbm_to_vmem [thread:$0]  (!%p6750_p6), %s346_s27, 3072, %s348_s19, [#allocation6], %s6631_s26, %s6631_s26, %s6632_s30  }
  0x24   : > { %s9116_s10 = sld [smem:[#allocation40_spill]]  ;;  %s6634_s27 = smov [#allocation13]  }
  0x25   : > { %s410_s19 = sshll.u32 %s6634_s27, 4  ;;  %s5163_s26 = sadd.s32 4294967294, %s6621_s24   ;;  %s411_s19 = int_to_ptr.vmem [resolvable:$true] %s410_s19 }
  0x26   : > { %s6786_s30 = sadd.s32 1, %s6621_s24   ;;  %s38_s4 = sadd.s32 1, %s6617_s23 }
  0x27   : > { %s380_s18 = sshll.u32 %s9115_s7, 4  ;;  %s35_s15 = ssub.s32 %s6621_s24, %s6786_s30  ;;  %s381_s18 = int_to_ptr.hbm [resolvable:$true] %s380_s18 }
  0x28   : > { %5787 = dma.hbm_to_vmem [thread:$0]  (!%p6750_p6), %s381_s18, 16, %s383_s12, [#allocation9]  }
  0x29   : > { %p36_p7 = scmp.eq.s32.totalorder %s35_s15, 0  ;;  %p45_p8 = scmp.ne.s32.totalorder %s6617_s23, %s6613_s22 }
  0x2a   : > { %s408_s16 = sshll.u32 %s9116_s10, 4  ;;  %p46_p9 = scmp.eq.s32.totalorder %s6621_s24, 0  ;;  %s409_s16 = int_to_ptr.hbm [resolvable:$true] %s408_s16 }
  0x2b   : > { %5793 = dma.hbm_to_vmem [thread:$0]  (!%p6750_p6), %s409_s16, 4096, %s411_s19, [#allocation12], %s6625_s20, %s6625_s20, %s6626_s25  }
  0x2c   : > { %p51_p10 = scmp.ne.s32.totalorder %s6613_s22, %s6609_s21  ;;  %p6799_p11 = por %p46_p9, %p45_p8 }
  0x2d   : > { %s6797_s18 = scalar_select %p36_p7, %s6617_s23, %s38_s4  }
  0x2e   : > { %p6805_p12 = por %p52_p1, %p51_p10  ;;  %p306_p13 = scmp.eq.s32.totalorder %s6733_s28, 1 }
  0x2f   : > { %p312_p0 = scmp.eq.s32.totalorder %s5163_s26, 1  ;;  %p5808_p2 = scmp.lt.s32.totalorder %s6621_s24, 2 }
  0x30   : > { %s427_s25 = sand.u32 1, %s6617_s23   ;;  %p6812_p5 = por %p306_p13, %p45_p8 }
  0x31   : > { %p6816_p6 = por %p312_p0, %p51_p10  ;;  %s5172_s14 = sshll.u32 %s427_s25, 7 }
  0x32   : > { %s5640_s13 = sshll.u32 %s6621_s24, 7  ;;  %s431_s15 = scalar_lea.vmem [#allocation2], %s5172_s14 }
  0x33   : > { %s437_s19 = scalar_lea.hbm %s9078_s0, %s5640_s13  ;;  %s440_s4 = sshll.u32 %s431_s15, 4  ;;  %s441_s4 = int_to_ptr.vmem [resolvable:$true] %s440_s4 }
  0x34   : > { %s438_s3 = sshll.u32 %s437_s19, 4  ;;  %p6826_p7 = pnand %p5808_p2, %p6799_p11  ;;  %s439_s3 = int_to_ptr.hbm [resolvable:$true] %s438_s3 }
  0x35   : > { %s428_s7 = scalar_lea.sflag [#allocation3], %s427_s25  ;;  %s6513_s8 = sshra.s32 %s439_s3, 4  ;;  %s6514_s8 = int_to_ptr.hbm [resolvable:$true] %s6513_s8 }
  0x36   : > { %s6515_s10 = scalar_lea.hbm %s6514_s8, 128  ;;  %p6517_p9 = pneg %p6826_p7 }
  0x37   : > { %p6516_p8 = scmp.ne.s32.totalorder %s6514_s8, %s6515_s10  ;;  %s6520_s16 = scalar_lea.hbm %s9078_s0, 256 }
  0x38   : > { %p6521_p11 = scmp.lt.s32.totalorder %s6514_s8, %s9078_s0  ;;  %p6522_p0 = scmp.lt.s32.totalorder %s6520_s16, %s6515_s10 }
  0x39   : > { %p6518_p10 = pnand %p6517_p9, %p6516_p8 }
  0x3a   : > { %p6523_p2 = por %p6522_p0, %p6521_p11 }
  0x3b   : > { %p6519_p13 = pneg %p6518_p10 }
  0x3d   : > { %p6524_p4 = pnand %p6523_p2, %p6519_p13 }
  0x3f   : > { %6527 = shalt.err (!%p6524_p4)
}
  0x40   : > { %s6635_s25 = smov 128   ;;  %s6636_s19 = smov 8  }
  0x41   : > { %5797 = dma.hbm_to_vmem [thread:$0]  (!%p6826_p7), %s439_s3, 2048, %s441_s4, %s428_s7, %s6635_s25, %s6635_s25, %s6636_s19  }
  0x42   : > { %452 = sbr.rel (%p6738_p3) target bundleno = 2519 (0x9d7), region = 68 }
  0x47   : > { %s6843_s15 = sand.u32 1, %s6613_s22  }
  0x48   : > { %s5177_s8 = sshll.u32 %s6843_s15, 7  ;;  %s455_s10 = scalar_lea.sflag [#allocation3], %s6843_s15 }
  0x49   : > { %s6849_s14 = scalar_lea.vmem [#allocation2], %s5177_s8 }
  0x4a   : > { %6588 = dma.done.wait (%p6805_p12), %s455_s10, 2048  }
  0x4b   : > { %6590 = vsyncadd (%p6805_p12), %s455_s10, 4294965248 }
  0x4c   : > { %6592 = dma.done.wait (%p52_p1), [#allocation6], 3088  }
  0x4d   : > { %6594 = vsyncadd (%p52_p1), [#allocation6], 4294964208 }
  0x4e   : > { %6596 = dma.done.wait (%p52_p1), [#allocation9], 1040  }
  0x4f   : > { %6598 = vsyncadd (%p52_p1), [#allocation9], 4294966256 }
  0x50   : > { %6600 = dma.done.wait (%p52_p1), [#allocation12], 8192  }
  0x51   : > { %6602 = vsyncadd (%p52_p1), [#allocation12], 4294959104  ;;  %v535_v0 = vld [vmem:[%s6849_s14 + $0x10] sm:$0xff]  ;;  %v533_v1 = vld [vmem:[%s6849_s14] sm:$0xff]  ;;  %v6637_v8 = vmov 128.0   ;;  %s6638_s29 = smov 64  }
  0x52   : > { %555 = vadd.xlane.f32.xlu1 %v535_v0  ;;  %551 = vadd.xlane.f32.xlu0 %v533_v1  ;;  %v537_v2 = vld [vmem:[%s6849_s14 + $0x20] sm:$0xff]  ;;  %v536_v3 = vld [vmem:[%s6849_s14 + $0x18] sm:$0xff]  ;;  %v534_v4 = vld [vmem:[%s6849_s14 + $0x8] sm:$0xff]  ;;  %5995 = vrcp.f32 %v6637_v8  ;;  %s6639_s20 = smov 96   ;;  %s6640_s4 = smov 32  }
  0x53   : > { %559 = vadd.xlane.f32.xlu2 %v537_v2  ;;  %v538_v5 = vld [vmem:[%s6849_s14 + $0x28] sm:$0xff]  ;;  %v539_v6 = vld [vmem:[%s6849_s14 + $0x30] sm:$0xff]  ;;  %v544_v7 = vld [vmem:[%s6849_s14 + $0x58] sm:$0xff] }
  0x54   : > { %v6891_v29 = vld [vmem:[%s6849_s14 + $0x38] sm:$0xff]  ;;  %v6906_v37 = vld [vmem:[%s6849_s14 + $0x40] sm:$0xff]  ;;  %v6920_v44 = vld [vmem:[%s6849_s14 + $0x48] sm:$0xff] }
  0x55   : > { %v6917_v43 = vld [vmem:[%s6849_s14 + $0x60] sm:$0xff]  ;;  %v6929_v47 = vld [vmem:[%s6849_s14 + $0x50] sm:$0xff]  ;;  %v6933_v48 = vld [vmem:[%s6849_s14 + $0x68] sm:$0xff] }
  0x56   : > { %v6938_v51 = vld [vmem:[%s6849_s14 + $0x70] sm:$0xff]  ;;  %v5271_v54 = vld [vmem:[#allocation7 + $0xa8] sm:$0xf]  ;;  %v5273_v58 = vld [vmem:[#allocation7 + $0xb4] sm:$0xf0] }
  0x57   : > { %v5663_v55 = vld [vmem:[#allocation7 + $0xb0] sm:$0xf0]  ;;  %v5662_v56 = vld [vmem:[#allocation7 + $0xac] sm:$0xf]  ;;  %v5279_v59 = vld [vmem:[#allocation7 + $0xb0] sm:$0xf] }
  0x58   : > { %v5996_v9 = vpop.eup %5995  ;;  %v5272_v57 = vor.u32 %v5663_v55, %v5271_v54  ;;  %v5664_v60 = vld [vmem:[#allocation7 + $0xb8] sm:$0xf0]  ;;  %v5276_v61 = vor.u32 %v5662_v56, %v5273_v58  ;;  %v5259_v63 = vld [vmem:[#allocation7 + $0x90] sm:$0xf]  ;;  %v5247_v8 = vld [vmem:[#allocation7 + $0x78] sm:$0xf] }
  0x59   : > { %v584_v10 = vmul.f32 128.0, %v5996_v9  ;;  %vm588_vm0 = vweird.f32 %v5996_v9  ;;  %v5280_v62 = vor.u32 %v5664_v60, %v5279_v59  ;;  %v5213_v55 = vld [vmem:[#allocation7 + $0x3c] sm:$0xf0]  ;;  %v5219_v56 = vld [vmem:[#allocation7 + $0x38] sm:$0xf] }
  0x5a   : > { %557 = vadd.xlane.f32.xlu1 %v536_v3  ;;  %553 = vadd.xlane.f32.xlu0 %v534_v4  ;;  %v5199_v60 = vld [vmem:[#allocation7 + $0x18] sm:$0xf] }
  0x5b   : > { %561 = vadd.xlane.f32.xlu2 %v538_v5  ;;  %v585_v11 = vsub.f32 1.0, %v584_v10  ;;  %1084 = vmatpush.bf16.msra.mxu0 %v5272_v57  ;;  %v5656_v10 = vld [vmem:[#allocation7 + $0x7c] sm:$0xf]  ;;  %v5649_v57 = vld [vmem:[#allocation7 + $0x40] sm:$0xf0] }
  0x5c   : > { %1133 = vmatpush.bf16.msra.mxu1 %v5276_v61  ;;  %1182 = vmatpush.bf16.msra.mxu2 %v5280_v62  ;;  %v5220_v59 = vor.u32 %v5649_v57, %v5219_v56  ;;  %v5645_v61 = vld [vmem:[#allocation7 + $0x20] sm:$0xf0] }
  0x5d   : > { %v586_v12 = vmul.f32 %v5996_v9, %v585_v11  ;;  %5739 = vmatpush.bf16.msra.mxu3 %v5280_v62  ;;  %v5644_v62 = vld [vmem:[#allocation7 + $0x1c] sm:$0xf] }
  0x5f   : > { %v587_v13 = vadd.f32 %v5996_v9, %v586_v12  ;;  %v5249_v12 = vld [vmem:[#allocation7 + $0x84] sm:$0xf0] }
  0x61   : > { %v6875_v14 = vsel %vm588_vm0, %v5996_v9, %v587_v13  ;;  %v5657_v9 = vld [vmem:[#allocation7 + $0x80] sm:$0xf0]  ;;  %v5255_v13 = vld [vmem:[#allocation7 + $0x80] sm:$0xf] }
  0x62   : > { %9122 = vst [vmem:[#allocation20_spill] sm:$0xff] %v6875_v14  ;;  %v5248_v11 = vor.u32 %v5657_v9, %v5247_v8  ;;  %v5187_v8 = vld [vmem:[#allocation7] sm:$0xf]  ;;  %v5642_v9 = vld [vmem:[#allocation7 + $0x8] sm:$0xf0] }
  0x63   : > { %563 = vadd.xlane.f32.xlu2 %v539_v6 }
  0x6b   : > { %573 = vadd.xlane.f32.xlu2 %v544_v7 }
  0xc5   : > { %v556_v15 = vpop.xlane.xlu1 %555  ;;  %v552_v16 = vpop.xlane.xlu0 %551 }
  0xc6   : > { %v590_v17 = vmul.f32 %v6875_v14, %v552_v16  ;;  %v560_v19 = vpop.xlane.xlu2 %559  ;;  %v592_v28 = vmul.f32 %v6875_v14, %v556_v15  ;;  %v5658_v15 = vld [vmem:[#allocation7 + $0x88] sm:$0xf0]  ;;  %v5252_v16 = vor.u32 %v5656_v10, %v5249_v12  ;;  %v5188_v10 = vor.u32 %v5642_v9, %v5187_v8  ;;  %v5189_v12 = vld [vmem:[#allocation7 + $0xc] sm:$0xf0] }
  0xc7   : > { %v594_v27 = vmul.f32 %v6875_v14, %v560_v19  ;;  %v5235_v19 = vld [vmem:[#allocation7 + $0x60] sm:$0xf] }
  0xc8   : > { %v6878_v18 = vsub.f32 %v533_v1, %v590_v17  ;;  %v6900_v34 = vsub.f32 %v535_v0, %v592_v28  ;;  %v5660_v0 = vld [vmem:[#allocation7 + $0x98] sm:$0xf0]  ;;  %v5659_v1 = vld [vmem:[#allocation7 + $0x94] sm:$0xf]  ;;  %v5256_v17 = vor.u32 %v5658_v15, %v5255_v13  ;;  %v5195_v13 = vld [vmem:[#allocation7 + $0x8] sm:$0xf] }
  0xc9   : > { %v6898_v33 = vsub.f32 %v537_v2, %v594_v27  ;;  %v5260_v2 = vor.u32 %v5660_v0, %v5259_v63  ;;  %v5655_v27 = vld [vmem:[#allocation7 + $0x70] sm:$0xf0]  ;;  %v5200_v0 = vor.u32 %v5645_v61, %v5199_v60 }
  0xca   : > { %v622_v20 = vmul.f32 %v6878_v18, %v6878_v18  ;;  %v624_v38 = vmul.f32 %v6900_v34, %v6900_v34 }
  0xcb   : > { %v626_v35 = vmul.f32 %v6898_v33, %v6898_v33  ;;  %1085 = vmatpush.bf16.msra.mxu0 %v5260_v2  ;;  %v5207_v2 = vld [vmem:[#allocation7 + $0x20] sm:$0xf] }
  0xcc   : > { %638 = vadd.xlane.f32.xlu0 %v622_v20  ;;  %v5654_v20 = vld [vmem:[#allocation7 + $0x68] sm:$0xf0] }
  0xcd   : > { %v558_v21 = vpop.xlane.xlu1 %557  ;;  %v554_v22 = vpop.xlane.xlu0 %553 }
  0xce   : > { %v593_v23 = vmul.f32 %v6875_v14, %v558_v21  ;;  %v591_v24 = vmul.f32 %v6875_v14, %v554_v22  ;;  %v562_v32 = vpop.xlane.xlu2 %561  ;;  %v5653_v21 = vld [vmem:[#allocation7 + $0x64] sm:$0xf]  ;;  %v5236_v22 = vor.u32 %v5654_v20, %v5235_v19 }
  0xcf   : > { %v595_v36 = vmul.f32 %v6875_v14, %v562_v32  ;;  %1086 = vmatpush.bf16.msra.mxu0 %v5248_v11  ;;  %v5651_v32 = vld [vmem:[#allocation7 + $0x50] sm:$0xf0]  ;;  %v5641_v11 = vld [vmem:[#allocation7 + $0x4] sm:$0xf] }
  0xd0   : > { %v6884_v25 = vsub.f32 %v536_v3, %v593_v23  ;;  %v6886_v26 = vsub.f32 %v534_v4, %v591_v24  ;;  %v5261_v3 = vld [vmem:[#allocation7 + $0x9c] sm:$0xf0]  ;;  %v5267_v4 = vld [vmem:[#allocation7 + $0x98] sm:$0xf]  ;;  %v5237_v23 = vld [vmem:[#allocation7 + $0x6c] sm:$0xf0]  ;;  %v5192_v15 = vor.u32 %v5641_v11, %v5189_v12 }
  0xd1   : > { %v6911_v39 = vsub.f32 %v538_v5, %v595_v36  ;;  %v5661_v5 = vld [vmem:[#allocation7 + $0xa0] sm:$0xf0]  ;;  %v5243_v24 = vld [vmem:[#allocation7 + $0x68] sm:$0xf]  ;;  %v5240_v28 = vor.u32 %v5653_v21, %v5237_v23 }
  0xd2   : > { %v625_v30 = vmul.f32 %v6884_v25, %v6884_v25  ;;  %v623_v31 = vmul.f32 %v6886_v26, %v6886_v26 }
  0xd3   : > { %v627_v41 = vmul.f32 %v6911_v39, %v6911_v39  ;;  %1087 = vmatpush.bf16.msra.mxu0 %v5236_v22 }
  0xd4   : > { %644 = vadd.xlane.f32.xlu2 %v625_v30  ;;  %565 = vadd.xlane.f32.xlu0 %v6891_v29  ;;  %v5244_v30 = vor.u32 %v5655_v27, %v5243_v24 }
  0xd5   : > { %640 = vadd.xlane.f32.xlu1 %v623_v31  ;;  %v5223_v31 = vld [vmem:[#allocation7 + $0x48] sm:$0xf] }
  0xd6   : > { %v564_v40 = vpop.xlane.xlu2 %563  ;;  %v5224_v36 = vor.u32 %v5651_v32, %v5223_v31 }
  0xd7   : > { %v596_v42 = vmul.f32 %v6875_v14, %v564_v40  ;;  %v5231_v40 = vld [vmem:[#allocation7 + $0x50] sm:$0xf] }
  0xd8   : > { %1088 = vmatpush.bf16.msra.mxu0 %v5224_v36 }
  0xd9   : > { %v6923_v45 = vsub.f32 %v539_v6, %v596_v42  ;;  %v5264_v6 = vor.u32 %v5659_v1, %v5261_v3  ;;  %v5201_v1 = vld [vmem:[#allocation7 + $0x24] sm:$0xf0] }
  0xdb   : > { %v628_v46 = vmul.f32 %v6923_v45, %v6923_v45  ;;  %1134 = vmatpush.bf16.msra.mxu1 %v5264_v6 }
  0xdc   : > { %646 = vadd.xlane.f32.xlu2 %v626_v35  ;;  %567 = vadd.xlane.f32.xlu0 %v6906_v37  ;;  %v5650_v35 = vld [vmem:[#allocation7 + $0x4c] sm:$0xf] }
  0xdd   : > { %642 = vadd.xlane.f32.xlu1 %v624_v38  ;;  %v5225_v38 = vld [vmem:[#allocation7 + $0x54] sm:$0xf0] }
  0xde   : > { %v574_v49 = vpop.xlane.xlu2 %573  ;;  %v5228_v42 = vor.u32 %v5650_v35, %v5225_v38 }
  0xdf   : > { %v601_v50 = vmul.f32 %v6875_v14, %v574_v49  ;;  %1135 = vmatpush.bf16.msra.mxu1 %v5252_v16  ;;  %v5211_v49 = vld [vmem:[#allocation7 + $0x30] sm:$0xf]  ;;  %v5643_v16 = vld [vmem:[#allocation7 + $0x10] sm:$0xf0] }
  0xe1   : > { %v6941_v52 = vsub.f32 %v544_v7, %v601_v50  ;;  %v5268_v7 = vor.u32 %v5661_v5, %v5267_v4  ;;  %v5648_v50 = vld [vmem:[#allocation7 + $0x38] sm:$0xf0]  ;;  %v5204_v4 = vor.u32 %v5644_v62, %v5201_v1  ;;  %v5646_v5 = vld [vmem:[#allocation7 + $0x28] sm:$0xf0] }
  0xe2   : > { %v5212_v54 = vor.u32 %v5648_v50, %v5211_v49  ;;  %v5208_v6 = vor.u32 %v5646_v5, %v5207_v2 }
  0xe3   : > { %v633_v53 = vmul.f32 %v6941_v52, %v6941_v52  ;;  %1183 = vmatpush.bf16.msra.mxu2 %v5268_v7  ;;  %5740 = vmatpush.bf16.msra.mxu3 %v5268_v7 }
  0xe4   : > { %648 = vadd.xlane.f32.xlu0 %v627_v41  ;;  %575 = vadd.xlane.f32.xlu2 %v6917_v43  ;;  %v5652_v41 = vld [vmem:[#allocation7 + $0x58] sm:$0xf0] }
  0xe5   : > { %569 = vadd.xlane.f32.xlu1 %v6920_v44  ;;  %1136 = vmatpush.bf16.msra.mxu1 %v5240_v28 }
  0xe6   : > { %1089 = vmatpush.bf16.msra.mxu0 %v5212_v54 }
  0xe7   : > { %1184 = vmatpush.bf16.msra.mxu2 %v5256_v17  ;;  %5741 = vmatpush.bf16.msra.mxu3 %v5256_v17  ;;  %v5196_v17 = vor.u32 %v5643_v16, %v5195_v13 }
  0xe9   : > { %1137 = vmatpush.bf16.msra.mxu1 %v5228_v42 }
  0xea   : > { %1090 = vmatpush.bf16.msra.mxu0 %v5200_v0 }
  0xeb   : > { %1185 = vmatpush.bf16.msra.mxu2 %v5244_v30  ;;  %5742 = vmatpush.bf16.msra.mxu3 %v5244_v30 }
  0xec   : > { %650 = vadd.xlane.f32.xlu0 %v628_v46  ;;  %v5232_v46 = vor.u32 %v5652_v41, %v5231_v40 }
  0xed   : > { %571 = vadd.xlane.f32.xlu1 %v6929_v47 }
  0xee   : > { %1091 = vmatpush.bf16.msra.mxu0 %v5188_v10 }
  0xef   : > { %1186 = vmatpush.bf16.msra.mxu2 %v5232_v46  ;;  %5743 = vmatpush.bf16.msra.mxu3 %v5232_v46 }
  0xf3   : > { %1187 = vmatpush.bf16.msra.mxu2 %v5220_v59  ;;  %5744 = vmatpush.bf16.msra.mxu3 %v5220_v59 }
  0xf4   : > { %577 = vadd.xlane.f32.xlu0 %v6933_v48 }
  0xf7   : > { %1188 = vmatpush.bf16.msra.mxu2 %v5208_v6  ;;  %5745 = vmatpush.bf16.msra.mxu3 %v5208_v6 }
  0xfb   : > { %1189 = vmatpush.bf16.msra.mxu2 %v5196_v17  ;;  %5746 = vmatpush.bf16.msra.mxu3 %v5196_v17 }
  0xfc   : > { %579 = vadd.xlane.f32.xlu0 %v6938_v51 }
 0x104   : > { %660 = vadd.xlane.f32.xlu0 %v633_v53  ;;  %v5647_v53 = vld [vmem:[#allocation7 + $0x34] sm:$0xf] }
 0x105   : > { %v5216_v58 = vor.u32 %v5647_v53, %v5213_v55 }
 0x107   : > { %1138 = vmatpush.bf16.msra.mxu1 %v5216_v58 }
 0x10b   : > { %1139 = vmatpush.bf16.msra.mxu1 %v5204_v4 }
 0x10f   : > { %1140 = vmatpush.bf16.msra.mxu1 %v5192_v15  ;;  %v6992_v15 = vld [vmem:[#allocation5] ss:$0 sm:$0xff] }
 0x13f   : > { %v639_v63 = vpop.xlane.xlu0 %638 }
 0x140   : > { %v670_v3 = vmul.f32 %v639_v63, %v6875_v14 }
 0x142   : > { %v686_v7 = vadd.f32 1e-05, %v670_v3 }
 0x144   : > { %5997 = vrsqrt.f32 %v686_v7  ;;  %vm708_vm2 = vweird.f32 %v686_v7 }
 0x147   : > { %v645_v19 = vpop.xlane.xlu2 %644  ;;  %v566_v20 = vpop.xlane.xlu0 %565 }
 0x148   : > { %v673_v21 = vmul.f32 %v645_v19, %v6875_v14  ;;  %v641_v22 = vpop.xlane.xlu1 %640  ;;  %v597_v23 = vmul.f32 %v6875_v14, %v566_v20  ;;  %v6997_v19 = vld [vmem:[%s6849_s14 + $0x78] sm:$0xff] }
 0x149   : > { %v671_v24 = vmul.f32 %v641_v22, %v6875_v14 }
 0x14a   : > { %v5998_v27 = vpop.eup %5997  ;;  %v6949_v28 = vadd.f32 1e-05, %v673_v21  ;;  %v6952_v30 = vsub.f32 %v6891_v29, %v597_v23 }
 0x14b   : > { %v703_v31 = vmul.f32 %v5998_v27, %v686_v7  ;;  %v687_v32 = vadd.f32 1e-05, %v671_v24  ;;  %vm709_vm1 = vweird.f32 %v5998_v27 }
 0x14c   : > { %5999 = vrsqrt.f32 %v6949_v28  ;;  %v629_v35 = vmul.f32 %v6952_v30, %v6952_v30  ;;  %vm6974_vm3 = vmor %vm708_vm2, %vm709_vm1  ;;  %vm738_vm7 = vweird.f32 %v6949_v28 }
 0x14d   : > { %v704_v36 = vmul.f32 %v5998_v27, %v703_v31  ;;  %6001 = vrsqrt.f32 %v687_v32  ;;  %vm718_vm4 = vweird.f32 %v687_v32  ;;  %v7008_v31 = vld [vmem:[%s9080_s2] ss:$0 sm:$0xff] }
 0x14e   : > { %652 = vadd.xlane.f32.xlu1 %v629_v35 }
 0x14f   : > { %v705_v38 = vmul.f32 0.5, %v704_v36  ;;  %v568_v40 = vpop.xlane.xlu0 %567  ;;  %v647_v41 = vpop.xlane.xlu2 %646 }
 0x150   : > { %v643_v42 = vpop.xlane.xlu1 %642  ;;  %v598_v46 = vmul.f32 %v6875_v14, %v568_v40  ;;  %v674_v55 = vmul.f32 %v647_v41, %v6875_v14 }
 0x151   : > { %v706_v49 = vsub.f32 1.5, %v705_v38  ;;  %v672_v29 = vmul.f32 %v643_v42, %v6875_v14 }
 0x152   : > { %v6959_v50 = vpop.eup %5999  ;;  %v6962_v53 = vsub.f32 %v6906_v37, %v598_v46  ;;  %v6972_v37 = vadd.f32 1e-05, %v674_v55 }
 0x153   : > { %v6002_v54 = vpop.eup %6001  ;;  %v6965_v56 = vadd.f32 1e-05, %v672_v29  ;;  %v707_v58 = vmul.f32 %v5998_v27, %v706_v49  ;;  %v733_v59 = vmul.f32 %v6959_v50, %v6949_v28  ;;  %vm739_vm8 = vweird.f32 %v6959_v50 }
 0x154   : > { %v713_v57 = vmul.f32 %v6002_v54, %v687_v32  ;;  %v630_v61 = vmul.f32 %v6962_v53, %v6962_v53  ;;  %vm719_vm5 = vweird.f32 %v6002_v54  ;;  %vm7027_vm11 = vmor %vm738_vm7, %vm739_vm8  ;;  %vm748_vm15 = vweird.f32 %v6972_v37 }
 0x155   : > { %6003 = vrsqrt.f32 %v6965_v56  ;;  %v711_v3 = vsel %vm6974_vm3, %v5998_v27, %v707_v58  ;;  %v734_v4 = vmul.f32 %v6959_v50, %v733_v59  ;;  %vm720_vm6 = vmor %vm718_vm4, %vm719_vm5  ;;  %vm728_vm9 = vweird.f32 %v6965_v56 }
 0x156   : > { %v714_v60 = vmul.f32 %v6002_v54, %v713_v57  ;;  %654 = vadd.xlane.f32.xlu1 %v630_v61  ;;  %6005 = vrsqrt.f32 %v6972_v37  ;;  %v862_v13 = vmul.f32 %v711_v3, %v6878_v18 }
 0x157   : > { %v649_v62 = vpop.xlane.xlu0 %648  ;;  %v576_v8 = vpop.xlane.xlu2 %575  ;;  %v735_v16 = vmul.f32 0.5, %v734_v4 }
 0x158   : > { %v715_v0 = vmul.f32 0.5, %v714_v60  ;;  %v570_v1 = vpop.xlane.xlu1 %569  ;;  %v675_v2 = vmul.f32 %v649_v62, %v6875_v14  ;;  %v602_v20 = vmul.f32 %v6875_v14, %v576_v8  ;;  %v881_v27 = vmul.f32 %v6992_v15, %v862_v13 }
 0x159   : > { %v599_v5 = vmul.f32 %v6875_v14, %v570_v1  ;;  %v736_v35 = vsub.f32 1.5, %v735_v16 }
 0x15a   : > { %v716_v6 = vsub.f32 1.5, %v715_v0  ;;  %v6983_v7 = vadd.f32 1e-05, %v675_v2  ;;  %v900_v29 = vadd.f32 %v7008_v31, %v881_v27 }
 0x15b   : > { %v6004_v9 = vpop.eup %6003  ;;  %v6987_v10 = vsub.f32 %v6920_v44, %v599_v5 }
 0x15c   : > { %v717_v11 = vmul.f32 %v6002_v54, %v716_v6  ;;  %v723_v12 = vmul.f32 %v6004_v9, %v6965_v56  ;;  %6007 = vrsqrt.f32 %v6983_v7  ;;  %v7010_v32 = vpop.eup %6005  ;;  %vm729_vm10 = vweird.f32 %v6004_v9 }
 0x15d   : > { %v631_v17 = vmul.f32 %v6987_v10, %v6987_v10  ;;  %v743_v55 = vmul.f32 %v7010_v32, %v6972_v37  ;;  %vm730_vm12 = vmor %vm728_vm9, %vm729_vm10  ;;  %vm758_vm13 = vweird.f32 %v6983_v7  ;;  %vm749_vm0 = vweird.f32 %v7010_v32 }
 0x15e   : > { %v721_v44 = vsel %vm720_vm6, %v6002_v54, %v717_v11  ;;  %v724_v21 = vmul.f32 %v6004_v9, %v723_v12  ;;  %581 = vadd.xlane.f32.xlu1 %v6997_v19  ;;  %v737_v54 = vmul.f32 %v6959_v50, %v736_v35  ;;  %vm750_vm2 = vmor %vm748_vm15, %vm749_vm0 }
 0x15f   : > { %656 = vadd.xlane.f32.xlu2 %v631_v17  ;;  %v7000_v22 = vpop.xlane.xlu0 %650  ;;  %v863_v23 = vmul.f32 %v721_v44, %v6886_v26  ;;  %v7015_v26 = vsub.f32 %v6917_v43, %v602_v20  ;;  %v744_v63 = vmul.f32 %v7010_v32, %v743_v55 }
 0x160   : > { %v725_v24 = vmul.f32 0.5, %v724_v21  ;;  %v572_v18 = vpop.xlane.xlu1 %571  ;;  %v741_v62 = vsel %vm7027_vm11, %v6959_v50, %v737_v54 }
 0x161   : > { %v600_v36 = vmul.f32 %v6875_v14, %v572_v18  ;;  %v882_v38 = vmul.f32 %v6992_v15, %v863_v23  ;;  %v865_v4 = vmul.f32 %v741_v62, %v6884_v25  ;;  %v745_v5 = vmul.f32 0.5, %v744_v63 }
 0x162   : > { %v6008_v40 = vpop.eup %6007  ;;  %v726_v41 = vsub.f32 1.5, %v725_v24 }
 0x163   : > { %v753_v42 = vmul.f32 %v6008_v40, %v6983_v7  ;;  %v7022_v46 = vsub.f32 %v6929_v47, %v600_v36  ;;  %v901_v43 = vadd.f32 %v7008_v31, %v882_v38  ;;  %v634_v47 = vmul.f32 %v7015_v26, %v7015_v26 }
 0x164   : > { %v727_v49 = vmul.f32 %v6004_v9, %v726_v41  ;;  %v884_v11 = vmul.f32 %v6992_v15, %v865_v4  ;;  %vm759_vm14 = vweird.f32 %v6008_v40 }
 0x165   : > { %v632_v56 = vmul.f32 %v7022_v46, %v7022_v46  ;;  %v916_v57 = vpack.c.bf16 %v901_v43, %v900_v29  ;;  %v754_v59 = vmul.f32 %v6008_v40, %v753_v42  ;;  %vm760_vm1 = vmor %vm758_vm13, %vm759_vm14 }
 0x166   : > { %v731_v58 = vsel %vm730_vm12, %v6004_v9, %v727_v49  ;;  %662 = vadd.xlane.f32.xlu1 %v634_v47  ;;  %v903_v13 = vadd.f32 %v7008_v31, %v884_v11 }
 0x167   : > { %658 = vadd.xlane.f32.xlu2 %v632_v56  ;;  %v578_v60 = vpop.xlane.xlu0 %577  ;;  %1092 = vmatmul.bf16.vlgmr.msra.gmra.mxu0 %v916_v57  ;;  %v864_v1 = vmul.f32 %v731_v58, %v6900_v34  ;;  %v755_v2 = vmul.f32 0.5, %v754_v59 }
 0x168   : > { %1141 = vmatmul.bf16.vlgmr.msra.gmra.mxu1 %v916_v57  ;;  %v603_v61 = vmul.f32 %v6875_v14, %v578_v60  ;;  %1190 = vmatmul.bf16.vlgmr.msra.gmra.mxu2 %v916_v57 }
 0x169   : > { %v883_v6 = vmul.f32 %v6992_v15, %v864_v1  ;;  %v756_v8 = vsub.f32 1.5, %v755_v2 }
 0x16a   : > { %v7043_v0 = vsub.f32 %v6933_v48, %v603_v61  ;;  %v746_v48 = vsub.f32 1.5, %v745_v5 }
 0x16b   : > { %v902_v34 = vadd.f32 %v7008_v31, %v883_v6  ;;  %v757_v25 = vmul.f32 %v6008_v40, %v756_v8 }
 0x16c   : > { %v635_v3 = vmul.f32 %v7043_v0, %v7043_v0  ;;  %v747_v17 = vmul.f32 %v7010_v32, %v746_v48 }
 0x16d   : > { %v917_v7 = vpack.c.bf16 %v903_v13, %v902_v34  ;;  %v761_v20 = vsel %vm760_vm1, %v6008_v40, %v757_v25 }
 0x16e   : > { %v867_v37 = vmul.f32 %v761_v20, %v6911_v39 }
 0x16f   : > { %664 = vadd.xlane.f32.xlu2 %v635_v3  ;;  %v580_v50 = vpop.xlane.xlu0 %579 }
 0x170   : > { %v604_v9 = vmul.f32 %v6875_v14, %v580_v50  ;;  %v886_v21 = vmul.f32 %v6992_v15, %v867_v37 }
 0x172   : > { %v7055_v12 = vsub.f32 %v6938_v51, %v604_v9  ;;  %v751_v51 = vsel %vm750_vm2, %v7010_v32, %v747_v17  ;;  %v905_v24 = vadd.f32 %v7008_v31, %v886_v21  ;;  %v676_v32 = vmul.f32 %v7000_v22, %v6875_v14 }
 0x173   : > { %v866_v44 = vmul.f32 %v751_v51, %v6898_v33 }
 0x174   : > { %v636_v16 = vmul.f32 %v7055_v12, %v7055_v12  ;;  %v692_v35 = vadd.f32 1e-05, %v676_v32 }
 0x175   : > { %v885_v23 = vmul.f32 %v6992_v15, %v866_v44 }
 0x176   : > { %666 = vadd.xlane.f32.xlu0 %v636_v16  ;;  %6009 = vrsqrt.f32 %v692_v35  ;;  %vm768_vm3 = vweird.f32 %v692_v35 }
 0x177   : > { %1097 = vmatmul.bf16.gmra.mxu0 %v917_v7  ;;  %v904_v18 = vadd.f32 %v7008_v31, %v885_v23  ;;  %v661_v29 = vpop.xlane.xlu0 %660 }
 0x178   : > { %1146 = vmatmul.bf16.gmra.mxu1 %v917_v7  ;;  %1195 = vmatmul.bf16.gmra.mxu2 %v917_v7  ;;  %v681_v28 = vmul.f32 %v661_v29, %v6875_v14 }
 0x179   : > { %v918_v27 = vpack.c.bf16 %v905_v24, %v904_v18 }
 0x17a   : > { %v7075_v58 = vadd.f32 1e-05, %v681_v28 }
 0x17c   : > { %v6010_v39 = vpop.eup %6009  ;;  %vm818_vm1 = vweird.f32 %v7075_v58 }
 0x17d   : > { %v763_v36 = vmul.f32 %v6010_v39, %v692_v35  ;;  %vm769_vm4 = vweird.f32 %v6010_v39 }
 0x17e   : > { %vm770_vm5 = vmor %vm768_vm3, %vm769_vm4 }
 0x17f   : > { %v764_v33 = vmul.f32 %v6010_v39, %v763_v36 }
 0x181   : > { %v765_v42 = vmul.f32 0.5, %v764_v33 }
 0x183   : > { %v766_v49 = vsub.f32 1.5, %v765_v42 }
 0x185   : > { %v767_v55 = vmul.f32 %v6010_v39, %v766_v49 }
 0x187   : > { %1102 = vmatmul.bf16.gmra.mxu0 %v918_v27  ;;  %v771_v59 = vsel %vm770_vm5, %v6010_v39, %v767_v55 }
 0x188   : > { %1151 = vmatmul.bf16.gmra.mxu1 %v918_v27  ;;  %1200 = vmatmul.bf16.gmra.mxu2 %v918_v27  ;;  %v868_v3 = vmul.f32 %v771_v59, %v6923_v45 }
 0x18a   : > { %v887_v34 = vmul.f32 %v6992_v15, %v868_v3 }
 0x18c   : > { %v906_v20 = vadd.f32 %v7008_v31, %v887_v34 }
 0x1c1   : > { %v653_v38 = vpop.xlane.xlu1 %652 }
 0x1c2   : > { %v677_v40 = vmul.f32 %v653_v38, %v6875_v14 }
 0x1c4   : > { %v693_v41 = vadd.f32 1e-05, %v677_v40 }
 0x1c6   : > { %6011 = vrsqrt.f32 %v693_v41  ;;  %vm778_vm7 = vweird.f32 %v693_v41 }
 0x1c9   : > { %v655_v43 = vpop.xlane.xlu1 %654 }
 0x1ca   : > { %v678_v22 = vmul.f32 %v655_v43, %v6875_v14 }
 0x1cc   : > { %v6012_v54 = vpop.eup %6011  ;;  %v694_v47 = vadd.f32 1e-05, %v678_v22 }
 0x1cd   : > { %v773_v56 = vmul.f32 %v6012_v54, %v693_v41  ;;  %vm779_vm6 = vweird.f32 %v6012_v54 }
 0x1ce   : > { %6013 = vrsqrt.f32 %v694_v47  ;;  %vm780_vm8 = vmor %vm778_vm7, %vm779_vm6  ;;  %vm788_vm10 = vweird.f32 %v694_v47 }
 0x1cf   : > { %v774_v57 = vmul.f32 %v6012_v54, %v773_v56  ;;  %6015 = vrsqrt.f32 %v7075_v58 }
 0x1d1   : > { %v775_v60 = vmul.f32 0.5, %v774_v57  ;;  %v582_v1 = vpop.xlane.xlu1 %581 }
 0x1d2   : > { %v657_v61 = vpop.xlane.xlu2 %656  ;;  %v605_v2 = vmul.f32 %v6875_v14, %v582_v1 }
 0x1d3   : > { %v776_v62 = vsub.f32 1.5, %v775_v60  ;;  %v679_v63 = vmul.f32 %v657_v61, %v6875_v14 }
 0x1d4   : > { %v6014_v6 = vpop.eup %6013  ;;  %v7082_v8 = vsub.f32 %v6997_v19, %v605_v2 }
 0x1d5   : > { %v777_v4 = vmul.f32 %v6012_v54, %v776_v62  ;;  %v695_v5 = vadd.f32 1e-05, %v679_v63  ;;  %v783_v9 = vmul.f32 %v6014_v6, %v694_v47  ;;  %v7088_v45 = vpop.eup %6015  ;;  %vm789_vm9 = vweird.f32 %v6014_v6 }
 0x1d6   : > { %v637_v11 = vmul.f32 %v7082_v8, %v7082_v8  ;;  %vm7098_vm11 = vmor %vm788_vm10, %vm789_vm9  ;;  %vm819_vm2 = vweird.f32 %v7088_v45 }
 0x1d7   : > { %v781_v50 = vsel %vm780_vm8, %v6012_v54, %v777_v4  ;;  %6017 = vrsqrt.f32 %v695_v5  ;;  %v784_v25 = vmul.f32 %v6014_v6, %v783_v9  ;;  %vm798_vm12 = vweird.f32 %v695_v5  ;;  %vm7131_vm4 = vmor %vm818_vm1, %vm819_vm2 }
 0x1d8   : > { %v869_v48 = vmul.f32 %v781_v50, %v6952_v30  ;;  %668 = vadd.xlane.f32.xlu1 %v637_v11  ;;  %v813_v30 = vmul.f32 %v7088_v45, %v7075_v58  ;;  %vm1346_vm1 = vcmask 261120  }
 0x1d9   : > { %v785_v17 = vmul.f32 0.5, %v784_v25  ;;  %v663_v7 = vpop.xlane.xlu1 %662 }
 0x1da   : > { %v659_v13 = vpop.xlane.xlu2 %658  ;;  %v888_v16 = vmul.f32 %v6992_v15, %v869_v48  ;;  %v682_v24 = vmul.f32 %v663_v7, %v6875_v14  ;;  %v814_v35 = vmul.f32 %v7088_v45, %v813_v30 }
 0x1db   : > { %v680_v19 = vmul.f32 %v659_v13, %v6875_v14  ;;  %v786_v44 = vsub.f32 1.5, %v785_v17 }
 0x1dc   : > { %v907_v51 = vadd.f32 %v7008_v31, %v888_v16  ;;  %v7102_v33 = vadd.f32 1e-05, %v682_v24  ;;  %v815_v29 = vmul.f32 0.5, %v814_v35 }
 0x1dd   : > { %v6018_v37 = vpop.eup %6017  ;;  %v696_v21 = vadd.f32 1e-05, %v680_v19  ;;  %v787_v27 = vmul.f32 %v6014_v6, %v786_v44 }
 0x1de   : > { %v793_v23 = vmul.f32 %v6018_v37, %v695_v5  ;;  %v919_v18 = vpack.c.bf16 %v907_v51, %v906_v20  ;;  %vm799_vm13 = vweird.f32 %v6018_v37  ;;  %v816_v60 = vsub.f32 1.5, %v815_v29 }
 0x1df   : > { %6019 = vrsqrt.f32 %v696_v21  ;;  %v791_v40 = vsel %vm7098_vm11, %v6014_v6, %v787_v27  ;;  %vm800_vm14 = vmor %vm798_vm12, %vm799_vm13  ;;  %vm808_vm15 = vweird.f32 %v696_v21  ;;  %vm828_vm7 = vweird.f32 %v7102_v33 }
 0x1e0   : > { %v794_v32 = vmul.f32 %v6018_v37, %v793_v23  ;;  %1107 = vmatmul.bf16.gmra.mxu0 %v919_v18  ;;  %1156 = vmatmul.bf16.gmra.mxu1 %v919_v18  ;;  %6021 = vrsqrt.f32 %v7102_v33  ;;  %v870_v56 = vmul.f32 %v791_v40, %v6962_v53  ;;  %v817_v50 = vmul.f32 %v7088_v45, %v816_v60 }
 0x1e1   : > { %1205 = vmatmul.bf16.gmra.mxu2 %v919_v18 }
 0x1e2   : > { %v795_v36 = vmul.f32 0.5, %v794_v32  ;;  %v665_v38 = vpop.xlane.xlu2 %664  ;;  %v889_v62 = vmul.f32 %v6992_v15, %v870_v56  ;;  %v821_v30 = vsel %vm7131_vm4, %v7088_v45, %v817_v50 }
 0x1e3   : > { %v683_v41 = vmul.f32 %v665_v38, %v6875_v14  ;;  %v873_v40 = vmul.f32 %v821_v30, %v6941_v52 }
 0x1e4   : > { %v796_v42 = vsub.f32 1.5, %v795_v36  ;;  %v1093_v54 = vpop.f32.mrf.mxu0  ;;  %v908_v48 = vadd.f32 %v7008_v31, %v889_v62 }
 0x1e5   : > { %v6020_v49 = vpop.eup %6019  ;;  %v7107_v43 = vadd.f32 1e-05, %v683_v41  ;;  %v1142_v28 = vpop.f32.mrf.mxu1 }
 0x1e6   : > { %v797_v22 = vmul.f32 %v6018_v37, %v796_v42  ;;  %v803_v55 = vmul.f32 %v6020_v49, %v696_v21  ;;  %vm809_vm0 = vweird.f32 %v6020_v49  ;;  %v1231_v63 = vpack.c.bf16 %v1142_v28, %v1093_v54  ;;  %v7115_v2 = vpop.eup %6021 }
 0x1e7   : > { %6023 = vrsqrt.f32 %v7107_v43  ;;  %vm7124_vm3 = vmor %vm808_vm15, %vm809_vm0  ;;  %v823_v25 = vmul.f32 %v7115_v2, %v7102_v33  ;;  %v892_v54 = vmul.f32 %v6992_v15, %v873_v40  ;;  %vm838_vm5 = vweird.f32 %v7107_v43 }
 0x1e8   : > { %v801_v47 = vsel %vm800_vm14, %v6018_v37, %v797_v22  ;;  %v804_v57 = vmul.f32 %v6020_v49, %v803_v55  ;;  %v1279_v13 = vrot.slane %v1231_v63, 4  ;;  %v1322_v17 = vunpack.c.l.b16 %v1231_v63 }
 0x1e9   : > { %v871_v59 = vmul.f32 %v801_v47, %v6987_v10  ;;  %v824_v44 = vmul.f32 %v7115_v2, %v823_v25  ;;  %vm829_vm8 = vweird.f32 %v7115_v2  ;;  %v911_v33 = vadd.f32 %v7008_v31, %v892_v54 }
 0x1ea   : > { %v805_v61 = vmul.f32 0.5, %v804_v57  ;;  %v1334_v21 = vunpack.c.l.b16 %v1279_v13  ;;  %vm7176_vm10 = vmor %vm828_vm7, %vm829_vm8 }
 0x1eb   : > { %v890_v1 = vmul.f32 %v6992_v15, %v871_v59  ;;  %v1191_v3 = vpop.f32.mrf.mxu2  ;;  %v825_v41 = vmul.f32 0.5, %v824_v44 }
 0x1ec   : > { %v806_v53 = vsub.f32 1.5, %v805_v61  ;;  %v1095_v10 = vpop.f32.mrf.mxu0  ;;  %v1232_v35 = vpack.c.bf16 %v1191_v3, %v1191_v3 }
 0x1ed   : > { %v7119_v4 = vpop.eup %6023  ;;  %v1144_v5 = vpop.f32.mrf.mxu1  ;;  %v909_v6 = vadd.f32 %v7008_v31, %v890_v1  ;;  %v826_v28 = vsub.f32 1.5, %v825_v41 }
 0x1ee   : > { %v807_v9 = vmul.f32 %v6020_v49, %v806_v53  ;;  %v833_v58 = vmul.f32 %v7119_v4, %v7107_v43  ;;  %v1233_v16 = vpack.c.bf16 %v1144_v5, %v1095_v10  ;;  %v1682_v29 = vunpack.c.l.b16 %v1232_v35 }
 0x1ef   : > { %v920_v19 = vpack.c.bf16 %v909_v6, %v908_v48  ;;  %vm839_vm6 = vweird.f32 %v7119_v4  ;;  %v827_v61 = vmul.f32 %v7115_v2, %v826_v28 }
 0x1f0   : > { %v811_v7 = vsel %vm7124_vm3, %v6020_v49, %v807_v9  ;;  %v834_v20 = vmul.f32 %v7119_v4, %v833_v58  ;;  %v1280_v51 = vrot.slane %v1233_v16, 4  ;;  %v1323_v37 = vunpack.c.l.b16 %v1233_v16  ;;  %vm7170_vm9 = vmor %vm838_vm5, %vm839_vm6 }
 0x1f1   : > { %1112 = vmatmul.bf16.gmra.mxu0 %v920_v19  ;;  %1161 = vmatmul.bf16.gmra.mxu1 %v920_v19  ;;  %v872_v27 = vmul.f32 %v811_v7, %v7022_v46  ;;  %v831_v5 = vsel %vm7176_vm10, %v7115_v2, %v827_v61  ;;  %vm1477_vm5 = vcmask 523264  }
 0x1f2   : > { %v7144_v23 = vpack.c.b16 %v1323_v37, %v1322_v17  ;;  %v1335_v24 = vunpack.c.l.b16 %v1280_v51  ;;  %1210 = vmatmul.bf16.vlgmr.msra.gmra.mxu3 %v920_v19  ;;  %v835_v32 = vmul.f32 0.5, %v834_v20  ;;  %v874_v58 = vmul.f32 %v831_v5, %v7015_v26 }
 0x1f3   : > { %v1193_v18 = vpop.f32.mrf.mxu2  ;;  %v891_v46 = vmul.f32 %v6992_v15, %v872_v27 }
 0x1f4   : > { %v7147_v39 = vpack.c.b16 %v1335_v24, %v1334_v21  ;;  %v1234_v36 = vpack.c.bf16 %v1193_v18, %v1193_v18  ;;  %2316 = vrot.lane.b32.xlu2 %v7144_v23, %s6638_s29  ;;  %1840 = vrot.lane.b32.xlu0 %v7144_v23, %s6639_s20  ;;  %v1098_v45 = vpop.f32.mrf.mxu0  ;;  %v836_v49 = vsub.f32 1.5, %v835_v32  ;;  %v893_v13 = vmul.f32 %v6992_v15, %v874_v58 }
 0x1f5   : > { %v1147_v38 = vpop.f32.mrf.mxu1  ;;  %v910_v52 = vadd.f32 %v7008_v31, %v891_v46 }
 0x1f6   : > { %v1683_v42 = vunpack.c.l.b16 %v1234_v36  ;;  %2324 = vrot.lane.b32.xlu1 %v7147_v39, %s6638_s29  ;;  %v1235_v55 = vpack.c.bf16 %v1147_v38, %v1098_v45  ;;  %v837_v56 = vmul.f32 %v7119_v4, %v836_v49  ;;  %v912_v37 = vadd.f32 %v7008_v31, %v893_v13  ;;  %v667_v49 = vpop.xlane.xlu0 %666 }
 0x1f7   : > { %v921_v53 = vpack.c.bf16 %v911_v33, %v910_v52  ;;  %v684_v54 = vmul.f32 %v667_v49, %v6875_v14 }
 0x1f8   : > { %v7160_v22 = vpack.c.b16 %v1683_v42, %v1682_v29  ;;  %v1324_v63 = vunpack.c.l.b16 %v1235_v55  ;;  %v841_v3 = vsel %vm7170_vm9, %v7119_v4, %v837_v56  ;;  %v1281_v9 = vrot.slane %v1235_v55, 4 }
 0x1f9   : > { %v875_v50 = vmul.f32 %v841_v3, %v7043_v0  ;;  %v700_v52 = vadd.f32 1e-05, %v684_v54 }
 0x1fa   : > { %v1336_v2 = vunpack.c.l.b16 %v1281_v9 }
 0x1fb   : > { %v1196_v59 = vpop.f32.mrf.mxu2  ;;  %v894_v25 = vmul.f32 %v6992_v15, %v875_v50  ;;  %6025 = vrsqrt.f32 %v700_v52  ;;  %vm848_vm11 = vweird.f32 %v700_v52 }
 0x1fc   : > { %2792 = vrot.lane.b32.xlu2 %v7144_v23, %s6640_s4  ;;  %2650 = vrot.lane.b32.xlu0 %v7160_v22, %s6638_s29  ;;  %v1100_v43 = vpop.f32.mrf.mxu0  ;;  %v1236_v7 = vpack.c.bf16 %v1196_v59, %v1196_v59 }
 0x1fd   : > { %v1149_v47 = vpop.f32.mrf.mxu1  ;;  %v913_v19 = vadd.f32 %v7008_v31, %v894_v25 }
 0x1fe   : > { %v1237_v60 = vpack.c.bf16 %v1149_v47, %v1100_v43  ;;  %v1684_v18 = vunpack.c.l.b16 %v1236_v7 }
 0x1ff   : > { %v922_v24 = vpack.c.bf16 %v913_v19, %v912_v37 }
 0x200   : > { %v1325_v1 = vunpack.c.l.b16 %v1237_v60  ;;  %v1282_v6 = vrot.slane %v1237_v60, 4 }
 0x201   : > { %1117 = vmatmul.bf16.gmra.mxu0 %v921_v53  ;;  %1166 = vmatmul.bf16.gmra.mxu1 %v921_v53  ;;  %v6026_v43 = vpop.eup %6025 }
 0x202   : > { %v7183_v10 = vpack.c.b16 %v1325_v1, %v1324_v63  ;;  %1215 = vmatmul.bf16.gmra.mxu3 %v921_v53  ;;  %v1337_v48 = vunpack.c.l.b16 %v1282_v6  ;;  %v843_v47 = vmul.f32 %v6026_v43, %v700_v52  ;;  %vm849_vm12 = vweird.f32 %v6026_v43 }
 0x203   : > { %v1198_v34 = vpop.f32.mrf.mxu2  ;;  %vm850_vm13 = vmor %vm848_vm11, %vm849_vm12  ;;  %vm3492_vm11 = vcmask 785408  }
 0x204   : > { %1848 = vrot.lane.b32.xlu2 %v7147_v39, %s6639_s20  ;;  %2318 = vrot.lane.b32.xlu0 %v7183_v10, %s6638_s29  ;;  %v1103_v4 = vpop.f32.mrf.mxu0  ;;  %v7196_v16 = vpack.c.b16 %v1337_v48, %v1336_v2  ;;  %v1238_v0 = vpack.c.bf16 %v1198_v34, %v1198_v34  ;;  %v844_v57 = vmul.f32 %v6026_v43, %v843_v47  ;;  %v1360_v47 = vsel %vm1346_vm1, %v7147_v39, 0 }
 0x205   : > { %v1152_v11 = vpop.f32.mrf.mxu1 }
 0x206   : > { %v1239_v17 = vpack.c.bf16 %v1152_v11, %v1103_v4  ;;  %v1685_v30 = vunpack.c.l.b16 %v1238_v0  ;;  %v845_v33 = vmul.f32 0.5, %v844_v57  ;;  %v1363_v54 = vsel %vm1346_vm1, %v7196_v16, 0 }
 0x208   : > { %v1326_v44 = vunpack.c.l.b16 %v1239_v17  ;;  %v7206_v32 = vpack.c.b16 %v1685_v30, %v1684_v18  ;;  %v1283_v36 = vrot.slane %v1239_v17, 4  ;;  %v846_v62 = vsub.f32 1.5, %v845_v33 }
 0x20a   : > { %v1338_v38 = vunpack.c.l.b16 %v1283_v36  ;;  %v847_v1 = vmul.f32 %v6026_v43, %v846_v62 }
 0x20b   : > { %v1201_v41 = vpop.f32.mrf.mxu2 }
 0x20c   : > { %2800 = vrot.lane.b32.xlu2 %v7147_v39, %s6640_s4  ;;  %2326 = vrot.lane.b32.xlu0 %v7196_v16, %s6638_s29  ;;  %v1105_v26 = vpop.f32.mrf.mxu0  ;;  %v1240_v29 = vpack.c.bf16 %v1201_v41, %v1201_v41  ;;  %v851_v5 = vsel %vm850_vm13, %v6026_v43, %v847_v1 }
 0x20d   : > { %v1154_v20 = vpop.f32.mrf.mxu1  ;;  %v876_v11 = vmul.f32 %v851_v5, %v7055_v12 }
 0x20e   : > { %v1241_v51 = vpack.c.bf16 %v1154_v20, %v1105_v26  ;;  %v1686_v55 = vunpack.c.l.b16 %v1240_v29 }
 0x20f   : > { %v895_v25 = vmul.f32 %v6992_v15, %v876_v11 }
 0x210   : > { %v1327_v21 = vunpack.c.l.b16 %v1241_v51  ;;  %v1284_v35 = vrot.slane %v1241_v51, 4 }
 0x211   : > { %1122 = vmatmul.bf16.gmra.mxu0 %v922_v24  ;;  %1171 = vmatmul.bf16.gmra.mxu1 %v922_v24  ;;  %v914_v20 = vadd.f32 %v7008_v31, %v895_v25 }
 0x212   : > { %v7204_v27 = vpack.c.b16 %v1327_v21, %v1326_v44  ;;  %1220 = vmatmul.bf16.gmra.mxu3 %v922_v24  ;;  %v1339_v45 = vunpack.c.l.b16 %v1284_v35 }
 0x213   : > { %v1203_v42 = vpop.f32.mrf.mxu2 }
 0x214   : > { %2174 = vrot.lane.b32.xlu2 %v7160_v22, %s6639_s20  ;;  %2652 = vrot.lane.b32.xlu0 %v7206_v32, %s6638_s29  ;;  %v7214_v40 = vpack.c.b16 %v1339_v45, %v1338_v38  ;;  %v1242_v46 = vpack.c.bf16 %v1203_v42, %v1203_v42 }
 0x216   : > { %v1687_v28 = vunpack.c.l.b16 %v1242_v46  ;;  %v1366_v46 = vsel %vm1346_vm1, %v7214_v40, 0 }
 0x218   : > { %v7223_v56 = vpack.c.b16 %v1687_v28, %v1686_v55 }
 0x21c   : > { %3128 = vrot.lane.b32.xlu0 %v7206_v32, %s6640_s4 }
 0x224   : > { %1852 = vrot.lane.b32.xlu0 %v7214_v40, %s6639_s20 }
 0x22c   : > { %2328 = vrot.lane.b32.xlu0 %v7214_v40, %s6638_s29 }
 0x234   : > { %2804 = vrot.lane.b32.xlu0 %v7214_v40, %s6640_s4 }
 0x23c   : > { %2178 = vrot.lane.b32.xlu0 %v7223_v56, %s6639_s20 }
 0x24b   : > { %v669_v59 = vpop.xlane.xlu1 %668 }
 0x24c   : > { %v685_v60 = vmul.f32 %v669_v59, %v6875_v14 }
 0x24e   : > { %v701_v61 = vadd.f32 1e-05, %v685_v60 }
 0x250   : > { %6027 = vrsqrt.f32 %v701_v61  ;;  %vm858_vm15 = vweird.f32 %v701_v61 }
 0x256   : > { %v6028_v63 = vpop.eup %6027 }
 0x257   : > { %v853_v53 = vmul.f32 %v6028_v63, %v701_v61  ;;  %vm859_vm14 = vweird.f32 %v6028_v63 }
 0x258   : > { %vm860_vm0 = vmor %vm858_vm15, %vm859_vm14 }
 0x259   : > { %v854_v3 = vmul.f32 %v6028_v63, %v853_v53 }
 0x25b   : > { %v855_v6 = vmul.f32 0.5, %v854_v3 }
 0x25d   : > { %v1108_v50 = vpop.f32.mrf.mxu0  ;;  %v1157_v9 = vpop.f32.mrf.mxu1  ;;  %v856_v4 = vsub.f32 1.5, %v855_v6 }
 0x25e   : > { %v1243_v48 = vpack.c.bf16 %v1157_v9, %v1108_v50 }
 0x25f   : > { %v857_v58 = vmul.f32 %v6028_v63, %v856_v4 }
 0x260   : > { %v1285_v19 = vrot.slane %v1243_v48, 4  ;;  %v1328_v51 = vunpack.c.l.b16 %v1243_v48 }
 0x261   : > { %v861_v34 = vsel %vm860_vm0, %v6028_v63, %v857_v58 }
 0x262   : > { %v877_v13 = vmul.f32 %v861_v34, %v7082_v8  ;;  %v1340_v44 = vunpack.c.l.b16 %v1285_v19 }
 0x264   : > { %v1206_v2 = vpop.f32.mrf.mxu2  ;;  %v896_v26 = vmul.f32 %v6992_v15, %v877_v13 }
 0x265   : > { %v1110_v0 = vpop.f32.mrf.mxu0  ;;  %v1159_v17 = vpop.f32.mrf.mxu1  ;;  %v1244_v35 = vpack.c.bf16 %v1206_v2, %v1206_v2 }
 0x266   : > { %v1245_v7 = vpack.c.bf16 %v1159_v17, %v1110_v0  ;;  %v915_v30 = vadd.f32 %v7008_v31, %v896_v26 }
 0x267   : > { %v1688_v38 = vunpack.c.l.b16 %v1244_v35 }
 0x268   : > { %v1286_v12 = vrot.slane %v1245_v7, 4  ;;  %v1329_v37 = vunpack.c.l.b16 %v1245_v7  ;;  %v923_v18 = vpack.c.bf16 %v915_v30, %v914_v20 }
 0x26a   : > { %v7234_v21 = vpack.c.b16 %v1329_v37, %v1328_v51  ;;  %v1341_v24 = vunpack.c.l.b16 %v1286_v12  ;;  %1127 = vmatmul.bf16.gmra.mxu0 %v923_v18  ;;  %1176 = vmatmul.bf16.gmra.mxu1 %v923_v18 }
 0x26b   : > { %1225 = vmatmul.bf16.gmra.mxu3 %v923_v18 }
 0x26c   : > { %v7236_v8 = vpack.c.b16 %v1341_v24, %v1340_v44  ;;  %v1208_v36 = vpop.f32.mrf.mxu2 }
 0x26d   : > { %v1246_v15 = vpack.c.bf16 %v1208_v36, %v1208_v36 }
 0x26e   : > { %v1369_v45 = vsel %vm1346_vm1, %v7236_v8, 0  ;;  %v1113_v5 = vpop.f32.mrf.mxu0  ;;  %v1162_v6 = vpop.f32.mrf.mxu1 }
 0x26f   : > { %v1689_v41 = vunpack.c.l.b16 %v1246_v15  ;;  %1375 = vmatpush.bf16.xpose.msrb.mxu3 %v1369_v45 }
 0x271   : > { %v7240_v31 = vpack.c.b16 %v1689_v41, %v1688_v38 }
 0x273   : > { %1714 = vmatpush.bf16.msrb.mxu0 %v7240_v31 }
 0x275   : > { %v1211_v42 = vpop.f32.mrf.mxu3 }
 0x276   : > { %v1248_v49 = vpack.c.bf16 %v1211_v42, %v1211_v42  ;;  %v1164_v50 = vpop.f32.mrf.mxu1 }
 0x277   : > { %1715 = vmatpush.bf16.msrb.mxu0 %v7223_v56  ;;  %1376 = vmatpush.bf16.xpose.msrb.mxu3 %v1366_v46 }
 0x278   : > { %v1767_v55 = vunpack.c.l.b16 %v1248_v49 }
 0x27b   : > { %1716 = vmatpush.bf16.msrb.mxu0 %v7206_v32 }
 0x27d   : > { %v1213_v29 = vpop.f32.mrf.mxu3 }
 0x27e   : > { %v1250_v28 = vpack.c.bf16 %v1213_v29, %v1213_v29  ;;  %v1167_v11 = vpop.f32.mrf.mxu1 }
 0x27f   : > { %1717 = vmatpush.bf16.msrb.mxu0 %v7160_v22  ;;  %1377 = vmatpush.bf16.xpose.msrb.mxu3 %v1363_v54 }
 0x280   : > { %v1768_v52 = vunpack.c.l.b16 %v1250_v28 }
 0x282   : > { %v7250_v43 = vpack.c.b16 %v1768_v52, %v1767_v55 }
 0x284   : > { %2723 = vrot.lane.b32.xlu1 %v7250_v43, %s6638_s29  ;;  %2247 = vrot.lane.b32.xlu2 %v7250_v43, %s6639_s20 }
 0x285   : > { %v1216_v40 = vpop.f32.mrf.mxu3 }
 0x286   : > { %v1252_v60 = vpack.c.bf16 %v1216_v40, %v1216_v40  ;;  %v1169_v25 = vpop.f32.mrf.mxu1 }
 0x287   : > { %1378 = vmatpush.bf16.xpose.msrb.mxu3 %v1360_v47 }
 0x288   : > { %v1769_v61 = vunpack.c.l.b16 %v1252_v60 }
 0x28c   : > { %2794 = vrot.lane.b32.xlu1 %v7183_v10, %s6640_s4  ;;  %3126 = vrot.lane.b32.xlu2 %v7160_v22, %s6640_s4 }
 0x28d   : > { %v1218_v57 = vpop.f32.mrf.mxu3 }
 0x28e   : > { %5281 = vmatmul.msk.bf16.vlgmr.msrb.gmra.mxu3 %vm1346_vm1, %v7144_v23  ;;  %v1254_v59 = vpack.c.bf16 %v1218_v57, %v1218_v57  ;;  %v1172_v7 = vpop.f32.mrf.mxu1 }
 0x290   : > { %v1770_v33 = vunpack.c.l.b16 %v1254_v59 }
 0x292   : > { %v7268_v62 = vpack.c.b16 %v1770_v33, %v1769_v61 }
 0x294   : > { %1850 = vrot.lane.b32.xlu1 %v7196_v16, %s6639_s20  ;;  %3199 = vrot.lane.b32.xlu2 %v7250_v43, %s6640_s4 }
 0x295   : > { %v1221_v39 = vpop.f32.mrf.mxu3 }
 0x296   : > { %v1256_v63 = vpack.c.bf16 %v1221_v39, %v1221_v39  ;;  %v1174_v15 = vpop.f32.mrf.mxu1 }
 0x298   : > { %v1771_v1 = vunpack.c.l.b16 %v1256_v63 }
 0x29c   : > { %1842 = vrot.lane.b32.xlu2 %v7183_v10, %s6639_s20  ;;  %2249 = vrot.lane.b32.xlu1 %v7268_v62, %s6639_s20 }
 0x29d   : > { %v1223_v23 = vpop.f32.mrf.mxu3 }
 0x29e   : > { %5282 = vmatmul.msk.bf16.gmra.mxu3 %vm1346_vm1, %v7183_v10  ;;  %v1258_v22 = vpack.c.bf16 %v1223_v23, %v1223_v23  ;;  %v7292_v10 = vpop.permute.xlu2 %2316 }
 0x2a0   : > { %v1772_v53 = vunpack.c.l.b16 %v1258_v22 }
 0x2a2   : > { %v7276_v3 = vpack.c.b16 %v1772_v53, %v1771_v1 }
 0x2a4   : > { %2802 = vrot.lane.b32.xlu2 %v7196_v16, %s6640_s4  ;;  %3201 = vrot.lane.b32.xlu1 %v7268_v62, %s6640_s4  ;;  %v1115_v16 = vpop.f32.mrf.mxu0 }
 0x2a5   : > { %2251 = vrot.lane.b32.xlu0 %v7276_v3, %s6639_s20  ;;  %v7324_v13 = vpack.c.bf16 %v1164_v50, %v1115_v16 }
 0x2a6   : > { %v7302_v9 = vpop.permute.xlu2 %2792 }
 0x2a7   : > { %v1401_v20 = vunpack.c.l.b16 %v7324_v13 }
 0x2ac   : > { %2176 = vrot.lane.b32.xlu2 %v7206_v32, %s6639_s20  ;;  %1844 = vrot.lane.b32.xlu1 %v7204_v27, %s6639_s20  ;;  %v7298_v32 = vpop.permute.xlu0 %1840  ;;  %v1118_v4 = vpop.f32.mrf.mxu0 }
 0x2ad   : > { %3130 = vrot.lane.b32.xlu0 %v7223_v56, %s6640_s4  ;;  %v1251_v17 = vpack.c.bf16 %v1167_v11, %v1118_v4 }
 0x2ae   : > { %5283 = vmatmul.msk.bf16.gmra.mxu3 %vm1346_vm1, %v7204_v27  ;;  %v7314_v48 = vpop.permute.xlu2 %1848 }
 0x2af   : > { %v1402_v51 = vunpack.c.l.b16 %v1251_v17  ;;  %v1289_v24 = vrot.slane %v1251_v17, 4 }
 0x2b1   : > { %v1414_v45 = vunpack.c.l.b16 %v1289_v24 }
 0x2b4   : > { %2725 = vrot.lane.b32.xlu2 %v7268_v62, %s6638_s29  ;;  %2320 = vrot.lane.b32.xlu1 %v7204_v27, %s6638_s29  ;;  %v7312_v58 = vpop.permute.xlu0 %2650  ;;  %v1120_v34 = vpop.f32.mrf.mxu0 }
 0x2b5   : > { %3203 = vrot.lane.b32.xlu0 %v7276_v3, %s6640_s4  ;;  %v1253_v2 = vpack.c.bf16 %v1169_v25, %v1120_v34 }
 0x2b6   : > { %v7326_v0 = vpop.permute.xlu2 %2800 }
 0x2b7   : > { %v1403_v26 = vunpack.c.l.b16 %v1253_v2  ;;  %v1290_v37 = vrot.slane %v1253_v2, 4 }
 0x2b9   : > { %v7338_v30 = vpack.c.b16 %v1403_v26, %v1402_v51  ;;  %v1415_v35 = vunpack.c.l.b16 %v1290_v37  ;;  %v1295_v51 = vlaneseq }
 0x2bb   : > { %v7352_v38 = vpack.c.b16 %v1415_v35, %v1414_v45 }
 0x2bc   : > { %2796 = vrot.lane.b32.xlu2 %v7204_v27, %s6640_s4  ;;  %2727 = vrot.lane.b32.xlu1 %v7276_v3, %s6638_s29  ;;  %v7322_v27 = vpop.permute.xlu0 %2318  ;;  %v1123_v19 = vpop.f32.mrf.mxu0 }
 0x2bd   : > { %2798 = vrot.lane.b32.xlu0 %v7234_v21, %s6640_s4 }
 0x2be   : > { %5284 = vmatmul.msk.bf16.gmra.mxu3 %vm1346_vm1, %v7234_v21  ;;  %v7350_v18 = vpop.permute.xlu2 %2174 }
 0x2c4   : > { %2654 = vrot.lane.b32.xlu2 %v7223_v56, %s6638_s29  ;;  %2322 = vrot.lane.b32.xlu1 %v7234_v21, %s6638_s29  ;;  %v7332_v56 = vpack.c.bf16 %v1162_v6, %v1113_v5  ;;  %v1125_v36 = vpop.f32.mrf.mxu0 }
 0x2c5   : > { %2656 = vrot.lane.b32.xlu0 %v7240_v31, %s6638_s29  ;;  %v1257_v41 = vpack.c.bf16 %v1174_v15, %v1125_v36  ;;  %v7398_v36 = vshrl.u32 %v1295_v51, 7 }
 0x2c6   : > { %v1400_v12 = vunpack.c.l.b16 %v7332_v56 }
 0x2c7   : > { %v1405_v46 = vunpack.c.l.b16 %v1257_v41  ;;  %v1292_v54 = vrot.slane %v1257_v41, 4  ;;  %v7406_v41 = vand.u32 127, %v1295_v51 }
 0x2c8   : > { %v7340_v44 = vpack.c.b16 %v1401_v20, %v1400_v12 }
 0x2c9   : > { %v1417_v52 = vunpack.c.l.b16 %v1292_v54  ;;  %vm1306_vm3 = vcmp.ge.s32.totalorder %v7398_v36, %v7406_v41 }
 0x2cc   : > { %1846 = vrot.lane.b32.xlu2 %v7234_v21, %s6639_s20  ;;  %2180 = vrot.lane.b32.xlu1 %v7240_v31, %s6639_s20  ;;  %v7342_v21 = vpop.permute.xlu0 %2326 }
 0x2cd   : > { %3132 = vrot.lane.b32.xlu0 %v7240_v31, %s6640_s4  ;;  %v1255_v31 = vpack.c.bf16 %v1172_v7, %v1123_v19 }
 0x2cf   : > { %v1404_v29 = vunpack.c.l.b16 %v1255_v31  ;;  %v1291_v55 = vrot.slane %v1255_v31, 4  ;;  %v1298_v31 = vadd.s32 16, %v7398_v36 }
 0x2d1   : > { %v7364_v28 = vpack.c.b16 %v1405_v46, %v1404_v29  ;;  %v1416_v57 = vunpack.c.l.b16 %v1291_v55  ;;  %vm1308_vm2 = vcmp.ge.s32.totalorder %v1298_v31, %v7406_v41  ;;  %v9092_v29 = vmov -1e+30  }
 0x2d2   : > { %v7413_v54 = vsel %vm1308_vm2, 0.0, %v9092_v29  ;;  %v1288_v55 = vrot.slane %v7324_v13, 4 }
 0x2d3   : > { %v1422_v39 = vpack.c.b16 %v1417_v52, %v1416_v57 }
 0x2d4   : > { %1854 = vrot.lane.b32.xlu2 %v7236_v8, %s6639_s20  ;;  %1911 = vrot.lane.b32.xlu1 %v7338_v30, %s6639_s20  ;;  %v7358_v42 = vpop.permute.xlu0 %2652 }
 0x2d5   : > { %1909 = vrot.lane.b32.xlu0 %v7340_v44, %s6639_s20  ;;  %v1443_v46 = vsel %vm1346_vm1, %v1422_v39, 0 }
 0x2dc   : > { %2330 = vrot.lane.b32.xlu2 %v7236_v8, %s6638_s29  ;;  %1919 = vrot.lane.b32.xlu1 %v7352_v38, %s6639_s20  ;;  %v7374_v47 = vpop.permute.xlu0 %3128 }
 0x2dd   : > { %2387 = vrot.lane.b32.xlu0 %v7338_v30, %s6638_s29 }
 0x2de   : > { %v7362_v49 = vpop.permute.xlu2 %2247 }
 0x2e4   : > { %2806 = vrot.lane.b32.xlu2 %v7236_v8, %s6640_s4  ;;  %2865 = vrot.lane.b32.xlu1 %v7364_v28, %s6640_s4  ;;  %v7379_v8 = vpop.permute.xlu1 %2324  ;;  %v7383_v1 = vpop.permute.xlu0 %1852 }
 0x2e5   : > { %2395 = vrot.lane.b32.xlu0 %v7352_v38, %s6638_s29 }
 0x2e6   : > { %v7372_v40 = vpop.permute.xlu2 %3126 }
 0x2e7   : > { %v1128_v59 = vpop.f32.mrf.mxu0  ;;  %v1177_v60 = vpop.f32.mrf.mxu1 }
 0x2e8   : > { %v1259_v33 = vpack.c.bf16 %v1177_v60, %v1128_v59  ;;  %v1413_v60 = vunpack.c.l.b16 %v1288_v55 }
 0x2ea   : > { %v1293_v53 = vrot.slane %v1259_v33, 4  ;;  %v1406_v6 = vunpack.c.l.b16 %v1259_v33 }
 0x2ec   : > { %1921 = vrot.lane.b32.xlu1 %v1422_v39, %s6639_s20  ;;  %v1418_v4 = vunpack.c.l.b16 %v1293_v53  ;;  %v7395_v24 = vpop.permute.xlu0 %2328 }
 0x2ed   : > { %2871 = vrot.lane.b32.xlu0 %v7352_v38, %s6640_s4 }
 0x2ee   : > { %v7381_v61 = vpop.permute.xlu2 %3199  ;;  %v1226_v63 = vpop.f32.mrf.mxu3 }
 0x2ef   : > { %9137 = vst [vmem:[#allocation21_spill] sm:$0xff] %v7381_v61  ;;  %v1130_v23 = vpop.f32.mrf.mxu0  ;;  %v1179_v22 = vpop.f32.mrf.mxu1  ;;  %v1260_v25 = vpack.c.bf16 %v1226_v63, %v1226_v63 }
 0x2f0   : > { %v1261_v5 = vpack.c.bf16 %v1179_v22, %v1130_v23 }
 0x2f1   : > { %v1773_v12 = vunpack.c.l.b16 %v1260_v25 }
 0x2f2   : > { %v1294_v16 = vrot.slane %v1261_v5, 4  ;;  %v1407_v50 = vunpack.c.l.b16 %v1261_v5 }
 0x2f4   : > { %2397 = vrot.lane.b32.xlu1 %v1422_v39, %s6638_s29  ;;  %v7386_v11 = vpack.c.b16 %v1407_v50, %v1406_v6  ;;  %v1419_v34 = vunpack.c.l.b16 %v1294_v16  ;;  %v7418_v52 = vpop.permute.xlu0 %2804 }
 0x2f6   : > { %v7388_v2 = vpop.permute.xlu1 %2723  ;;  %v7390_v17 = vpop.permute.xlu2 %1842  ;;  %v1423_v19 = vpack.c.b16 %v1419_v34, %v1418_v4  ;;  %2391 = vrot.lane.b32.xlu0 %v7386_v11, %s6638_s29  ;;  %v1302_v34 = vadd.s32 48, %v7398_v36 }
 0x2f7   : > { %v1228_v7 = vpop.f32.mrf.mxu3 }
 0x2f8   : > { %v1262_v26 = vpack.c.bf16 %v1228_v7, %v1228_v7  ;;  %v1446_v20 = vsel %vm1346_vm1, %v1423_v19, 0  ;;  %vm1312_vm4 = vcmp.ge.s32.totalorder %v1302_v34, %v7406_v41  ;;  %v1300_v34 = vadd.s32 32, %v7398_v36 }
 0x2f9   : > { %1452 = vmatpush.bf16.xpose.msra.mxu3 %v1446_v20  ;;  %v7465_v25 = vsel %vm1312_vm4, 0.0, %v9092_v29  ;;  %v1299_v20 = vadd.s32 24, %v7398_v36 }
 0x2fa   : > { %v1774_v37 = vunpack.c.l.b16 %v1262_v26  ;;  %vm1310_vm9 = vcmp.ge.s32.totalorder %v1300_v34, %v7406_v41 }
 0x2fb   : > { %vm1309_vm6 = vcmp.ge.s32.totalorder %v1299_v20, %v7406_v41  ;;  %v7525_v34 = vsel %vm1310_vm9, 0.0, %v9092_v29 }
 0x2fc   : > { %v1778_v35 = vpack.c.b16 %v1774_v37, %v1773_v12  ;;  %2873 = vrot.lane.b32.xlu1 %v1422_v39, %s6640_s4  ;;  %v1440_v39 = vsel %vm1346_vm1, %v7352_v38, 0  ;;  %v1297_v37 = vadd.s32 8, %v7398_v36  ;;  %v7489_v31 = vsel %vm1309_vm6, 0.0, %v9092_v29 }
 0x2fe   : > { %v7400_v15 = vpop.permute.xlu1 %2794  ;;  %v7402_v45 = vpop.permute.xlu2 %2802  ;;  %2253 = vrot.lane.b32.xlu2 %v1778_v35, %s6639_s20  ;;  %1799 = vmatpush.bf16.msrb.mxu1 %v1778_v35  ;;  %vm1307_vm7 = vcmp.ge.s32.totalorder %v1297_v37, %v7406_v41 }
 0x2ff   : > { %1923 = vrot.lane.b32.xlu0 %v1423_v19, %s6639_s20 }
 0x301   : > { %1453 = vmatpush.bf16.xpose.msra.mxu3 %v1443_v46 }
 0x302   : > { %1800 = vmatpush.bf16.msrb.mxu1 %v7276_v3  ;;  %v1287_v3 = vrot.slane %v7332_v56, 4 }
 0x304   : > { %2867 = vrot.lane.b32.xlu1 %v7386_v11, %s6640_s4  ;;  %v1412_v13 = vunpack.c.l.b16 %v1287_v3 }
 0x306   : > { %v7420_v57 = vpop.permute.xlu1 %1850  ;;  %v7422_v59 = vpop.permute.xlu2 %2176  ;;  %2729 = vrot.lane.b32.xlu2 %v1778_v35, %s6638_s29  ;;  %1801 = vmatpush.bf16.msrb.mxu1 %v7268_v62  ;;  %v1420_v33 = vpack.c.b16 %v1413_v60, %v1412_v13 }
 0x307   : > { %2399 = vrot.lane.b32.xlu0 %v1423_v19, %s6638_s29  ;;  %v7436_v62 = vpop.permute.xlu0 %2178 }
 0x308   : > { %v1437_v22 = vsel %vm1346_vm1, %v1420_v33, 0 }
 0x309   : > { %1454 = vmatpush.bf16.xpose.msra.mxu3 %v1440_v39  ;;  %v1301_v39 = vadd.s32 40, %v7398_v36 }
 0x30a   : > { %1802 = vmatpush.bf16.msrb.mxu1 %v7250_v43 }
 0x30b   : > { %vm1311_vm8 = vcmp.ge.s32.totalorder %v1301_v39, %v7406_v41 }
 0x30e   : > { %v7431_v63 = vpop.permute.xlu2 %2725  ;;  %v7433_v23 = vpop.permute.xlu1 %2249  ;;  %3205 = vrot.lane.b32.xlu2 %v1778_v35, %s6640_s4 }
 0x30f   : > { %2875 = vrot.lane.b32.xlu0 %v1423_v19, %s6640_s4  ;;  %v7468_v19 = vsel %vm1306_vm3, 0.0, %v9092_v29 }
 0x311   : > { %v1380_v56 = vpop.f32.mrf.mxu3  ;;  %1455 = vmatpush.bf16.xpose.msra.mxu3 %v1437_v22 }
 0x312   : > { %v7479_v12 = vadd.f32 %v1380_v56, %v7468_v19  ;;  %v7499_v56 = vsel %vm1307_vm7, 0.0, %v9092_v29 }
 0x314   : > { %v1478_v35 = vsel %vm1477_vm5, %v7479_v12, -inf }
 0x316   : > { %v7440_v38 = vpop.permute.xlu2 %2796  ;;  %v7442_v43 = vpop.permute.xlu1 %3201  ;;  %2385 = vrot.lane.b32.xlu2 %v7340_v44, %s6638_s29 }
 0x317   : > { %v7446_v53 = vpop.permute.xlu0 %2251 }
 0x318   : > { %5285 = vmatmul.msk.bf16.vlgmr.msra.gmra.mxu3 %vm1346_vm1, %v7340_v44 }
 0x319   : > { %v1382_v5 = vpop.f32.mrf.mxu3 }
 0x31a   : > { %v7507_v20 = vadd.f32 %v1382_v5, %v7499_v56 }
 0x31c   : > { %v1481_v5 = vsel %vm1477_vm5, %v7507_v20, -inf }
 0x31e   : > { %v7450_v6 = vpop.permute.xlu2 %2654  ;;  %v7452_v16 = vpop.permute.xlu1 %1844  ;;  %2861 = vrot.lane.b32.xlu2 %v7340_v44, %s6640_s4 }
 0x31f   : > { %v7456_v50 = vpop.permute.xlu0 %3130 }
 0x321   : > { %v7458_v4 = vpop.f32.mrf.mxu3 }
 0x326   : > { %v7470_v7 = vpop.permute.xlu2 %1846  ;;  %v7472_v44 = vpop.permute.xlu1 %2320  ;;  %1917 = vrot.lane.b32.xlu2 %v1420_v33, %s6639_s20 }
 0x327   : > { %v7475_v26 = vpop.permute.xlu0 %3203 }
 0x328   : > { %5286 = vmatmul.msk.bf16.gmra.mxu3 %vm1346_vm1, %v7338_v30 }
 0x329   : > { %v1387_v51 = vpop.f32.mrf.mxu3 }
 0x32a   : > { %v7502_v22 = vadd.f32 %v1387_v51, %v7489_v31  ;;  %v7516_v51 = vsel %vm1311_vm8, 0.0, %v9092_v29 }
 0x32c   : > { %v1487_v37 = vsel %vm1477_vm5, %v7502_v22, -inf }
 0x32e   : > { %v1855_v46 = vpop.permute.xlu2 %1854  ;;  %v7491_v55 = vpop.permute.xlu1 %2727  ;;  %2393 = vrot.lane.b32.xlu2 %v1420_v33, %s6638_s29  ;;  %1479 = vmax.xlane.f32.xlu1 %v1478_v35 }
 0x32f   : > { %v7494_v3 = vpop.permute.xlu0 %2798  ;;  %v1878_v60 = vsel %vm1346_vm1, %v1855_v46, 0 }
 0x330   : > { %1884 = vmatpush.bf16.xpose.msrb.mxu2 %v1878_v60  ;;  %v1875_v60 = vsel %vm1346_vm1, %v7383_v1, 0 }
 0x331   : > { %v1390_v13 = vpop.f32.mrf.mxu3 }
 0x332   : > { %v7535_v1 = vadd.f32 %v1390_v13, %v7525_v34  ;;  %v9138_v13 = vmov -1e+30  }
 0x334   : > { %v1490_v14 = vsel %vm1477_vm5, %v7535_v1, -inf }
 0x336   : > { %v7512_v35 = vpop.permute.xlu1 %2322  ;;  %2869 = vrot.lane.b32.xlu2 %v1420_v33, %s6640_s4  ;;  %1488 = vmax.xlane.f32.xlu1 %v1487_v37 }
 0x337   : > { %v7518_v46 = vpop.permute.xlu0 %2656 }
 0x338   : > { %1885 = vmatpush.bf16.xpose.msrb.mxu2 %v1875_v60  ;;  %5287 = vmatmul.msk.bf16.gmra.mxu3 %vm1346_vm1, %v7364_v28 }
 0x339   : > { %v1392_v39 = vpop.f32.mrf.mxu3  ;;  %1482 = vmax.xlane.f32.xlu0 %v1481_v5  ;;  %v1872_v5 = vsel %vm1346_vm1, %v7420_v57, 0 }
 0x33a   : > { %v7530_v33 = vadd.f32 %v1392_v39, %v7516_v51  ;;  %v1303_v39 = vadd.s32 56, %v7398_v36  ;;  %v1869_v36 = vsel %vm1346_vm1, %v7314_v48, 0 }
 0x33c   : > { %v1493_v37 = vsel %vm1477_vm5, %v7530_v33, -inf  ;;  %vm1313_vm10 = vcmp.ge.s32.totalorder %v1303_v39, %v7406_v41 }
 0x33e   : > { %v2181_v60 = vpop.permute.xlu1 %2180  ;;  %2863 = vrot.lane.b32.xlu2 %v7338_v30, %s6640_s4  ;;  %1494 = vmax.xlane.f32.xlu1 %v1493_v37  ;;  %v2331_v30 = vpop.permute.xlu2 %2330  ;;  %v7553_v37 = vsel %vm1313_vm10, 0.0, %v9138_v13 }
 0x33f   : > { %v7539_v29 = vpop.permute.xlu0 %3132  ;;  %2202 = vmatpush.bf16.msra.mxu0 %v2181_v60 }
 0x340   : > { %1886 = vmatpush.bf16.xpose.msrb.mxu2 %v1872_v5  ;;  %v2351_v5 = vsel %vm1346_vm1, %v7395_v24, 0 }
 0x341   : > { %v7546_v61 = vpop.f32.mrf.mxu3  ;;  %1491 = vmax.xlane.f32.xlu0 %v1490_v14  ;;  %v2354_v14 = vsel %vm1346_vm1, %v2331_v30, 0  ;;  %v2348_v30 = vsel %vm1346_vm1, %v7342_v21, 0 }
 0x343   : > { %2203 = vmatpush.bf16.msra.mxu0 %v7436_v62 }
 0x346   : > { %1913 = vrot.lane.b32.xlu2 %v7364_v28, %s6639_s20  ;;  %v7581_v13 = vpop.permute.xlu1 %1911 }
 0x347   : > { %v7555_v57 = vpop.permute.xlu0 %1909  ;;  %2204 = vmatpush.bf16.msra.mxu0 %v7422_v59  ;;  %v2807_v59 = vpop.permute.xlu2 %2806 }
 0x348   : > { %1887 = vmatpush.bf16.xpose.msrb.mxu2 %v1869_v36  ;;  %5288 = vmatmul.msk.bf16.gmra.mxu3 %vm1346_vm1, %v7386_v11 }
 0x349   : > { %v1397_v62 = vpop.f32.mrf.mxu3 }
 0x34a   : > { %v7564_v41 = vadd.f32 %v1397_v62, %v7553_v37 }
 0x34b   : > { %2205 = vmatpush.bf16.msra.mxu0 %v7350_v18 }
 0x34c   : > { %v1499_v60 = vsel %vm1477_vm5, %v7564_v41, -inf }
 0x34d   : > { %1500 = vmax.xlane.f32.xlu1 %v1499_v60 }
 0x34e   : > { %2389 = vrot.lane.b32.xlu2 %v7364_v28, %s6638_s29  ;;  %v2345_v28 = vsel %vm1346_vm1, %v7379_v8, 0  ;;  %v1920_v21 = vpop.permute.xlu1 %1919 }
 0x34f   : > { %v7571_v48 = vpop.permute.xlu0 %2387  ;;  %5297 = vmatmul.msk.bf16.vlgmr.msrb.gmra.mxu2 %vm1346_vm1, %v7298_v32 }
 0x350   : > { %2360 = vmatpush.bf16.xpose.msra.mxu2 %v2354_v14 }
 0x356   : > { %1915 = vrot.lane.b32.xlu2 %v7386_v11, %s6639_s20  ;;  %v2830_v11 = vsel %vm1346_vm1, %v2807_v59, 0  ;;  %v7601_v8 = vpop.permute.xlu1 %2865  ;;  %v7614_v59 = vadd.f32 %v7458_v4, %v7413_v54  ;;  %v1941_v4 = vsel %vm1346_vm1, %v1920_v21, 0 }
 0x357   : > { %v2396_v18 = vpop.permute.xlu0 %2395 }
 0x358   : > { %2361 = vmatpush.bf16.xpose.msra.mxu2 %v2351_v5  ;;  %v2254_v39 = vpop.permute.xlu2 %2253 }
 0x359   : > { %2275 = vmatpush.bf16.msra.mxu1 %v2254_v39 }
 0x35d   : > { %2276 = vmatpush.bf16.msra.mxu1 %v7446_v53 }
 0x35e   : > { %v1922_v60 = vpop.permute.xlu1 %1921 }
 0x35f   : > { %5298 = vmatmul.msk.bf16.gmra.mxu2 %vm1346_vm1, %v7390_v17  ;;  %v7591_v24 = vpop.permute.xlu0 %2871  ;;  %v2827_v17 = vsel %vm1346_vm1, %v7418_v52, 0  ;;  %v2821_v52 = vsel %vm1346_vm1, %v7326_v0, 0  ;;  %v7625_v0 = vadd.f32 %v7546_v61, %v7465_v25 }
 0x360   : > { %2362 = vmatpush.bf16.xpose.msra.mxu2 %v2348_v30  ;;  %v7586_v32 = vpop.permute.xlu2 %2729 }
 0x361   : > { %2277 = vmatpush.bf16.msra.mxu1 %v7433_v23  ;;  %v2824_v23 = vsel %vm1346_vm1, %v7402_v45, 0  ;;  %v1484_v45 = vsel %vm1477_vm5, %v7614_v59, -inf }
 0x365   : > { %2278 = vmatpush.bf16.msra.mxu1 %v7362_v49 }
 0x366   : > { %v2398_v30 = vpop.permute.xlu1 %2397 }
 0x367   : > { %v2420_v21 = vsel %vm1346_vm1, %v2398_v30, 0 }
 0x368   : > { %2363 = vmatpush.bf16.xpose.msra.mxu2 %v2345_v28  ;;  %v7595_v53 = vpop.permute.xlu2 %3205  ;;  %v7599_v36 = vpop.permute.xlu0 %2391  ;;  %v1496_v28 = vsel %vm1477_vm5, %v7625_v0, -inf }
 0x36e   : > { %v2874_v61 = vpop.permute.xlu1 %2873 }
 0x36f   : > { %5299 = vmatmul.msk.bf16.gmra.mxu2 %vm1346_vm1, %v7452_v16  ;;  %v1944_v16 = vsel %vm1346_vm1, %v1922_v60, 0  ;;  %v2417_v60 = vsel %vm1346_vm1, %v2396_v18, 0 }
 0x370   : > { %2836 = vmatpush.bf16.xpose.msrb.mxu2 %v2830_v11  ;;  %v7605_v14 = vpop.permute.xlu2 %2385 }
 0x371   : > { %v1924_v62 = vpop.permute.xlu0 %1923 }
 0x372   : > { %v1947_v49 = vsel %vm1346_vm1, %v1924_v62, 0 }
 0x373   : > { %1953 = vmatpush.bf16.xpose.msrb.mxu3 %v1947_v49 }
 0x376   : > { %v7637_v49 = vpop.permute.xlu1 %2867 }
 0x378   : > { %2837 = vmatpush.bf16.xpose.msrb.mxu2 %v2827_v17  ;;  %v7617_v5 = vpop.permute.xlu2 %2861 }
 0x379   : > { %v2400_v11 = vpop.permute.xlu0 %2399 }
 0x37b   : > { %1954 = vmatpush.bf16.xpose.msrb.mxu3 %v1944_v16 }
 0x37f   : > { %1485 = vmax.xlane.f32.xlu2 %v1484_v45  ;;  %5300 = vmatmul.msk.bf16.gmra.mxu2 %vm1346_vm1, %v7470_v7 }
 0x380   : > { %2838 = vmatpush.bf16.xpose.msrb.mxu2 %v2824_v23  ;;  %v1918_v39 = vpop.permute.xlu2 %1917  ;;  %v2423_v23 = vsel %vm1346_vm1, %v2400_v11, 0 }
 0x381   : > { %v1938_v17 = vsel %vm1346_vm1, %v1918_v39, 0 }
 0x383   : > { %1955 = vmatpush.bf16.xpose.msrb.mxu3 %v1941_v4 }
 0x387   : > { %1497 = vmax.xlane.f32.xlu2 %v1496_v28 }
 0x388   : > { %2839 = vmatpush.bf16.xpose.msrb.mxu2 %v2821_v52  ;;  %v2394_v7 = vpop.permute.xlu2 %2393 }
 0x389   : > { %v2414_v18 = vsel %vm1346_vm1, %v2394_v7, 0 }
 0x38b   : > { %1956 = vmatpush.bf16.xpose.msrb.mxu3 %v1938_v17 }
 0x38f   : > { %5313 = vmatmul.msk.bf16.vlgmr.msra.gmra.mxu2 %vm1346_vm1, %v7292_v10 }
 0x390   : > { %v2870_v62 = vpop.permute.xlu2 %2869 }
 0x392   : > { %5301 = vmatmul.msk.bf16.vlgmr.msrb.gmra.mxu3 %vm1346_vm1, %v7555_v57  ;;  %v2876_v57 = vpop.permute.xlu0 %2875 }
 0x393   : > { %2429 = vmatpush.bf16.xpose.msra.mxu3 %v2423_v23  ;;  %v2899_v39 = vsel %vm1346_vm1, %v2876_v57, 0 }
 0x398   : > { %v7649_v4 = vpop.permute.xlu2 %2863 }
 0x39b   : > { %2430 = vmatpush.bf16.xpose.msra.mxu3 %v2420_v21  ;;  %v1457_v52 = vpop.f32.mrf.mxu3  ;;  %v2896_v21 = vsel %vm1346_vm1, %v2874_v61, 0 }
 0x39c   : > { %v7641_v16 = vadd.f32 %v1457_v52, %v7468_v19 }
 0x39e   : > { %v1502_v10 = vsel %vm1477_vm5, %v7641_v16, -inf }
 0x39f   : > { %5314 = vmatmul.msk.bf16.gmra.mxu2 %vm1346_vm1, %v7322_v27  ;;  %1503 = vmax.xlane.f32.xlu1 %v1502_v10 }
 0x3a0   : > { %v1914_v7 = vpop.permute.xlu2 %1913 }
 0x3a1   : > { %v1480_v45 = vpop.xlane.xlu1 %1479 }
 0x3a2   : > { %5302 = vmatmul.msk.bf16.gmra.mxu3 %vm1346_vm1, %v7581_v13  ;;  %v1526_v28 = vsub.f32 %v7479_v12, %v1480_v45  ;;  %v2893_v45 = vsel %vm1346_vm1, %v7591_v24, 0  ;;  %v2890_v24 = vsel %vm1346_vm1, %v2870_v62, 0 }
 0x3a3   : > { %2431 = vmatpush.bf16.xpose.msra.mxu3 %v2417_v60  ;;  %v1459_v30 = vpop.f32.mrf.mxu3 }
 0x3a4   : > { %v7655_v27 = vadd.f32 %v1459_v30, %v7499_v56  ;;  %v1542_v17 = vmul.f32 1.442695, %v1526_v28 }
 0x3a6   : > { %v1505_v11 = vsel %vm1477_vm5, %v7655_v27, -inf  ;;  %6029 = vpow2.f32 %v1542_v17 }
 0x3a7   : > { %1506 = vmax.xlane.f32.xlu0 %v1505_v11 }
 0x3ab   : > { %2432 = vmatpush.bf16.xpose.msra.mxu3 %v2414_v18  ;;  %v1462_v13 = vpop.f32.mrf.mxu3 }
 0x3ac   : > { %v1483_v23 = vpop.xlane.xlu0 %1482  ;;  %v7661_v60 = vadd.f32 %v1462_v13, %v7413_v54  ;;  %v6030_v61 = vpop.eup %6029 }
 0x3ad   : > { %v1527_v12 = vsub.f32 %v7507_v20, %v1483_v23  ;;  %v1638_v20 = vpack.c.bf16 %v6030_v61, %v6030_v61 }
 0x3ae   : > { %v1508_v10 = vsel %vm1477_vm5, %v7661_v60, -inf }
 0x3af   : > { %v1544_v52 = vmul.f32 1.442695, %v1527_v12  ;;  %5315 = vmatmul.msk.bf16.gmra.mxu2 %vm1346_vm1, %v7472_v44  ;;  %1509 = vmax.xlane.f32.xlu0 %v1508_v10  ;;  %v7676_v44 = vpop.permute.xlu2 %2389  ;;  %v1662_v11 = vunpack.c.l.b16 %v1638_v20  ;;  %v1574_v20 = vsel %vm1477_vm5, %v6030_v61, 0.0 }
 0x3b1   : > { %6031 = vpow2.f32 %v1544_v52 }
 0x3b2   : > { %5303 = vmatmul.msk.bf16.gmra.mxu3 %vm1346_vm1, %v1914_v7 }
 0x3b3   : > { %2905 = vmatpush.bf16.xpose.msrb.mxu3 %v2899_v39  ;;  %v1464_v57 = vpop.f32.mrf.mxu3 }
 0x3b4   : > { %v7672_v18 = vadd.f32 %v1464_v57, %v7489_v31 }
 0x3b6   : > { %v1511_v30 = vsel %vm1477_vm5, %v7672_v18, -inf }
 0x3b7   : > { %v7674_v39 = vpop.eup %6031  ;;  %1512 = vmax.xlane.f32.xlu1 %v1511_v30  ;;  %v1916_v12 = vpop.permute.xlu2 %1915 }
 0x3b8   : > { %v1639_v28 = vpack.c.bf16 %v7674_v39, %v7674_v39 }
 0x3ba   : > { %v1663_v17 = vunpack.c.l.b16 %v1639_v28 }
 0x3bb   : > { %2906 = vmatpush.bf16.xpose.msrb.mxu3 %v2896_v21  ;;  %v1467_v13 = vpop.f32.mrf.mxu3 }
 0x3bc   : > { %v1670_v23 = vpack.c.b16 %v1663_v17, %v1662_v11  ;;  %v7684_v21 = vadd.f32 %v1467_v13, %v7525_v34  ;;  %v1489_v17 = vpop.xlane.xlu1 %1488 }
 0x3be   : > { %5289 = vmatmul.msk.bf16.vlgmr.msrb.gmra.mxu0 %vm1477_vm5, %v1670_v23  ;;  %v1514_v7 = vsel %vm1477_vm5, %v7684_v21, -inf  ;;  %v1529_v23 = vsub.f32 %v7502_v22, %v1489_v17 }
 0x3bf   : > { %5316 = vmatmul.msk.bf16.gmra.mxu2 %vm1346_vm1, %v7512_v35  ;;  %2678 = vmatpush.bf16.msrb.mxu0 %v7518_v46 }
 0x3c0   : > { %1515 = vmax.xlane.f32.xlu1 %v1514_v7 }
 0x3c2   : > { %5304 = vmatmul.msk.bf16.gmra.mxu3 %vm1346_vm1, %v1916_v12  ;;  %v1548_v12 = vmul.f32 1.442695, %v1529_v23 }
 0x3c3   : > { %2907 = vmatpush.bf16.xpose.msrb.mxu3 %v2893_v45  ;;  %2679 = vmatpush.bf16.msrb.mxu0 %v7450_v6  ;;  %v1469_v62 = vpop.f32.mrf.mxu3 }
 0x3c4   : > { %v7695_v52 = vadd.f32 %v1469_v62, %v7516_v51  ;;  %v1495_v62 = vpop.xlane.xlu1 %1494  ;;  %6033 = vpow2.f32 %v1548_v12 }
 0x3c6   : > { %v1517_v35 = vsel %vm1477_vm5, %v7695_v52, -inf }
 0x3c7   : > { %2680 = vmatpush.bf16.msrb.mxu0 %v7358_v42  ;;  %1518 = vmax.xlane.f32.xlu0 %v1517_v35  ;;  %v1492_v35 = vpop.xlane.xlu0 %1491 }
 0x3cb   : > { %2908 = vmatpush.bf16.xpose.msrb.mxu3 %v2890_v24  ;;  %2681 = vmatpush.bf16.msrb.mxu0 %v7312_v58  ;;  %v1472_v46 = vpop.f32.mrf.mxu3 }
 0x3cc   : > { %v7702_v10 = vadd.f32 %v1472_v46, %v7465_v25 }
 0x3ce   : > { %v1520_v6 = vsel %vm1477_vm5, %v7702_v10, -inf }
 0x3cf   : > { %5329 = vmatmul.msk.bf16.vlgmr.msrb.gmra.mxu2 %vm1346_vm1, %v7302_v9  ;;  %1521 = vmax.xlane.f32.xlu0 %v1520_v6 }
 0x3d2   : > { %v1889_v57 = vpop.f32.mrf.mxu2  ;;  %5317 = vmatmul.msk.bf16.vlgmr.msra.gmra.mxu3 %vm1346_vm1, %v7605_v14 }
 0x3d3   : > { %v7711_v42 = vadd.f32 %v1889_v57, %v7468_v19  ;;  %v1474_v45 = vpop.f32.mrf.mxu3 }
 0x3d4   : > { %v7717_v9 = vadd.f32 %v1474_v45, %v7553_v37 }
 0x3d5   : > { %v1978_v58 = vsel %vm1477_vm5, %v7711_v42, -inf }
 0x3d6   : > { %1979 = vmax.xlane.f32.xlu2 %v1978_v58  ;;  %v1523_v28 = vsel %vm1477_vm5, %v7717_v9, -inf  ;;  %v1530_v58 = vsub.f32 %v7535_v1, %v1492_v35 }
 0x3d7   : > { %1575 = vadd.xlane.f32.xlu0 %v1574_v20 }
 0x3da   : > { %v1891_v30 = vpop.f32.mrf.mxu2 }
 0x3db   : > { %v7724_v14 = vadd.f32 %v1891_v30, %v7499_v56  ;;  %v1550_v30 = vmul.f32 1.442695, %v1530_v58 }
 0x3dd   : > { %v1981_v61 = vsel %vm1477_vm5, %v7724_v14, -inf }
 0x3de   : > { %1524 = vmax.xlane.f32.xlu2 %v1523_v28  ;;  %v1501_v28 = vpop.xlane.xlu1 %1500 }
 0x3df   : > { %5330 = vmatmul.msk.bf16.gmra.mxu2 %vm1346_vm1, %v7400_v15  ;;  %v1533_v1 = vsub.f32 %v7564_v41, %v1501_v28 }
 0x3e2   : > { %v1894_v11 = vpop.f32.mrf.mxu2  ;;  %5318 = vmatmul.msk.bf16.gmra.mxu3 %vm1346_vm1, %v7571_v48 }
 0x3e3   : > { %v7731_v13 = vadd.f32 %v1894_v11, %v7413_v54 }
 0x3e5   : > { %v1984_v48 = vsel %vm1477_vm5, %v7731_v13, -inf }
 0x3e6   : > { %1982 = vmax.xlane.f32.xlu2 %v1981_v61  ;;  %v1531_v61 = vsub.f32 %v7530_v33, %v1495_v62  ;;  %v1556_v33 = vmul.f32 1.442695, %v1533_v1 }
 0x3e8   : > { %v1552_v35 = vmul.f32 1.442695, %v1531_v61 }
 0x3ea   : > { %v1896_v24 = vpop.f32.mrf.mxu2 }
 0x3eb   : > { %v7735_v15 = vadd.f32 %v1896_v24, %v7489_v31 }
 0x3ed   : > { %v1987_v7 = vsel %vm1477_vm5, %v7735_v15, -inf }
 0x3ee   : > { %1988 = vmax.xlane.f32.xlu0 %v1987_v7  ;;  %1985 = vmax.xlane.f32.xlu2 %v1984_v48 }
 0x3ef   : > { %5331 = vmatmul.msk.bf16.gmra.mxu2 %vm1346_vm1, %v7440_v38  ;;  %v1577_v38 = vsel %vm1477_vm5, %v7674_v39, 0.0 }
 0x3f2   : > { %v1486_v46 = vpop.xlane.xlu2 %1485  ;;  %v1899_v6 = vpop.f32.mrf.mxu2  ;;  %5319 = vmatmul.msk.bf16.gmra.mxu3 %vm1346_vm1, %v7676_v44 }
 0x3f3   : > { %v1528_v22 = vsub.f32 %v7614_v59, %v1486_v46  ;;  %v7747_v57 = vadd.f32 %v1899_v6, %v7525_v34  ;;  %v6034_v44 = vpop.eup %6033 }
 0x3f4   : > { %v1641_v24 = vpack.c.bf16 %v6034_v44, %v6034_v44  ;;  %v1583_v39 = vsel %vm1477_vm5, %v6034_v44, 0.0 }
 0x3f5   : > { %v1546_v45 = vmul.f32 1.442695, %v1528_v22  ;;  %v1990_v20 = vsel %vm1477_vm5, %v7747_v57, -inf }
 0x3f6   : > { %1991 = vmax.xlane.f32.xlu1 %v1990_v20  ;;  %1578 = vadd.xlane.f32.xlu2 %v1577_v38  ;;  %v1665_v62 = vunpack.c.l.b16 %v1641_v24 }
 0x3f7   : > { %6035 = vpow2.f32 %v1546_v45 }
 0x3f8   : > { %6037 = vpow2.f32 %v1550_v30 }
 0x3fa   : > { %v1498_v11 = vpop.xlane.xlu2 %1497  ;;  %v1901_v59 = vpop.f32.mrf.mxu2 }
 0x3fb   : > { %v1532_v17 = vsub.f32 %v7625_v0, %v1498_v11  ;;  %v7762_v41 = vadd.f32 %v1901_v59, %v7516_v51 }
 0x3fd   : > { %v6036_v23 = vpop.eup %6035  ;;  %v1554_v7 = vmul.f32 1.442695, %v1532_v17  ;;  %v1993_v20 = vsel %vm1477_vm5, %v7762_v41, -inf }
 0x3fe   : > { %1584 = vadd.xlane.f32.xlu2 %v1583_v39  ;;  %v1580_v48 = vsel %vm1477_vm5, %v6036_v23, 0.0  ;;  %v1640_v12 = vpack.c.bf16 %v6036_v23, %v6036_v23  ;;  %v6038_v46 = vpop.eup %6037 }
 0x3ff   : > { %6039 = vpow2.f32 %v1554_v7  ;;  %1581 = vadd.xlane.f32.xlu0 %v1580_v48  ;;  %5332 = vmatmul.msk.bf16.gmra.mxu2 %vm1346_vm1, %v7494_v3  ;;  %v1586_v45 = vsel %vm1477_vm5, %v6038_v46, 0.0  ;;  %v1642_v28 = vpack.c.bf16 %v6038_v46, %v6038_v46 }
 0x400   : > { %v1664_v0 = vunpack.c.l.b16 %v1640_v12  ;;  %6041 = vpow2.f32 %v1552_v35 }
 0x401   : > { %6043 = vpow2.f32 %v1556_v33  ;;  %v1666_v17 = vunpack.c.l.b16 %v1642_v28 }
 0x402   : > { %v1904_v6 = vpop.f32.mrf.mxu2  ;;  %5320 = vmatmul.msk.bf16.gmra.mxu3 %vm1346_vm1, %v7599_v36  ;;  %v1671_v22 = vpack.c.b16 %v1665_v62, %v1664_v0 }
 0x403   : > { %v7772_v36 = vadd.f32 %v1904_v6, %v7465_v25 }
 0x404   : > { %5290 = vmatmul.msk.bf16.gmra.mxu0 %vm1477_vm5, %v1671_v22 }
 0x405   : > { %v6040_v58 = vpop.eup %6039  ;;  %v1996_v61 = vsel %vm1477_vm5, %v7772_v36, -inf }
 0x406   : > { %1587 = vadd.xlane.f32.xlu2 %v1586_v45  ;;  %v1592_v3 = vsel %vm1477_vm5, %v6040_v58, 0.0  ;;  %v6042_v38 = vpop.eup %6041  ;;  %v1644_v62 = vpack.c.bf16 %v6040_v58, %v6040_v58 }
 0x407   : > { %1593 = vadd.xlane.f32.xlu1 %v1592_v3  ;;  %1994 = vmax.xlane.f32.xlu0 %v1993_v20  ;;  %v6044_v30 = vpop.eup %6043  ;;  %v1643_v11 = vpack.c.bf16 %v6042_v38, %v6042_v38  ;;  %v1589_v12 = vsel %vm1477_vm5, %v6042_v38, 0.0 }
 0x408   : > { %v1595_v59 = vsel %vm1477_vm5, %v6044_v30, 0.0  ;;  %v1645_v6 = vpack.c.bf16 %v6044_v30, %v6044_v30  ;;  %v1668_v20 = vunpack.c.l.b16 %v1644_v62 }
 0x409   : > { %v1667_v1 = vunpack.c.l.b16 %v1643_v11 }
 0x40a   : > { %v1906_v44 = vpop.f32.mrf.mxu2  ;;  %v1669_v58 = vunpack.c.l.b16 %v1645_v6 }
 0x40b   : > { %v1672_v23 = vpack.c.b16 %v1667_v1, %v1666_v17  ;;  %v7783_v33 = vadd.f32 %v1906_v44, %v7553_v37 }
 0x40c   : > { %v1673_v28 = vpack.c.b16 %v1669_v58, %v1668_v20 }
 0x40d   : > { %v1999_v3 = vsel %vm1477_vm5, %v7783_v33, -inf }
 0x40e   : > { %1596 = vadd.xlane.f32.xlu2 %v1595_v59 }
 0x40f   : > { %1997 = vmax.xlane.f32.xlu0 %v1996_v61 }
 0x412   : > { %v2365_v24 = vpop.f32.mrf.mxu2  ;;  %5333 = vmatmul.msk.bf16.vlgmr.msrb.gmra.mxu3 %vm1346_vm1, %v7617_v5  ;;  %v1504_v7 = vpop.xlane.xlu1 %1503 }
 0x413   : > { %v1534_v39 = vsub.f32 %v7641_v16, %v1504_v7 }
 0x414   : > { %5291 = vmatmul.msk.bf16.gmra.mxu0 %vm1477_vm5, %v1672_v23 }
 0x415   : > { %v1958_v48 = vpop.f32.mrf.mxu3  ;;  %v1558_v35 = vmul.f32 1.442695, %v1534_v39 }
 0x417   : > { %1590 = vadd.xlane.f32.xlu0 %v1589_v12  ;;  %6045 = vpow2.f32 %v1558_v35 }
 0x41a   : > { %v2367_v0 = vpop.f32.mrf.mxu2  ;;  %v1507_v46 = vpop.xlane.xlu0 %1506 }
 0x41b   : > { %v1535_v5 = vsub.f32 %v7655_v27, %v1507_v46  ;;  %v7796_v27 = vadd.f32 %v1958_v48, %v7468_v19  ;;  %v7821_v46 = vadd.f32 %v2365_v24, %v7468_v19 }
 0x41d   : > { %v1960_v22 = vpop.f32.mrf.mxu3  ;;  %v1560_v45 = vmul.f32 1.442695, %v1535_v5  ;;  %v7793_v44 = vpop.eup %6045  ;;  %v2454_v58 = vsel %vm1477_vm5, %v7821_v46, -inf }
 0x41e   : > { %v7787_v16 = vadd.f32 %v1960_v22, %v7499_v56  ;;  %v1646_v17 = vpack.c.bf16 %v7793_v44, %v7793_v44 }
 0x41f   : > { %2000 = vmax.xlane.f32.xlu0 %v1999_v3  ;;  %6047 = vpow2.f32 %v1560_v45 }
 0x420   : > { %v2005_v38 = vsel %vm1477_vm5, %v7787_v16, -inf  ;;  %v1747_v35 = vunpack.c.l.b16 %v1646_v17 }
 0x421   : > { %2006 = vmax.xlane.f32.xlu1 %v2005_v38 }
 0x422   : > { %v2370_v30 = vpop.f32.mrf.mxu2  ;;  %5334 = vmatmul.msk.bf16.gmra.mxu3 %vm1346_vm1, %v7649_v4  ;;  %v1510_v11 = vpop.xlane.xlu0 %1509  ;;  %v2002_v4 = vsel %vm1477_vm5, %v7796_v27, -inf }
 0x423   : > { %v7801_v59 = vadd.f32 %v2370_v30, %v7413_v54  ;;  %v1536_v61 = vsub.f32 %v7661_v60, %v1510_v11 }
 0x424   : > { %5292 = vmatmul.msk.bf16.gmra.mxu0 %vm1477_vm5, %v1673_v28  ;;  %v7836_v28 = vadd.f32 %v2367_v0, %v7499_v56 }
 0x425   : > { %v1963_v1 = vpop.f32.mrf.mxu3  ;;  %v7807_v23 = vpop.eup %6047  ;;  %v1562_v48 = vmul.f32 1.442695, %v1536_v61  ;;  %v2460_v60 = vsel %vm1477_vm5, %v7801_v59, -inf }
 0x426   : > { %9139 = vst [vmem:[#allocation22_spill] sm:$0xff] %v7807_v23  ;;  %v7810_v7 = vadd.f32 %v1963_v1, %v7413_v54  ;;  %v1647_v39 = vpack.c.bf16 %v7807_v23, %v7807_v23 }
 0x427   : > { %2003 = vmax.xlane.f32.xlu0 %v2002_v4  ;;  %6049 = vpow2.f32 %v1562_v48 }
 0x428   : > { %v2008_v12 = vsel %vm1477_vm5, %v7810_v7, -inf  ;;  %v1748_v62 = vunpack.c.l.b16 %v1647_v39 }
 0x429   : > { %2461 = vmax.xlane.f32.xlu1 %v2460_v60  ;;  %2009 = vmax.xlane.f32.xlu2 %v2008_v12 }
 0x42a   : > { %v2372_v5 = vpop.f32.mrf.mxu2  ;;  %v1513_v6 = vpop.xlane.xlu1 %1512  ;;  %v1755_v22 = vpack.c.b16 %v1748_v62, %v1747_v35 }
 0x42b   : > { %v7824_v45 = vadd.f32 %v2372_v5, %v7489_v31  ;;  %v1537_v3 = vsub.f32 %v7672_v18, %v1513_v6 }
 0x42c   : > { %5293 = vmatmul.msk.bf16.vlgmr.msrb.gmra.mxu1 %vm1477_vm5, %v1755_v22 }
 0x42d   : > { %v1965_v20 = vpop.f32.mrf.mxu3  ;;  %v1564_v38 = vmul.f32 1.442695, %v1537_v3  ;;  %2751 = vmatpush.bf16.msrb.mxu1 %v7586_v32  ;;  %v2463_v24 = vsel %vm1477_vm5, %v7824_v45, -inf  ;;  %v7833_v30 = vpop.eup %6049 }
 0x42e   : > { %9140 = vst [vmem:[#allocation23_spill] sm:$0xff] %v7833_v30  ;;  %v1648_v0 = vpack.c.bf16 %v7833_v30, %v7833_v30  ;;  %v7862_v35 = vadd.f32 %v1965_v20, %v7489_v31 }
 0x42f   : > { %2455 = vmax.xlane.f32.xlu0 %v2454_v58  ;;  %6051 = vpow2.f32 %v1564_v38 }
 0x430   : > { %v1749_v60 = vunpack.c.l.b16 %v1648_v0  ;;  %v2011_v58 = vsel %vm1477_vm5, %v7862_v35, -inf }
 0x431   : > { %2464 = vmax.xlane.f32.xlu2 %v2463_v24  ;;  %2752 = vmatpush.bf16.msrb.mxu1 %v7491_v55 }
 0x432   : > { %v2375_v18 = vpop.f32.mrf.mxu2  ;;  %5335 = vmatmul.msk.bf16.gmra.mxu3 %vm1346_vm1, %v7601_v8  ;;  %v2457_v8 = vsel %vm1477_vm5, %v7836_v28, -inf }
 0x433   : > { %v7842_v32 = vadd.f32 %v2375_v18, %v7525_v34  ;;  %v1516_v11 = vpop.xlane.xlu1 %1515 }
 0x434   : > { %v1538_v61 = vsub.f32 %v7684_v21, %v1516_v11 }
 0x435   : > { %v1968_v17 = vpop.f32.mrf.mxu3  ;;  %v2466_v1 = vsel %vm1477_vm5, %v7842_v32, -inf  ;;  %v7849_v4 = vpop.eup %6051  ;;  %2753 = vmatpush.bf16.msrb.mxu1 %v7431_v63 }
 0x436   : > { %9141 = vst [vmem:[#allocation24_spill] sm:$0xff] %v7849_v4  ;;  %v7852_v55 = vadd.f32 %v1968_v17, %v7525_v34  ;;  %2467 = vmax.xlane.f32.xlu1 %v2466_v1  ;;  %v1649_v21 = vpack.c.bf16 %v7849_v4, %v7849_v4  ;;  %v1566_v39 = vmul.f32 1.442695, %v1538_v61 }
 0x437   : > { %2458 = vmax.xlane.f32.xlu0 %v2457_v8 }
 0x438   : > { %v2014_v48 = vsel %vm1477_vm5, %v7852_v55, -inf  ;;  %v1750_v12 = vunpack.c.l.b16 %v1649_v21  ;;  %6053 = vpow2.f32 %v1566_v39 }
 0x439   : > { %2015 = vmax.xlane.f32.xlu2 %v2014_v48  ;;  %2754 = vmatpush.bf16.msrb.mxu1 %v7388_v2 }
 0x43a   : > { %v2377_v62 = vpop.f32.mrf.mxu2  ;;  %v1519_v63 = vpop.xlane.xlu0 %1518  ;;  %v1756_v5 = vpack.c.b16 %v1750_v12, %v1749_v60 }
 0x43b   : > { %v7866_v6 = vadd.f32 %v2377_v62, %v7516_v51  ;;  %v1539_v22 = vsub.f32 %v7695_v52, %v1519_v63 }
 0x43c   : > { %5294 = vmatmul.msk.bf16.gmra.mxu1 %vm1477_vm5, %v1756_v5 }
 0x43d   : > { %v1970_v3 = vpop.f32.mrf.mxu3  ;;  %v1568_v38 = vmul.f32 1.442695, %v1539_v22  ;;  %v2469_v2 = vsel %vm1477_vm5, %v7866_v6, -inf }
 0x43e   : > { %v7874_v20 = vpop.eup %6053  ;;  %v7877_v24 = vadd.f32 %v1970_v3, %v7516_v51 }
 0x43f   : > { %2012 = vmax.xlane.f32.xlu0 %v2011_v58  ;;  %6055 = vpow2.f32 %v1568_v38  ;;  %9142 = vst [vmem:[#allocation25_spill] sm:$0xff] %v7874_v20  ;;  %v1650_v61 = vpack.c.bf16 %v7874_v20, %v7874_v20 }
 0x440   : > { %v2017_v1 = vsel %vm1477_vm5, %v7877_v24, -inf }
 0x441   : > { %2470 = vmax.xlane.f32.xlu2 %v2469_v2  ;;  %v1751_v39 = vunpack.c.l.b16 %v1650_v61 }
 0x442   : > { %v2380_v18 = vpop.f32.mrf.mxu2  ;;  %5336 = vmatmul.msk.bf16.gmra.mxu3 %vm1346_vm1, %v7637_v49  ;;  %v1522_v0 = vpop.xlane.xlu0 %1521 }
 0x443   : > { %v7882_v52 = vadd.f32 %v2380_v18, %v7465_v25  ;;  %v1540_v60 = vsub.f32 %v7702_v10, %v1522_v0 }
 0x445   : > { %v1973_v11 = vpop.f32.mrf.mxu3  ;;  %v7886_v17 = vpop.eup %6055  ;;  %v2472_v49 = vsel %vm1477_vm5, %v7882_v52, -inf  ;;  %v1570_v22 = vmul.f32 1.442695, %v1540_v60 }
 0x446   : > { %9143 = vst [vmem:[#allocation26_spill] sm:$0xff] %v7886_v17  ;;  %v1651_v8 = vpack.c.bf16 %v7886_v17, %v7886_v17  ;;  %v7896_v12 = vadd.f32 %v1973_v11, %v7465_v25 }
 0x447   : > { %2018 = vmax.xlane.f32.xlu0 %v2017_v1  ;;  %6057 = vpow2.f32 %v1570_v22 }
 0x448   : > { %v1752_v48 = vunpack.c.l.b16 %v1651_v8  ;;  %v2020_v38 = vsel %vm1477_vm5, %v7896_v12, -inf }
 0x449   : > { %v1980_v21 = vpop.xlane.xlu2 %1979  ;;  %2473 = vmax.xlane.f32.xlu2 %v2472_v49 }
 0x44a   : > { %v2382_v62 = vpop.f32.mrf.mxu2  ;;  %v1757_v63 = vpack.c.b16 %v1752_v48, %v1751_v39  ;;  %v2026_v2 = vsub.f32 %v7711_v42, %v1980_v21  ;;  %v7920_v21 = vpop.xlane.xlu0 %1575 }
 0x44b   : > { %v7908_v18 = vadd.f32 %v2382_v62, %v7553_v37  ;;  %9145 = vst [vmem:[#allocation28_spill] sm:$0xff] %v7920_v21 }
 0x44c   : > { %5295 = vmatmul.msk.bf16.gmra.mxu1 %vm1477_vm5, %v1757_v63  ;;  %v2042_v8 = vmul.f32 1.442695, %v2026_v2 }
 0x44d   : > { %v1975_v5 = vpop.f32.mrf.mxu3  ;;  %v2475_v39 = vsel %vm1477_vm5, %v7908_v18, -inf  ;;  %v7916_v48 = vpop.eup %6057 }
 0x44e   : > { %v7900_v3 = vadd.f32 %v1975_v5, %v7553_v37  ;;  %9144 = vst [vmem:[#allocation27_spill] sm:$0xff] %v7916_v48  ;;  %v1652_v5 = vpack.c.bf16 %v7916_v48, %v7916_v48 }
 0x44f   : > { %2021 = vmax.xlane.f32.xlu0 %v2020_v38 }
 0x450   : > { %v2023_v58 = vsel %vm1477_vm5, %v7900_v3, -inf }
 0x451   : > { %v1525_v10 = vpop.xlane.xlu2 %1524  ;;  %2024 = vmax.xlane.f32.xlu1 %v2023_v58 }
 0x452   : > { %v1541_v11 = vsub.f32 %v7717_v9, %v1525_v10  ;;  %v2841_v61 = vpop.f32.mrf.mxu2 }
 0x453   : > { %v7923_v60 = vadd.f32 %v2841_v61, %v7468_v19  ;;  %v1753_v61 = vunpack.c.l.b16 %v1652_v5 }
 0x454   : > { %v1572_v1 = vmul.f32 1.442695, %v1541_v11 }
 0x455   : > { %v2434_v0 = vpop.f32.mrf.mxu3 }
 0x456   : > { %6059 = vpow2.f32 %v1572_v1  ;;  %v7912_v49 = vadd.f32 %v2434_v0, %v7468_v19 }
 0x457   : > { %2476 = vmax.xlane.f32.xlu0 %v2475_v39  ;;  %6061 = vpow2.f32 %v2042_v8 }
 0x458   : > { %v2478_v42 = vsel %vm1477_vm5, %v7912_v49, -inf }
 0x459   : > { %v1983_v9 = vpop.xlane.xlu2 %1982  ;;  %2479 = vmax.xlane.f32.xlu1 %v2478_v42 }
 0x45a   : > { %v2027_v62 = vsub.f32 %v7724_v14, %v1983_v9  ;;  %v2843_v63 = vpop.f32.mrf.mxu2  ;;  %v2930_v14 = vsel %vm1477_vm5, %v7923_v60, -inf }
 0x45b   : > { %v7931_v58 = vadd.f32 %v2843_v63, %v7499_v56 }
 0x45c   : > { %v7928_v22 = vpop.eup %6059  ;;  %v2044_v38 = vmul.f32 1.442695, %v2027_v62 }
 0x45d   : > { %9146 = vst [vmem:[#allocation29_spill] sm:$0xff] %v7928_v22  ;;  %v2436_v10 = vpop.f32.mrf.mxu3  ;;  %v1653_v2 = vpack.c.bf16 %v7928_v22, %v7928_v22  ;;  %v6062_v0 = vpop.eup %6061  ;;  %v2933_v8 = vsel %vm1477_vm5, %v7931_v58, -inf }
 0x45e   : > { %6063 = vpow2.f32 %v2044_v38  ;;  %v7936_v11 = vadd.f32 %v2436_v10, %v7499_v56  ;;  %v2074_v17 = vsel %vm1477_vm5, %v6062_v0, 0.0 }
 0x45f   : > { %2931 = vmax.xlane.f32.xlu0 %v2930_v14  ;;  %v1754_v1 = vunpack.c.l.b16 %v1653_v2  ;;  %v2138_v14 = vpack.c.bf16 %v6062_v0, %v6062_v0 }
 0x460   : > { %v2481_v39 = vsel %vm1477_vm5, %v7936_v11, -inf }
 0x461   : > { %v1986_v42 = vpop.xlane.xlu2 %1985  ;;  %v1989_v9 = vpop.xlane.xlu0 %1988  ;;  %2934 = vmax.xlane.f32.xlu1 %v2933_v8  ;;  %2482 = vmax.xlane.f32.xlu2 %v2481_v39  ;;  %v1758_v62 = vpack.c.b16 %v1754_v1, %v1753_v61  ;;  %v2162_v30 = vunpack.c.l.b16 %v2138_v14 }
 0x462   : > { %v2028_v63 = vsub.f32 %v7731_v13, %v1986_v42  ;;  %v2029_v38 = vsub.f32 %v7735_v15, %v1989_v9  ;;  %v2846_v10 = vpop.f32.mrf.mxu2 }
 0x463   : > { %5296 = vmatmul.msk.bf16.gmra.mxu1 %vm1477_vm5, %v1758_v62  ;;  %v7954_v8 = vadd.f32 %v2846_v10, %v7413_v54 }
 0x464   : > { %v6064_v5 = vpop.eup %6063  ;;  %v2046_v2 = vmul.f32 1.442695, %v2028_v63  ;;  %v2048_v22 = vmul.f32 1.442695, %v2029_v38 }
 0x465   : > { %v2139_v48 = vpack.c.bf16 %v6064_v5, %v6064_v5  ;;  %v2439_v20 = vpop.f32.mrf.mxu3  ;;  %v2077_v13 = vsel %vm1477_vm5, %v6064_v5, 0.0 }
 0x466   : > { %6065 = vpow2.f32 %v2046_v2  ;;  %v7950_v15 = vadd.f32 %v2439_v20, %v7413_v54  ;;  %v2936_v20 = vsel %vm1477_vm5, %v7954_v8, -inf }
 0x467   : > { %v2163_v4 = vunpack.c.l.b16 %v2139_v48  ;;  %2075 = vadd.xlane.f32.xlu0 %v2074_v17  ;;  %6067 = vpow2.f32 %v2048_v22 }
 0x469   : > { %v2170_v61 = vpack.c.b16 %v2163_v4, %v2162_v30  ;;  %2078 = vadd.xlane.f32.xlu2 %v2077_v13  ;;  %v2484_v30 = vsel %vm1477_vm5, %v7950_v15, -inf  ;;  %v1992_v42 = vpop.xlane.xlu1 %1991  ;;  %v7971_v14 = vpop.xlane.xlu2 %1578 }
 0x46a   : > { %v2848_v1 = vpop.f32.mrf.mxu2  ;;  %v2030_v63 = vsub.f32 %v7747_v57, %v1992_v42  ;;  %9147 = vst [vmem:[#allocation30_spill] sm:$0xff] %v7971_v14 }
 0x46b   : > { %5305 = vmatmul.msk.bf16.vlgmr.msra.gmra.mxu0 %vm1477_vm5, %v2170_v61 }
 0x46c   : > { %3154 = vmatpush.bf16.msra.mxu0 %v7539_v29  ;;  %v6066_v0 = vpop.eup %6065  ;;  %v2050_v13 = vmul.f32 1.442695, %v2030_v63 }
 0x46d   : > { %v2441_v48 = vpop.f32.mrf.mxu3  ;;  %v6068_v39 = vpop.eup %6067  ;;  %v2140_v22 = vpack.c.bf16 %v6066_v0, %v6066_v0  ;;  %v2080_v2 = vsel %vm1477_vm5, %v6066_v0, 0.0 }
 0x46e   : > { %v7958_v17 = vadd.f32 %v2441_v48, %v7489_v31  ;;  %v2141_v29 = vpack.c.bf16 %v6068_v39, %v6068_v39  ;;  %v2083_v57 = vsel %vm1477_vm5, %v6068_v39, 0.0  ;;  %v7982_v48 = vadd.f32 %v2848_v1, %v7489_v31 }
 0x46f   : > { %2485 = vmax.xlane.f32.xlu0 %v2484_v30  ;;  %6069 = vpow2.f32 %v2050_v13 }
 0x470   : > { %3155 = vmatpush.bf16.msra.mxu0 %v7456_v50  ;;  %v2487_v4 = vsel %vm1477_vm5, %v7958_v17, -inf  ;;  %v2164_v50 = vunpack.c.l.b16 %v2140_v22  ;;  %v2165_v10 = vunpack.c.l.b16 %v2141_v29  ;;  %v2939_v29 = vsel %vm1477_vm5, %v7982_v48, -inf }
 0x471   : > { %2488 = vmax.xlane.f32.xlu1 %v2487_v4  ;;  %2937 = vmax.xlane.f32.xlu2 %v2936_v20  ;;  %v7994_v1 = vpop.xlane.xlu2 %1584 }
 0x472   : > { %v2851_v9 = vpop.f32.mrf.mxu2  ;;  %v7967_v62 = vpop.xlane.xlu0 %1581  ;;  %9148 = vst [vmem:[#allocation31_spill] sm:$0xff] %v7994_v1 }
 0x474   : > { %3156 = vmatpush.bf16.msra.mxu0 %v7374_v47  ;;  %v2171_v47 = vpack.c.b16 %v2165_v10, %v2164_v50 }
 0x475   : > { %v2444_v38 = vpop.f32.mrf.mxu3 }
 0x476   : > { %v7974_v5 = vadd.f32 %v2444_v38, %v7525_v34  ;;  %v8001_v38 = vadd.f32 %v2851_v9, %v7525_v34 }
 0x477   : > { %2081 = vadd.xlane.f32.xlu0 %v2080_v2 }
 0x478   : > { %3157 = vmatpush.bf16.msra.mxu0 %v7372_v40  ;;  %v2490_v61 = vsel %vm1477_vm5, %v7974_v5, -inf }
 0x479   : > { %2491 = vmax.xlane.f32.xlu1 %v2490_v61  ;;  %2084 = vadd.xlane.f32.xlu2 %v2083_v57 }
 0x47a   : > { %v2853_v30 = vpop.f32.mrf.mxu2  ;;  %v1995_v4 = vpop.xlane.xlu0 %1994 }
 0x47b   : > { %5306 = vmatmul.msk.bf16.gmra.mxu0 %vm1477_vm5, %v2171_v47  ;;  %v7986_v0 = vadd.f32 %v2853_v30, %v7516_v51  ;;  %v2031_v40 = vsub.f32 %v7762_v41, %v1995_v4  ;;  %v6070_v41 = vpop.eup %6069  ;;  %v2942_v4 = vsel %vm1477_vm5, %v8001_v38, -inf }
 0x47c   : > { %v2142_v61 = vpack.c.bf16 %v6070_v41, %v6070_v41 }
 0x47d   : > { %v2446_v20 = vpop.f32.mrf.mxu3  ;;  %v2052_v22 = vmul.f32 1.442695, %v2031_v40  ;;  %v2945_v42 = vsel %vm1477_vm5, %v7986_v0, -inf }
 0x47e   : > { %v7990_v39 = vadd.f32 %v2446_v20, %v7516_v51 }
 0x47f   : > { %2940 = vmax.xlane.f32.xlu0 %v2939_v29  ;;  %6071 = vpow2.f32 %v2052_v22  ;;  %v2166_v22 = vunpack.c.l.b16 %v2142_v61 }
 0x480   : > { %v2493_v63 = vsel %vm1477_vm5, %v7990_v39, -inf }
 0x481   : > { %2946 = vmax.xlane.f32.xlu1 %v2945_v42  ;;  %2494 = vmax.xlane.f32.xlu2 %v2493_v63 }
 0x482   : > { %v2856_v50 = vpop.f32.mrf.mxu2  ;;  %v1998_v10 = vpop.xlane.xlu0 %1997 }
 0x483   : > { %v8004_v2 = vadd.f32 %v2856_v50, %v7465_v25  ;;  %v2032_v13 = vsub.f32 %v7772_v36, %v1998_v10  ;;  %v8012_v36 = vpop.xlane.xlu2 %1587  ;;  %v8016_v50 = vpop.xlane.xlu1 %1593 }
 0x485   : > { %v2449_v57 = vpop.f32.mrf.mxu3  ;;  %v6072_v47 = vpop.eup %6071  ;;  %v2054_v30 = vmul.f32 1.442695, %v2032_v13  ;;  %v2948_v9 = vsel %vm1477_vm5, %v8004_v2, -inf }
 0x486   : > { %v2143_v40 = vpack.c.bf16 %v6072_v47, %v6072_v47  ;;  %v2089_v20 = vsel %vm1477_vm5, %v6072_v47, 0.0  ;;  %v8019_v10 = vadd.f32 %v2449_v57, %v7465_v25  ;;  %v2086_v47 = vsel %vm1477_vm5, %v6070_v41, 0.0 }
 0x487   : > { %2943 = vmax.xlane.f32.xlu0 %v2942_v4  ;;  %6073 = vpow2.f32 %v2054_v30 }
 0x488   : > { %v2167_v29 = vunpack.c.l.b16 %v2143_v40  ;;  %v2496_v61 = vsel %vm1477_vm5, %v8019_v10, -inf }
 0x489   : > { %2949 = vmax.xlane.f32.xlu1 %v2948_v9  ;;  %2090 = vadd.xlane.f32.xlu2 %v2089_v20 }
 0x48a   : > { %v8014_v42 = vpop.xlane.xlu0 %1590  ;;  %v2172_v63 = vpack.c.b16 %v2167_v29, %v2166_v22  ;;  %v2858_v40 = vpop.f32.mrf.mxu2 }
 0x48b   : > { %9149 = vst [vmem:[#allocation32_spill] sm:$0xff] %v8014_v42  ;;  %v8029_v20 = vpop.xlane.xlu2 %1596  ;;  %v8032_v22 = vadd.f32 %v2858_v40, %v7553_v37 }
 0x48c   : > { %5307 = vmatmul.msk.bf16.gmra.mxu0 %vm1477_vm5, %v2172_v63  ;;  %9150 = vst [vmem:[#allocation33_spill] sm:$0xff] %v8029_v20 }
 0x48d   : > { %v2451_v13 = vpop.f32.mrf.mxu3  ;;  %v6074_v30 = vpop.eup %6073 }
 0x48e   : > { %v2092_v4 = vsel %vm1477_vm5, %v6074_v30, 0.0  ;;  %v8027_v9 = vadd.f32 %v2451_v13, %v7553_v37 }
 0x48f   : > { %2087 = vadd.xlane.f32.xlu0 %v2086_v47 }
 0x491   : > { %2497 = vmax.xlane.f32.xlu2 %v2496_v61  ;;  %2093 = vadd.xlane.f32.xlu1 %v2092_v4  ;;  %v2499_v61 = vsel %vm1477_vm5, %v8027_v9, -inf  ;;  %v2951_v4 = vsel %vm1477_vm5, %v8032_v22, -inf }
 0x492   : > { %v2001_v57 = vpop.xlane.xlu0 %2000 }
 0x493   : > { %v2033_v41 = vsub.f32 %v7783_v33, %v2001_v57  ;;  %v2144_v57 = vpack.c.bf16 %v6074_v30, %v6074_v30 }
 0x494   : > { %v2007_v29 = vpop.xlane.xlu1 %2006 }
 0x495   : > { %v2035_v63 = vsub.f32 %v7787_v16, %v2007_v29  ;;  %v2910_v47 = vpop.f32.mrf.mxu3  ;;  %v2056_v42 = vmul.f32 1.442695, %v2033_v41 }
 0x497   : > { %2500 = vmax.xlane.f32.xlu0 %v2499_v61  ;;  %6075 = vpow2.f32 %v2056_v42  ;;  %v2060_v13 = vmul.f32 1.442695, %v2035_v63  ;;  %v2168_v42 = vunpack.c.l.b16 %v2144_v57 }
 0x499   : > { %2952 = vmax.xlane.f32.xlu2 %v2951_v4  ;;  %6077 = vpow2.f32 %v2060_v13  ;;  %v8046_v4 = vpop.f32.mrf.mxu0  ;;  %v8049_v13 = vadd.f32 %v2910_v47, %v7468_v19 }
 0x49a   : > { %v2004_v1 = vpop.xlane.xlu0 %2003  ;;  %9151 = vst [vmem:[#allocation34_spill] sm:$0xff] %v8046_v4 }
 0x49b   : > { %v2034_v40 = vsub.f32 %v7796_v27, %v2004_v1  ;;  %v2954_v4 = vsel %vm1477_vm5, %v8049_v13, -inf }
 0x49c   : > { %v2010_v33 = vpop.xlane.xlu2 %2009 }
 0x49d   : > { %v8041_v14 = vpop.f32.mrf.mxu3  ;;  %v6076_v16 = vpop.eup %6075  ;;  %v2058_v41 = vmul.f32 1.442695, %v2034_v40 }
 0x49e   : > { %v2145_v29 = vpack.c.bf16 %v6076_v16, %v6076_v16  ;;  %v2095_v21 = vsel %vm1477_vm5, %v6076_v16, 0.0 }
 0x49f   : > { %6079 = vpow2.f32 %v2058_v41  ;;  %2096 = vadd.xlane.f32.xlu0 %v2095_v21  ;;  %v8044_v61 = vpop.eup %6077 }
 0x4a0   : > { %v2169_v63 = vunpack.c.l.b16 %v2145_v29  ;;  %v2147_v40 = vpack.c.bf16 %v8044_v61, %v8044_v61 }
 0x4a2   : > { %v2456_v27 = vpop.xlane.xlu0 %2455  ;;  %v2173_v1 = vpack.c.b16 %v2169_v63, %v2168_v42  ;;  %v2236_v19 = vunpack.c.l.b16 %v2147_v40  ;;  %v8059_v63 = vpop.f32.mrf.mxu0 }
 0x4a3   : > { %v2502_v30 = vsub.f32 %v7821_v46, %v2456_v27  ;;  %v2036_v27 = vsub.f32 %v7810_v7, %v2010_v33 }
 0x4a4   : > { %5308 = vmatmul.msk.bf16.gmra.mxu0 %vm1477_vm5, %v2173_v1  ;;  %v2465_v41 = vpop.xlane.xlu2 %2464 }
 0x4a5   : > { %v8055_v16 = vpop.f32.mrf.mxu3  ;;  %v6080_v21 = vpop.eup %6079  ;;  %v2518_v57 = vmul.f32 1.442695, %v2502_v30  ;;  %v2062_v40 = vmul.f32 1.442695, %v2036_v27 }
 0x4a6   : > { %v2146_v29 = vpack.c.bf16 %v6080_v21, %v6080_v21 }
 0x4a7   : > { %6081 = vpow2.f32 %v2518_v57  ;;  %2955 = vmax.xlane.f32.xlu0 %v2954_v4 }
 0x4a8   : > { %v2235_v47 = vunpack.c.l.b16 %v2146_v29  ;;  %v2462_v29 = vpop.xlane.xlu1 %2461 }
 0x4a9   : > { %v2504_v33 = vsub.f32 %v7801_v59, %v2462_v29 }
 0x4aa   : > { %v2243_v42 = vpack.c.b16 %v2236_v19, %v2235_v47  ;;  %v2459_v46 = vpop.xlane.xlu0 %2458  ;;  %v2505_v19 = vsub.f32 %v7824_v45, %v2465_v41  ;;  %v2098_v45 = vsel %vm1477_vm5, %v6080_v21, 0.0 }
 0x4ab   : > { %v2503_v1 = vsub.f32 %v7836_v28, %v2459_v46  ;;  %v8070_v28 = vpop.f32.mrf.mxu0  ;;  %v2522_v41 = vmul.f32 1.442695, %v2504_v33 }
 0x4ac   : > { %5309 = vmatmul.msk.bf16.vlgmr.msra.gmra.mxu1 %vm1477_vm5, %v2243_v42  ;;  %v2016_v57 = vpop.xlane.xlu2 %2015  ;;  %v2524_v27 = vmul.f32 1.442695, %v2505_v19 }
 0x4ad   : > { %v8064_v30 = vpop.f32.mrf.mxu3  ;;  %v6082_v23 = vpop.eup %6081  ;;  %v2520_v20 = vmul.f32 1.442695, %v2503_v1  ;;  %3227 = vmatpush.bf16.msra.mxu1 %v7595_v53  ;;  %v2038_v19 = vsub.f32 %v7852_v55, %v2016_v57  ;;  %v2101_v55 = vsel %vm1477_vm5, %v8044_v61, 0.0 }
 0x4ae   : > { %v2550_v4 = vsel %vm1477_vm5, %v6082_v23, 0.0  ;;  %v2614_v53 = vpack.c.bf16 %v6082_v23, %v6082_v23 }
 0x4af   : > { %6083 = vpow2.f32 %v2520_v20  ;;  %2551 = vadd.xlane.f32.xlu1 %v2550_v4 }
 0x4b0   : > { %6085 = vpow2.f32 %v2062_v40  ;;  %v2638_v59 = vunpack.c.l.b16 %v2614_v53 }
 0x4b1   : > { %3228 = vmatpush.bf16.msra.mxu1 %v7475_v26 }
 0x4b2   : > { %v2013_v7 = vpop.xlane.xlu0 %2012 }
 0x4b3   : > { %v2037_v47 = vsub.f32 %v7862_v35, %v2013_v7  ;;  %v9152_v35 = vld [vmem:[#allocation21_spill] sm:$0xff]  ;;  %v8089_v53 = vpop.f32.mrf.mxu0 }
 0x4b4   : > { %v2471_v23 = vpop.xlane.xlu2 %2470 }
 0x4b5   : > { %v2920_v42 = vpop.f32.mrf.mxu3  ;;  %v6084_v46 = vpop.eup %6083  ;;  %v2064_v20 = vmul.f32 1.442695, %v2037_v47  ;;  %3229 = vmatpush.bf16.msra.mxu1 %v7442_v43  ;;  %v8082_v43 = vadd.f32 %v8041_v14, %v7499_v56 }
 0x4b6   : > { %v2615_v1 = vpack.c.bf16 %v6084_v46, %v6084_v46  ;;  %v2553_v26 = vsel %vm1477_vm5, %v6084_v46, 0.0  ;;  %v8077_v40 = vpop.eup %6085 }
 0x4b7   : > { %6087 = vpow2.f32 %v2064_v20  ;;  %2099 = vadd.xlane.f32.xlu1 %v2098_v45  ;;  %2554 = vadd.xlane.f32.xlu0 %v2553_v26  ;;  %v2148_v33 = vpack.c.bf16 %v8077_v40, %v8077_v40  ;;  %v2957_v14 = vsel %vm1477_vm5, %v8082_v43, -inf }
 0x4b8   : > { %v2639_v4 = vunpack.c.l.b16 %v2615_v1  ;;  %6089 = vpow2.f32 %v2524_v27  ;;  %v2468_v27 = vpop.xlane.xlu1 %2467  ;;  %v2066_v1 = vmul.f32 1.442695, %v2038_v19  ;;  %v8105_v19 = vadd.f32 %v2920_v42, %v7525_v34 }
 0x4b9   : > { %3230 = vmatpush.bf16.msra.mxu1 %v9152_v35  ;;  %6091 = vpow2.f32 %v2522_v41  ;;  %v2237_v45 = vunpack.c.l.b16 %v2148_v33  ;;  %v8101_v35 = vadd.f32 %v8055_v16, %v7413_v54 }
 0x4ba   : > { %v2646_v29 = vpack.c.b16 %v2639_v4, %v2638_v59  ;;  %v2019_v21 = vpop.xlane.xlu0 %2018  ;;  %v2507_v59 = vsub.f32 %v7866_v6, %v2471_v23  ;;  %v2966_v42 = vsel %vm1477_vm5, %v8105_v19, -inf }
 0x4bb   : > { %v2039_v7 = vsub.f32 %v7877_v24, %v2019_v21  ;;  %v2506_v21 = vsub.f32 %v7842_v32, %v2468_v27  ;;  %v2960_v16 = vsel %vm1477_vm5, %v8101_v35, -inf  ;;  %v8114_v32 = vpop.f32.mrf.mxu0 }
 0x4bc   : > { %5321 = vmatmul.msk.bf16.vlgmr.msrb.gmra.mxu0 %vm1477_vm5, %v2646_v29 }
 0x4bd   : > { %v6088_v47 = vpop.eup %6087  ;;  %v2068_v46 = vmul.f32 1.442695, %v2039_v7  ;;  %v8091_v56 = vpop.f32.mrf.mxu3  ;;  %v2526_v34 = vmul.f32 1.442695, %v2506_v21 }
 0x4be   : > { %v2149_v20 = vpack.c.bf16 %v6088_v47, %v6088_v47  ;;  %v2107_v24 = vsel %vm1477_vm5, %v6088_v47, 0.0  ;;  %v6090_v57 = vpop.eup %6089  ;;  %v2474_v7 = vpop.xlane.xlu2 %2473  ;;  %v2528_v47 = vmul.f32 1.442695, %v2507_v59 }
 0x4bf   : > { %2958 = vmax.xlane.f32.xlu1 %v2957_v14  ;;  %2102 = vadd.xlane.f32.xlu0 %v2101_v55  ;;  %v6092_v41 = vpop.eup %6091  ;;  %6093 = vpow2.f32 %v2068_v46  ;;  %v2617_v4 = vpack.c.bf16 %v6090_v57, %v6090_v57  ;;  %v2508_v23 = vsub.f32 %v7882_v52, %v2474_v7  ;;  %v2559_v21 = vsel %vm1477_vm5, %v6090_v57, 0.0 }
 0x4c0   : > { %2108 = vadd.xlane.f32.xlu2 %v2107_v24  ;;  %v2238_v26 = vunpack.c.l.b16 %v2149_v20  ;;  %6095 = vpow2.f32 %v2066_v1  ;;  %v2616_v33 = vpack.c.bf16 %v6092_v41, %v6092_v41  ;;  %v2556_v54 = vsel %vm1477_vm5, %v6092_v41, 0.0 }
 0x4c1   : > { %v2641_v6 = vunpack.c.l.b16 %v2617_v4  ;;  %6097 = vpow2.f32 %v2528_v47  ;;  %v2530_v1 = vmul.f32 1.442695, %v2508_v23 }
 0x4c2   : > { %v2022_v29 = vpop.xlane.xlu0 %2021  ;;  %v2244_v61 = vpack.c.b16 %v2238_v26, %v2237_v45  ;;  %v2640_v27 = vunpack.c.l.b16 %v2616_v33  ;;  %6099 = vpow2.f32 %v2526_v34 }
 0x4c3   : > { %v2040_v41 = vsub.f32 %v7896_v12, %v2022_v29  ;;  %6101 = vpow2.f32 %v2530_v1 }
 0x4c4   : > { %5310 = vmatmul.msk.bf16.gmra.mxu1 %vm1477_vm5, %v2244_v61  ;;  %v2025_v46 = vpop.xlane.xlu1 %2024  ;;  %v2647_v26 = vpack.c.b16 %v2641_v6, %v2640_v27  ;;  %v8135_v6 = vpop.f32.mrf.mxu0 }
 0x4c5   : > { %v8112_v20 = vpop.eup %6093  ;;  %v2925_v14 = vpop.f32.mrf.mxu3  ;;  %v2041_v55 = vsub.f32 %v7900_v3, %v2025_v46  ;;  %v2104_v3 = vsel %vm1477_vm5, %v8077_v40, 0.0  ;;  %v2070_v47 = vmul.f32 1.442695, %v2040_v41  ;;  %v8140_v40 = vadd.f32 %v8064_v30, %v7489_v31 }
 0x4c6   : > { %v8118_v52 = vpop.eup %6095  ;;  %v2151_v24 = vpack.c.bf16 %v8112_v20, %v8112_v20  ;;  %v8125_v59 = vadd.f32 %v2925_v14, %v7465_v25  ;;  %v8144_v46 = vadd.f32 %v8091_v56, %v7516_v51 }
 0x4c7   : > { %2557 = vadd.xlane.f32.xlu1 %v2556_v54  ;;  %2961 = vmax.xlane.f32.xlu0 %v2960_v16  ;;  %v2150_v4 = vpack.c.bf16 %v8118_v52, %v8118_v52  ;;  %v2072_v61 = vmul.f32 1.442695, %v2041_v55  ;;  %v6098_v33 = vpop.eup %6097  ;;  %v2963_v51 = vsel %vm1477_vm5, %v8140_v40, -inf }
 0x4c8   : > { %2967 = vmax.xlane.f32.xlu2 %v2966_v42  ;;  %v2240_v7 = vunpack.c.l.b16 %v2151_v24  ;;  %v2972_v25 = vsel %vm1477_vm5, %v8125_v59, -inf  ;;  %v6100_v29 = vpop.eup %6099  ;;  %v2619_v57 = vpack.c.bf16 %v6098_v33, %v6098_v33  ;;  %v2969_v56 = vsel %vm1477_vm5, %v8144_v46, -inf }
 0x4c9   : > { %v2239_v12 = vunpack.c.l.b16 %v2150_v4  ;;  %6103 = vpow2.f32 %v2072_v61  ;;  %v8147_v14 = vpop.eup %6101  ;;  %v2618_v55 = vpack.c.bf16 %v6100_v29, %v6100_v29 }
 0x4ca   : > { %v2477_v45 = vpop.xlane.xlu0 %2476  ;;  %6105 = vpow2.f32 %v2070_v47  ;;  %v2643_v24 = vunpack.c.l.b16 %v2619_v57  ;;  %v2562_v57 = vsel %vm1477_vm5, %v6100_v29, 0.0 }
 0x4cb   : > { %v2509_v23 = vsub.f32 %v7908_v18, %v2477_v45  ;;  %v2245_v34 = vpack.c.b16 %v2240_v7, %v2239_v12  ;;  %v2642_v45 = vunpack.c.l.b16 %v2618_v55 }
 0x4cc   : > { %5322 = vmatmul.msk.bf16.gmra.mxu0 %vm1477_vm5, %v2647_v26  ;;  %v2480_v54 = vpop.xlane.xlu1 %2479 }
 0x4cd   : > { %v2532_v18 = vmul.f32 1.442695, %v2509_v23  ;;  %v2510_v31 = vsub.f32 %v7912_v49, %v2480_v54  ;;  %v2565_v54 = vsel %vm1477_vm5, %v6098_v33, 0.0  ;;  %v8183_v33 = vpop.f32.mrf.mxu1 }
 0x4cf   : > { %2105 = vadd.xlane.f32.xlu1 %v2104_v3  ;;  %2560 = vadd.xlane.f32.xlu0 %v2559_v21  ;;  %v8155_v1 = vpop.eup %6103  ;;  %v2534_v49 = vmul.f32 1.442695, %v2510_v31  ;;  %v2648_v3 = vpack.c.b16 %v2643_v24, %v2642_v45  ;;  %v8166_v21 = vpop.f32.mrf.mxu0 }
 0x4d0   : > { %2973 = vmax.xlane.f32.xlu2 %v2972_v25  ;;  %v8159_v26 = vpop.eup %6105  ;;  %v2153_v4 = vpack.c.bf16 %v8155_v1, %v8155_v1 }
 0x4d1   : > { %v2152_v47 = vpack.c.bf16 %v8159_v26, %v8159_v26 }
 0x4d2   : > { %v2932_v16 = vpop.xlane.xlu0 %2931  ;;  %v2242_v23 = vunpack.c.l.b16 %v2153_v4 }
 0x4d3   : > { %v2978_v42 = vsub.f32 %v7923_v60, %v2932_v16  ;;  %v2568_v60 = vsel %vm1477_vm5, %v8147_v14, 0.0 }
 0x4d4   : > { %v2483_v27 = vpop.xlane.xlu2 %2482  ;;  %5311 = vmatmul.msk.bf16.gmra.mxu1 %vm1477_vm5, %v2245_v34  ;;  %v2935_v12 = vpop.xlane.xlu1 %2934 }
 0x4d5   : > { %v2994_v30 = vmul.f32 1.442695, %v2978_v42  ;;  %v2511_v41 = vsub.f32 %v7936_v11, %v2483_v27  ;;  %v2927_v42 = vpop.f32.mrf.mxu3  ;;  %v2241_v27 = vunpack.c.l.b16 %v2152_v47  ;;  %v2979_v55 = vsub.f32 %v7931_v58, %v2935_v12 }
 0x4d6   : > { %v8181_v31 = vadd.f32 %v2927_v42, %v7553_v37 }
 0x4d7   : > { %6107 = vpow2.f32 %v2994_v30  ;;  %2964 = vmax.xlane.f32.xlu1 %v2963_v51  ;;  %2970 = vmax.xlane.f32.xlu0 %v2969_v56  ;;  %v2536_v11 = vmul.f32 1.442695, %v2511_v41  ;;  %v2246_v29 = vpack.c.b16 %v2242_v23, %v2241_v27  ;;  %v2620_v56 = vpack.c.bf16 %v8147_v14, %v8147_v14  ;;  %v8189_v45 = vpop.f32.mrf.mxu0  ;;  %v8201_v27 = vpop.f32.mrf.mxu1 }
 0x4d8   : > { %2569 = vadd.xlane.f32.xlu2 %v2568_v60  ;;  %6109 = vpow2.f32 %v2532_v18  ;;  %v2996_v60 = vmul.f32 1.442695, %v2979_v55  ;;  %v2975_v4 = vsel %vm1477_vm5, %v8181_v31, -inf }
 0x4d9   : > { %6111 = vpow2.f32 %v2534_v49  ;;  %v2644_v12 = vunpack.c.l.b16 %v2620_v56 }
 0x4da   : > { %v8164_v61 = vpop.xlane.xlu0 %2075  ;;  %6113 = vpow2.f32 %v2536_v11 }
 0x4db   : > { %6115 = vpow2.f32 %v2996_v60 }
 0x4dc   : > { %v8168_v7 = vpop.xlane.xlu2 %2078  ;;  %5323 = vmatmul.msk.bf16.gmra.mxu0 %vm1477_vm5, %v2648_v3 }
 0x4dd   : > { %v8173_v25 = vpop.eup %6107 }
 0x4de   : > { %v3026_v16 = vsel %vm1477_vm5, %v8173_v25, 0.0  ;;  %v6110_v34 = vpop.eup %6109 }
 0x4df   : > { %2563 = vadd.xlane.f32.xlu1 %v2562_v57  ;;  %2566 = vadd.xlane.f32.xlu0 %v2565_v54  ;;  %v2621_v18 = vpack.c.bf16 %v6110_v34, %v6110_v34  ;;  %v6112_v24 = vpop.eup %6111 }
 0x4e0   : > { %3027 = vadd.xlane.f32.xlu2 %v3026_v16  ;;  %v2574_v3 = vsel %vm1477_vm5, %v6112_v24, 0.0  ;;  %v6114_v47 = vpop.eup %6113  ;;  %v2622_v16 = vpack.c.bf16 %v6112_v24, %v6112_v24 }
 0x4e1   : > { %v2645_v49 = vunpack.c.l.b16 %v2621_v18 }
 0x4e2   : > { %v2486_v30 = vpop.xlane.xlu0 %2485  ;;  %v2711_v56 = vunpack.c.l.b16 %v2622_v16 }
 0x4e3   : > { %v2512_v14 = vsub.f32 %v7950_v15, %v2486_v30  ;;  %v2649_v57 = vpack.c.b16 %v2645_v49, %v2644_v12  ;;  %v2577_v15 = vsel %vm1477_vm5, %v6114_v47, 0.0 }
 0x4e4   : > { %v2938_v51 = vpop.xlane.xlu2 %2937  ;;  %5312 = vmatmul.msk.bf16.gmra.mxu1 %vm1477_vm5, %v2246_v29  ;;  %v2489_v41 = vpop.xlane.xlu1 %2488 }
 0x4e5   : > { %v2980_v58 = vsub.f32 %v7954_v8, %v2938_v51  ;;  %v2513_v11 = vsub.f32 %v7958_v17, %v2489_v41  ;;  %v2623_v8 = vpack.c.bf16 %v6114_v47, %v6114_v47  ;;  %v2538_v42 = vmul.f32 1.442695, %v2512_v14  ;;  %v6116_v29 = vpop.eup %6115 }
 0x4e6   : > { %v2571_v17 = vsel %vm1477_vm5, %v6110_v34, 0.0  ;;  %v3091_v60 = vpack.c.bf16 %v6116_v29, %v6116_v29  ;;  %v3090_v34 = vpack.c.bf16 %v8173_v25, %v8173_v25  ;;  %v3029_v14 = vsel %vm1477_vm5, %v6116_v29, 0.0 }
 0x4e7   : > { %v2998_v37 = vmul.f32 1.442695, %v2980_v58  ;;  %2976 = vmax.xlane.f32.xlu1 %v2975_v4  ;;  %2575 = vadd.xlane.f32.xlu0 %v2574_v3  ;;  %v2540_v55 = vmul.f32 1.442695, %v2513_v11  ;;  %v2712_v51 = vunpack.c.l.b16 %v2623_v8  ;;  %v8217_v8 = vpop.f32.mrf.mxu1 }
 0x4e8   : > { %v2207_v18 = vpop.f32.mrf.mxu0  ;;  %v3115_v47 = vunpack.c.l.b16 %v3091_v60 }
 0x4e9   : > { %6117 = vpow2.f32 %v2998_v37  ;;  %v2719_v58 = vpack.c.b16 %v2712_v51, %v2711_v56 }
 0x4ea   : > { %v8196_v23 = vpop.xlane.xlu0 %2081  ;;  %6119 = vpow2.f32 %v2538_v42 }
 0x4eb   : > { %6121 = vpow2.f32 %v2540_v55 }
 0x4ec   : > { %v8198_v54 = vpop.xlane.xlu2 %2084  ;;  %5324 = vmatmul.msk.bf16.gmra.mxu0 %vm1477_vm5, %v2649_v57  ;;  %6123 = vrcp.f32 %v8168_v7  ;;  %v2492_v12 = vpop.xlane.xlu1 %2491 }
 0x4ed   : > { %v2514_v29 = vsub.f32 %v7974_v5, %v2492_v12 }
 0x4ef   : > { %v8205_v30 = vpop.eup %6117  ;;  %2578 = vadd.xlane.f32.xlu0 %v2577_v15  ;;  %2572 = vadd.xlane.f32.xlu1 %v2571_v17 }
 0x4f0   : > { %v3032_v24 = vsel %vm1477_vm5, %v8205_v30, 0.0  ;;  %v6120_v3 = vpop.eup %6119  ;;  %v2209_v57 = vpop.f32.mrf.mxu0 }
 0x4f1   : > { %3033 = vadd.xlane.f32.xlu2 %v3032_v24  ;;  %v8215_v11 = vpop.eup %6121  ;;  %v2580_v16 = vsel %vm1477_vm5, %v6120_v3, 0.0  ;;  %v2624_v56 = vpack.c.bf16 %v6120_v3, %v6120_v3 }
 0x4f2   : > { %v2941_v49 = vpop.xlane.xlu0 %2940  ;;  %v2625_v7 = vpack.c.bf16 %v8215_v11, %v8215_v11  ;;  %v6124_v17 = vpop.eup %6123 }
 0x4f3   : > { %v2981_v41 = vsub.f32 %v7982_v48, %v2941_v49  ;;  %v3114_v48 = vunpack.c.l.b16 %v3090_v34  ;;  %v2542_v34 = vmul.f32 1.442695, %v2514_v29  ;;  %v2713_v5 = vunpack.c.l.b16 %v2624_v56 }
 0x4f4   : > { %v2495_v37 = vpop.xlane.xlu2 %2494  ;;  %5325 = vmatmul.msk.bf16.vlgmr.msrb.gmra.mxu1 %vm1477_vm5, %v2719_v58  ;;  %v2714_v49 = vunpack.c.l.b16 %v2625_v7  ;;  %v2113_v7 = vsel %vm1477_vm5, %v8112_v20, 0.0 }
 0x4f5   : > { %v3000_v4 = vmul.f32 1.442695, %v2981_v41  ;;  %v2515_v25 = vsub.f32 %v7990_v39, %v2495_v37  ;;  %v3122_v42 = vpack.c.b16 %v3115_v47, %v3114_v48  ;;  %v2301_v39 = vmul.f32 %v6124_v17, %v2209_v57 }
 0x4f6   : > { %v2720_v57 = vpack.c.b16 %v2714_v49, %v2713_v5 }
 0x4f7   : > { %6125 = vpow2.f32 %v3000_v4  ;;  %3030 = vadd.xlane.f32.xlu1 %v3029_v14  ;;  %v2544_v24 = vmul.f32 1.442695, %v2515_v25  ;;  %v8230_v4 = vpop.f32.mrf.mxu1 }
 0x4f8   : > { %6127 = vrcp.f32 %v8164_v61  ;;  %v8232_v3 = vpop.f32.mrf.mxu0 }
 0x4f9   : > { %2581 = vadd.xlane.f32.xlu2 %v2580_v16 }
 0x4fa   : > { %v2944_v55 = vpop.xlane.xlu0 %2943 }
 0x4fb   : > { %v2982_v51 = vsub.f32 %v8001_v38, %v2944_v55  ;;  %v2947_v38 = vpop.xlane.xlu1 %2946 }
 0x4fc   : > { %v8226_v15 = vpop.xlane.xlu2 %2090  ;;  %5337 = vmatmul.msk.bf16.vlgmr.msra.gmra.mxu0 %vm1477_vm5, %v3122_v42  ;;  %v2983_v48 = vsub.f32 %v7986_v0, %v2947_v38 }
 0x4fd   : > { %v6126_v61 = vpop.eup %6125  ;;  %v3002_v60 = vmul.f32 1.442695, %v2982_v51 }
 0x4fe   : > { %v6128_v58 = vpop.eup %6127  ;;  %v3035_v41 = vsel %vm1477_vm5, %v6126_v61, 0.0  ;;  %v3093_v12 = vpack.c.bf16 %v6126_v61, %v6126_v61  ;;  %v3004_v51 = vmul.f32 1.442695, %v2983_v48 }
 0x4ff   : > { %v2300_v37 = vmul.f32 %v6128_v58, %v2207_v18  ;;  %6129 = vpow2.f32 %v3002_v60  ;;  %3036 = vadd.xlane.f32.xlu1 %v3035_v41  ;;  %v3092_v18 = vpack.c.bf16 %v8205_v30, %v8205_v30 }
 0x500   : > { %6131 = vpow2.f32 %v2544_v24  ;;  %v3117_v42 = vunpack.c.l.b16 %v3093_v12  ;;  %v2214_v24 = vpop.f32.mrf.mxu0 }
 0x501   : > { %v5869_v47 = vpack.i.bf16 %v2301_v39, %v2300_v37  ;;  %6133 = vpow2.f32 %v2542_v34  ;;  %v3116_v0 = vunpack.c.l.b16 %v3092_v18  ;;  %v8248_v39 = vpop.f32.mrf.mxu1 }
 0x502   : > { %v8234_v14 = vpop.xlane.xlu0 %2087  ;;  %6135 = vpow2.f32 %v3004_v51 }
 0x503   : > { %5870 = vrot.lane.b32.xlu0 %v5869_v47, %s6640_s4  ;;  %v3123_v61 = vpack.c.b16 %v3117_v42, %v3116_v0  ;;  %v2950_v47 = vpop.xlane.xlu1 %2949 }
 0x504   : > { %5326 = vmatmul.msk.bf16.gmra.mxu1 %vm1477_vm5, %v2720_v57  ;;  %v2498_v25 = vpop.xlane.xlu2 %2497  ;;  %v2984_v48 = vsub.f32 %v8004_v2, %v2950_v47 }
 0x505   : > { %v6130_v16 = vpop.eup %6129  ;;  %v2516_v20 = vsub.f32 %v8019_v10, %v2498_v25 }
 0x506   : > { %v3038_v55 = vsel %vm1477_vm5, %v6130_v16, 0.0  ;;  %v8244_v29 = vpop.eup %6131  ;;  %v3094_v10 = vpack.c.bf16 %v6130_v16, %v6130_v16 }
 0x507   : > { %2114 = vadd.xlane.f32.xlu1 %v2113_v7  ;;  %3039 = vadd.xlane.f32.xlu2 %v3038_v55  ;;  %v6134_v17 = vpop.eup %6133  ;;  %v2627_v30 = vpack.c.bf16 %v8244_v29, %v8244_v29  ;;  %v2546_v5 = vmul.f32 1.442695, %v2516_v20 }
 0x508   : > { %v2626_v58 = vpack.c.bf16 %v6134_v17, %v6134_v17  ;;  %v2586_v34 = vsel %vm1477_vm5, %v6134_v17, 0.0  ;;  %v6136_v12 = vpop.eup %6135  ;;  %v3118_v55 = vunpack.c.l.b16 %v3094_v10 }
 0x509   : > { %v2716_v41 = vunpack.c.l.b16 %v2627_v30  ;;  %v3095_v18 = vpack.c.bf16 %v6136_v12, %v6136_v12  ;;  %v8259_v25 = vpop.f32.mrf.mxu1  ;;  %v2217_v42 = vpop.f32.mrf.mxu0  ;;  %v3041_v51 = vsel %vm1477_vm5, %v6136_v12, 0.0 }
 0x50a   : > { %v2501_v56 = vpop.xlane.xlu0 %2500  ;;  %v2715_v38 = vunpack.c.l.b16 %v2626_v58 }
 0x50b   : > { %v2517_v60 = vsub.f32 %v8027_v9, %v2501_v56  ;;  %v3119_v0 = vunpack.c.l.b16 %v3095_v18  ;;  %v8268_v56 = vpop.xlane.xlu1 %2093 }
 0x50c   : > { %5338 = vmatmul.msk.bf16.gmra.mxu0 %vm1477_vm5, %v3123_v61  ;;  %v2953_v37 = vpop.xlane.xlu2 %2952  ;;  %v2721_v9 = vpack.c.b16 %v2716_v41, %v2715_v38 }
 0x50d   : > { %v2548_v49 = vmul.f32 1.442695, %v2517_v60  ;;  %v2985_v57 = vsub.f32 %v8032_v22, %v2953_v37  ;;  %v3124_v20 = vpack.c.b16 %v3119_v0, %v3118_v55 }
 0x50f   : > { %2587 = vadd.xlane.f32.xlu1 %v2586_v34  ;;  %6137 = vpow2.f32 %v2548_v49  ;;  %v3008_v7 = vmul.f32 1.442695, %v2985_v57 }
 0x510   : > { %6139 = vrcp.f32 %v8198_v54  ;;  %v3006_v54 = vmul.f32 1.442695, %v2984_v48 }
 0x511   : > { %6141 = vpow2.f32 %v2546_v5  ;;  %v8276_v49 = vpop.f32.mrf.mxu1  ;;  %v2219_v34 = vpop.f32.mrf.mxu0 }
 0x512   : > { %6143 = vrcp.f32 %v8196_v23  ;;  %v8264_v2 = vpop.xlane.xlu0 %2096 }
 0x513   : > { %6145 = vpow2.f32 %v3008_v7 }
 0x514   : > { %5327 = vmatmul.msk.bf16.gmra.mxu1 %vm1477_vm5, %v2721_v9  ;;  %6147 = vpow2.f32 %v3006_v54 }
 0x515   : > { %v8262_v22 = vpop.eup %6137  ;;  %6149 = vrcp.f32 %v8226_v15 }
 0x516   : > { %v6140_v16 = vpop.eup %6139  ;;  %v2629_v61 = vpack.c.bf16 %v8262_v22, %v8262_v22  ;;  %6151 = vrcp.f32 %v8234_v14 }
 0x517   : > { %3042 = vadd.xlane.f32.xlu1 %v3041_v51  ;;  %v8266_v17 = vpop.eup %6141  ;;  %v2303_v23 = vmul.f32 %v6140_v16, %v2214_v24 }
 0x518   : > { %v6144_v30 = vpop.eup %6143  ;;  %v2628_v58 = vpack.c.bf16 %v8266_v17, %v8266_v17  ;;  %v2718_v24 = vunpack.c.l.b16 %v2629_v61 }
 0x519   : > { %v2302_v60 = vmul.f32 %v6144_v30, %v8232_v3  ;;  %v8278_v37 = vpop.eup %6145  ;;  %v8292_v48 = vpop.f32.mrf.mxu1  ;;  %v2583_v30 = vsel %vm1477_vm5, %v8215_v11, 0.0 }
 0x51a   : > { %v2717_v5 = vunpack.c.l.b16 %v2628_v58  ;;  %v8281_v38 = vpop.eup %6147  ;;  %v3097_v3 = vpack.c.bf16 %v8278_v37, %v8278_v37  ;;  %v2956_v47 = vpop.xlane.xlu0 %2955 }
 0x51b   : > { %v5874_v41 = vpack.i.bf16 %v2303_v23, %v2302_v60  ;;  %v3096_v10 = vpack.c.bf16 %v8281_v38, %v8281_v38  ;;  %v6150_v7 = vpop.eup %6149  ;;  %v2986_v54 = vsub.f32 %v8049_v13, %v2956_v47 }
 0x51c   : > { %5339 = vmatmul.msk.bf16.gmra.mxu0 %vm1477_vm5, %v3124_v20  ;;  %v2722_v57 = vpack.c.b16 %v2718_v24, %v2717_v5  ;;  %v3121_v9 = vunpack.c.l.b16 %v3097_v3  ;;  %v6152_v55 = vpop.eup %6151  ;;  %v2305_v51 = vmul.f32 %v6150_v7, %v2219_v34  ;;  %v2110_v5 = vsel %vm1477_vm5, %v8118_v52, 0.0 }
 0x51d   : > { %v3120_v15 = vunpack.c.l.b16 %v3096_v10  ;;  %v2304_v14 = vmul.f32 %v6152_v55, %v2217_v42  ;;  %v3010_v20 = vmul.f32 1.442695, %v2986_v54 }
 0x51f   : > { %5875 = vrot.lane.b32.xlu2 %v5874_v41, %s6640_s4  ;;  %v3125_v23 = vpack.c.b16 %v3121_v9, %v3120_v15  ;;  %v5879_v61 = vpack.i.bf16 %v2305_v51, %v2304_v14 }
 0x521   : > { %v2222_v18 = vpop.f32.mrf.mxu0 }
 0x522   : > { %v8286_v12 = vpop.xlane.xlu1 %2551 }
 0x524   : > { %5328 = vmatmul.msk.bf16.gmra.mxu1 %vm1477_vm5, %v2722_v57 }
 0x529   : > { %v2280_v60 = vpop.f32.mrf.mxu1  ;;  %v2224_v41 = vpop.f32.mrf.mxu0 }
 0x52a   : > { %v2100_v16 = vpop.xlane.xlu1 %2099  ;;  %v8295_v0 = vpop.xlane.xlu0 %2554 }
 0x52b   : > { %6153 = vrcp.f32 %v2100_v16 }
 0x52c   : > { %5340 = vmatmul.msk.bf16.gmra.mxu0 %vm1477_vm5, %v3125_v23  ;;  %6155 = vpow2.f32 %v3010_v20 }
 0x52d   : > { %2584 = vadd.xlane.f32.xlu0 %v2583_v30 }
 0x530   : > { %5880 = vrot.lane.b32.xlu1 %v5879_v61, %s6640_s4 }
 0x531   : > { %v6154_v58 = vpop.eup %6153  ;;  %v2282_v10 = vpop.f32.mrf.mxu1 }
 0x532   : > { %v8301_v13 = vmul.f32 %v6154_v58, %v2280_v60  ;;  %v2959_v24 = vpop.xlane.xlu1 %2958  ;;  %v2103_v34 = vpop.xlane.xlu0 %2102 }
 0x533   : > { %v2987_v42 = vsub.f32 %v8082_v43, %v2959_v24  ;;  %6157 = vrcp.f32 %v2103_v34  ;;  %v8306_v3 = vpop.eup %6155  ;;  %v2109_v47 = vpop.xlane.xlu2 %2108 }
 0x534   : > { %v3098_v43 = vpack.c.bf16 %v8306_v3, %v8306_v3 }
 0x535   : > { %v3012_v11 = vmul.f32 1.442695, %v2987_v42  ;;  %2111 = vadd.xlane.f32.xlu0 %v2110_v5 }
 0x536   : > { %v3187_v16 = vunpack.c.l.b16 %v3098_v43 }
 0x537   : > { %6159 = vpow2.f32 %v3012_v11 }
 0x538   : > { %6161 = vrcp.f32 %v8264_v2 }
 0x539   : > { %v6158_v57 = vpop.eup %6157  ;;  %v8308_v9 = vpop.f32.mrf.mxu0  ;;  %6163 = vrcp.f32 %v8268_v56 }
 0x53a   : > { %v8310_v7 = vmul.f32 %v6158_v57, %v2282_v10  ;;  %v8312_v15 = vpop.xlane.xlu1 %2557  ;;  %v2962_v55 = vpop.xlane.xlu0 %2961  ;;  %6165 = vrcp.f32 %v2109_v47  ;;  %v2589_v57 = vsel %vm1477_vm5, %v8244_v29, 0.0 }
 0x53b   : > { %v2968_v20 = vpop.xlane.xlu2 %2967  ;;  %v2988_v24 = vsub.f32 %v8101_v35, %v2962_v55 }
 0x53c   : > { %v5914_v52 = vpack.i.bf16 %v8310_v7, %v8301_v13 }
 0x53d   : > { %v8319_v51 = vpop.eup %6159  ;;  %v3014_v11 = vmul.f32 1.442695, %v2988_v24 }
 0x53e   : > { %v3099_v54 = vpack.c.bf16 %v8319_v51, %v8319_v51  ;;  %v6162_v61 = vpop.eup %6161 }
 0x53f   : > { %v2307_v58 = vmul.f32 %v6162_v61, %v2224_v41  ;;  %v6164_v34 = vpop.eup %6163 }
 0x540   : > { %v3188_v23 = vunpack.c.l.b16 %v3099_v54  ;;  %v2306_v56 = vmul.f32 %v6164_v34, %v2222_v18  ;;  %v6166_v10 = vpop.eup %6165 }
 0x541   : > { %v2285_v14 = vpop.f32.mrf.mxu1  ;;  %v8324_v30 = vpop.f32.mrf.mxu0 }
 0x542   : > { %v3195_v2 = vpack.c.b16 %v3188_v23, %v3187_v16  ;;  %v2106_v60 = vpop.xlane.xlu1 %2105  ;;  %v8327_v42 = vpop.xlane.xlu0 %2560  ;;  %v5884_v5 = vpack.i.bf16 %v2307_v58, %v2306_v56 }
 0x543   : > { %6167 = vrcp.f32 %v2106_v60  ;;  %v2974_v16 = vpop.xlane.xlu2 %2973 }
 0x544   : > { %5341 = vmatmul.msk.bf16.vlgmr.msra.gmra.mxu1 %vm1477_vm5, %v3195_v2  ;;  %6169 = vpow2.f32 %v3014_v11  ;;  %v3044_v2 = vsel %vm1477_vm5, %v8281_v38, 0.0 }
 0x548   : > { %2590 = vadd.xlane.f32.xlu2 %v2589_v57 }
 0x549   : > { %v6168_v47 = vpop.eup %6167  ;;  %v2287_v43 = vpop.f32.mrf.mxu1  ;;  %5885 = vrot.lane.b32.xlu0 %v5884_v5, %s6640_s4 }
 0x54a   : > { %v8332_v54 = vpop.f32.mrf.mxu0  ;;  %v8335_v35 = vmul.f32 %v6168_v47, %v2285_v14  ;;  %v8337_v41 = vmul.f32 %v6166_v10, %v2287_v43  ;;  %v2965_v55 = vpop.xlane.xlu1 %2964 }
 0x54b   : > { %v2989_v18 = vsub.f32 %v8140_v40, %v2965_v55  ;;  %v2971_v61 = vpop.xlane.xlu0 %2970  ;;  %v6170_v60 = vpop.eup %6169  ;;  %v2990_v40 = vsub.f32 %v8105_v19, %v2968_v20  ;;  %v3047_v20 = vsel %vm1477_vm5, %v8278_v37, 0.0  ;;  %v3050_v37 = vsel %vm1477_vm5, %v8306_v3, 0.0 }
 0x54c   : > { %v2991_v14 = vsub.f32 %v8144_v46, %v2971_v61  ;;  %v3100_v56 = vpack.c.bf16 %v6170_v60, %v6170_v60  ;;  %v8354_v38 = vpop.xlane.xlu2 %2569  ;;  %v3056_v46 = vsel %vm1477_vm5, %v6170_v60, 0.0 }
 0x54d   : > { %v3016_v23 = vmul.f32 1.442695, %v2989_v18  ;;  %v3018_v10 = vmul.f32 1.442695, %v2990_v40 }
 0x54e   : > { %v3020_v11 = vmul.f32 1.442695, %v2991_v14  ;;  %v3189_v47 = vunpack.c.l.b16 %v3100_v56 }
 0x54f   : > { %6171 = vpow2.f32 %v3016_v23 }
 0x550   : > { %3045 = vadd.xlane.f32.xlu2 %v3044_v2 }
 0x551   : > { %v8345_v58 = vpop.f32.mrf.mxu1 }
 0x552   : > { %v8347_v24 = vpop.f32.mrf.mxu0  ;;  %v2564_v34 = vpop.xlane.xlu1 %2563 }
 0x553   : > { %6173 = vrcp.f32 %v2564_v34 }
 0x554   : > { %6175 = vpow2.f32 %v3020_v11  ;;  %v8366_v14 = vpop.xlane.xlu2 %3027 }
 0x555   : > { %v8350_v5 = vpop.eup %6171  ;;  %6177 = vpow2.f32 %v3018_v10 }
 0x556   : > { %v3101_v57 = vpack.c.bf16 %v8350_v5, %v8350_v5  ;;  %6179 = vrcp.f32 %v8295_v0 }
 0x557   : > { %6181 = vrcp.f32 %v8286_v12 }
 0x558   : > { %v3190_v43 = vunpack.c.l.b16 %v3101_v57  ;;  %3057 = vadd.xlane.f32.xlu2 %v3056_v46  ;;  %v2992_v46 = vsub.f32 %v8125_v59, %v2974_v16 }
 0x559   : > { %v6174_v55 = vpop.eup %6173  ;;  %v8357_v18 = vpop.f32.mrf.mxu1 }
 0x55a   : > { %v2693_v19 = vpop.f32.mrf.mxu0  ;;  %v2977_v61 = vpop.xlane.xlu1 %2976  ;;  %3048 = vadd.xlane.f32.xlu1 %v3047_v20  ;;  %v3196_v2 = vpack.c.b16 %v3190_v43, %v3189_v47 }
 0x55b   : > { %v8361_v23 = vmul.f32 %v6174_v55, %v2693_v19  ;;  %v8364_v60 = vpop.eup %6175  ;;  %v2993_v40 = vsub.f32 %v8181_v31, %v2977_v61  ;;  %v3022_v55 = vmul.f32 1.442695, %v2992_v46 }
 0x55c   : > { %5342 = vmatmul.msk.bf16.gmra.mxu1 %vm1477_vm5, %v3196_v2  ;;  %v6178_v34 = vpop.eup %6177  ;;  %v3103_v57 = vpack.c.bf16 %v8364_v60, %v8364_v60 }
 0x55d   : > { %v3102_v47 = vpack.c.bf16 %v6178_v34, %v6178_v34  ;;  %v3024_v31 = vmul.f32 1.442695, %v2993_v40  ;;  %v6180_v61 = vpop.eup %6179 }
 0x55e   : > { %v3192_v43 = vunpack.c.l.b16 %v3103_v57  ;;  %v2777_v0 = vmul.f32 %v6180_v61, %v8324_v30  ;;  %v6182_v16 = vpop.eup %6181 }
 0x55f   : > { %v3191_v19 = vunpack.c.l.b16 %v3102_v47  ;;  %6183 = vpow2.f32 %v3024_v31  ;;  %v2776_v12 = vmul.f32 %v6182_v16, %v8308_v9 }
 0x560   : > { %6185 = vpow2.f32 %v3022_v55 }
 0x561   : > { %v8369_v56 = vpop.f32.mrf.mxu1  ;;  %v3197_v59 = vpack.c.b16 %v3192_v43, %v3191_v19  ;;  %v5889_v40 = vpack.i.bf16 %v2777_v0, %v2776_v12  ;;  %v3053_v43 = vsel %vm1477_vm5, %v8319_v51, 0.0  ;;  %6187 = vrcp.f32 %v8327_v42  ;;  %v2567_v12 = vpop.xlane.xlu0 %2566 }
 0x562   : > { %v8371_v11 = vpop.f32.mrf.mxu0  ;;  %v2573_v10 = vpop.xlane.xlu1 %2572  ;;  %3051 = vadd.xlane.f32.xlu1 %v3050_v37  ;;  %v3062_v37 = vsel %vm1477_vm5, %v6178_v34, 0.0  ;;  %6189 = vrcp.f32 %v8312_v15 }
 0x564   : > { %v8380_v20 = vpop.xlane.xlu2 %3033 }
 0x565   : > { %v8388_v57 = vpop.eup %6183 }
 0x566   : > { %v8391_v46 = vpop.eup %6185  ;;  %v3105_v30 = vpack.c.bf16 %v8388_v57, %v8388_v57 }
 0x567   : > { %v3104_v9 = vpack.c.bf16 %v8391_v46, %v8391_v46  ;;  %v6188_v16 = vpop.eup %6187 }
 0x568   : > { %v3194_v19 = vunpack.c.l.b16 %v3105_v30  ;;  %v2779_v15 = vmul.f32 %v6188_v16, %v8347_v24  ;;  %v6190_v42 = vpop.eup %6189 }
 0x569   : > { %v8382_v3 = vpop.f32.mrf.mxu1  ;;  %v3193_v61 = vunpack.c.l.b16 %v3104_v9 }
 0x56a   : > { %v2698_v2 = vpop.f32.mrf.mxu0  ;;  %v3031_v29 = vpop.xlane.xlu1 %3030  ;;  %3063 = vadd.xlane.f32.xlu1 %v3062_v37 }
 0x56b   : > { %v3198_v51 = vpack.c.b16 %v3194_v19, %v3193_v61 }
 0x56c   : > { %5343 = vmatmul.msk.bf16.gmra.mxu1 %vm1477_vm5, %v3197_v59  ;;  %v2582_v34 = vpop.xlane.xlu2 %2581  ;;  %v3059_v59 = vsel %vm1477_vm5, %v8350_v5, 0.0 }
 0x56d   : > { %6191 = vrcp.f32 %v2582_v34 }
 0x56e   : > { %6193 = vrcp.f32 %v7967_v62 }
 0x56f   : > { %6195 = vrcp.f32 %v2573_v10 }
 0x570   : > { %5890 = vrot.lane.b32.xlu2 %v5889_v40, %s6638_s29  ;;  %6197 = vrcp.f32 %v8354_v38 }
 0x571   : > { %v8393_v47 = vpop.f32.mrf.mxu1  ;;  %6199 = vrcp.f32 %v3031_v29 }
 0x572   : > { %v2700_v31 = vpop.f32.mrf.mxu0  ;;  %v8401_v55 = vpop.xlane.xlu1 %3036  ;;  %6201 = vrcp.f32 %v8366_v14 }
 0x573   : > { %3054 = vadd.xlane.f32.xlu0 %v3053_v43  ;;  %v2778_v43 = vmul.f32 %v6190_v42, %v8332_v54  ;;  %v6192_v5 = vpop.eup %6191 }
 0x574   : > { %v6194_v19 = vpop.eup %6193 }
 0x575   : > { %v5894_v9 = vpack.i.bf16 %v2779_v15, %v2778_v43  ;;  %v1826_v24 = vmul.f32 %v6194_v19, %v8070_v28  ;;  %v6196_v54 = vpop.eup %6195  ;;  %v8428_v15 = vpop.xlane.xlu0 %2575 }
 0x576   : > { %v2783_v38 = vmul.f32 %v6196_v54, %v2700_v31  ;;  %v6198_v16 = vpop.eup %6197 }
 0x577   : > { %v2782_v43 = vmul.f32 %v6198_v16, %v2698_v2  ;;  %v6200_v31 = vpop.eup %6199  ;;  %v3065_v16 = vsel %vm1477_vm5, %v8364_v60, 0.0 }
 0x578   : > { %v6202_v19 = vpop.eup %6201 }
 0x579   : > { %v8405_v37 = vpop.f32.mrf.mxu1  ;;  %v5904_v28 = vpack.i.bf16 %v2783_v38, %v2782_v43  ;;  %v2592_v38 = vsel %vm1477_vm5, %v8266_v17, 0.0  ;;  %v2595_v43 = vsel %vm1477_vm5, %v8262_v22, 0.0 }
 0x57a   : > { %v8407_v0 = vpop.xlane.xlu2 %3039  ;;  %v3159_v40 = vpop.f32.mrf.mxu0 }
 0x57b   : > { %3060 = vadd.xlane.f32.xlu0 %v3059_v59  ;;  %v2115_v30 = vpop.xlane.xlu1 %2114  ;;  %v1598_v59 = vsel %vm1477_vm5, %v7793_v44, 0.0 }
 0x57c   : > { %5344 = vmatmul.msk.bf16.gmra.mxu1 %vm1477_vm5, %v3198_v51 }
 0x57d   : > { %v8436_v29 = vpop.xlane.xlu0 %2578 }
 0x581   : > { %v2761_v34 = vpop.f32.mrf.mxu1 }
 0x582   : > { %v8416_v61 = vmul.f32 %v6192_v5, %v2761_v34  ;;  %v8418_v62 = vpop.permute.xlu2 %5875  ;;  %v3161_v42 = vpop.f32.mrf.mxu0 }
 0x583   : > { %v5877_v10 = vunpack.i.l.bf16 %v8418_v62  ;;  %1599 = vadd.xlane.f32.xlu0 %v1598_v59  ;;  %5895 = vrot.lane.b32.xlu1 %v5894_v9, %s6638_s29  ;;  %v2588_v44 = vpop.xlane.xlu1 %2587  ;;  %v2119_v9 = vsel %vm1477_vm5, %v8155_v1, 0.0  ;;  %v3253_v34 = vmul.f32 %v6200_v31, %v3161_v42  ;;  %v3252_v59 = vmul.f32 %v6202_v19, %v3159_v40 }
 0x584   : > { %6203 = vrcp.f32 %v2588_v44 }
 0x585   : > { %v8426_v51 = vsel %vm1346_vm1, %v1826_v24, %v5877_v10  ;;  %v5909_v14 = vpack.i.bf16 %v3253_v34, %v3252_v59  ;;  %v8443_v1 = vpop.permute.xlu0 %5870  ;;  %6205 = vrcp.f32 %v8012_v36 }
 0x586   : > { %6207 = vrcp.f32 %v8401_v55 }
 0x587   : > { %6209 = vrcp.f32 %v2567_v12 }
 0x588   : > { %6211 = vrcp.f32 %v8380_v20 }
 0x589   : > { %v8431_v5 = vpop.f32.mrf.mxu1  ;;  %6213 = vrcp.f32 %v2115_v30 }
 0x58a   : > { %v3164_v2 = vpop.f32.mrf.mxu0  ;;  %v6204_v24 = vpop.eup %6203 }
 0x58b   : > { %2120 = vadd.xlane.f32.xlu0 %v2119_v9  ;;  %5905 = vrot.lane.b32.xlu1 %v5904_v28, %s6638_s29  ;;  %v3043_v40 = vpop.xlane.xlu1 %3042  ;;  %v6206_v17 = vpop.eup %6205 }
 0x58c   : > { %v1828_v9 = vmul.f32 %v6206_v17, %v8114_v32  ;;  %v6208_v36 = vpop.eup %6207 }
 0x58d   : > { %v6210_v19 = vpop.eup %6209 }
 0x58e   : > { %v6212_v55 = vpop.eup %6211 }
 0x58f   : > { %v3254_v32 = vmul.f32 %v6212_v55, %v3164_v2  ;;  %v6214_v12 = vpop.eup %6213  ;;  %v3068_v55 = vsel %vm1477_vm5, %v8391_v46, 0.0 }
 0x591   : > { %v2766_v10 = vpop.f32.mrf.mxu1 }
 0x592   : > { %v8438_v54 = vmul.f32 %v6204_v24, %v2766_v10  ;;  %v3166_v42 = vpop.f32.mrf.mxu0  ;;  %v2781_v24 = vmul.f32 %v6210_v19, %v8371_v11 }
 0x593   : > { %2593 = vadd.xlane.f32.xlu0 %v2592_v38  ;;  %5910 = vrot.lane.b32.xlu1 %v5909_v14, %s6639_s20  ;;  %v3255_v59 = vmul.f32 %v6208_v36, %v3166_v42 }
 0x594   : > { %v5899_v38 = vpack.i.bf16 %v2781_v24, %v8361_v23  ;;  %v9153_v23 = vld [vmem:[#allocation33_spill] sm:$0xff]  ;;  %v5672_v24 = vld [vmem:[#allocation8 + $0x38] sm:$0xff] }
 0x595   : > { %v5919_v14 = vpack.i.bf16 %v3255_v59, %v3254_v32  ;;  %3581 = vmatpush.bf16.msra.mxu2 %v5672_v24 }
 0x599   : > { %3066 = vadd.xlane.f32.xlu2 %v3065_v16  ;;  %v8466_v16 = vmul.f32 %v6214_v12, %v8357_v18  ;;  %v8489_v32 = vpop.f32.mrf.mxu1 }
 0x59a   : > { %v3169_v31 = vpop.f32.mrf.mxu0 }
 0x59b   : > { %2596 = vadd.xlane.f32.xlu0 %v2595_v43 }
 0x5a0   : > { %v8450_v44 = vpop.xlane.xlu0 %2584 }
 0x5a2   : > { %v8453_v28 = vpop.permute.xlu1 %5880  ;;  %v3171_v20 = vpop.f32.mrf.mxu0 }
 0x5a3   : > { %v5882_v60 = vunpack.i.l.bf16 %v8453_v28 }
 0x5a5   : > { %v8459_v22 = vsel %vm1346_vm1, %v1828_v9, %v5882_v60 }
 0x5a8   : > { %v2112_v34 = vpop.xlane.xlu0 %2111 }
 0x5a9   : > { %6215 = vrcp.f32 %v2112_v34 }
 0x5aa   : > { %6217 = vrcp.f32 %v3043_v40 }
 0x5ab   : > { %6219 = vrcp.f32 %v8407_v0 }
 0x5ac   : > { %6221 = vrcp.f32 %v8016_v50 }
 0x5ad   : > { %6223 = vrcp.f32 %v9153_v23 }
 0x5ae   : > { %6225 = vrcp.f32 %v8436_v29 }
 0x5af   : > { %v6216_v10 = vpop.eup %6215  ;;  %5920 = vrot.lane.b32.xlu0 %v5919_v14, %s6639_s20  ;;  %6227 = vrcp.f32 %v8428_v15 }
 0x5b0   : > { %v6218_v30 = vpop.eup %6217  ;;  %v8469_v42 = vmul.f32 %v6216_v10, %v8345_v58  ;;  %v9154_v58 = vld [vmem:[#allocation22_spill] sm:$0xff]  ;;  %v5669_v10 = vld [vmem:[#allocation8 + $0x20] sm:$0xff] }
 0x5b1   : > { %v3257_v40 = vmul.f32 %v6218_v30, %v3171_v20  ;;  %5900 = vrot.lane.b32.xlu2 %v5899_v38, %s6638_s29  ;;  %v6220_v11 = vpop.eup %6219  ;;  %v1601_v60 = vsel %vm1477_vm5, %v9154_v58, 0.0  ;;  %v8494_v20 = vpop.f32.mrf.mxu1  ;;  %v2116_v30 = vsel %vm1477_vm5, %v8159_v26, 0.0 }
 0x5b2   : > { %v5959_v0 = vpack.i.bf16 %v8466_v16, %v8469_v42  ;;  %v3256_v2 = vmul.f32 %v6220_v11, %v3169_v31  ;;  %v6222_v18 = vpop.eup %6221  ;;  %v5668_v11 = vld [vmem:[#allocation8 + $0x18] sm:$0xff] }
 0x5b3   : > { %v6224_v17 = vpop.eup %6223  ;;  %v1830_v36 = vmul.f32 %v6222_v18, %v8166_v21  ;;  %v5671_v21 = vld [vmem:[#allocation8 + $0x30] sm:$0xff]  ;;  %v5665_v18 = vld [vmem:[#allocation8] sm:$0xff] }
 0x5b4   : > { %v5924_v43 = vpack.i.bf16 %v3257_v40, %v3256_v2  ;;  %v1831_v34 = vmul.f32 %v6224_v17, %v8189_v45  ;;  %3582 = vmatpush.bf16.msra.mxu2 %v5671_v21  ;;  %v5670_v45 = vld [vmem:[#allocation8 + $0x28] sm:$0xff]  ;;  %v6226_v12 = vpop.eup %6225  ;;  %v5667_v2 = vld [vmem:[#allocation8 + $0x10] sm:$0xff]  ;;  %v3174_v17 = vpop.f32.mrf.mxu0  ;;  %v9155_v21 = vpack.i.bf16 %v8337_v41, %v8335_v35 }
 0x5b5   : > { %v2785_v14 = vmul.f32 %v6226_v12, %v8405_v37  ;;  %v6228_v46 = vpop.eup %6227  ;;  %v3071_v37 = vsel %vm1477_vm5, %v8388_v57, 0.0 }
 0x5b6   : > { %v2784_v40 = vmul.f32 %v6228_v46, %v8393_v47 }
 0x5b7   : > { %5925 = vrot.lane.b32.xlu0 %v5924_v43, %s6639_s20  ;;  %v5666_v43 = vld [vmem:[#allocation8 + $0x8] sm:$0xff] }
 0x5b8   : > { %3583 = vmatpush.bf16.msra.mxu2 %v5670_v45  ;;  %v5929_v29 = vpack.i.bf16 %v2785_v14, %v2784_v40 }
 0x5b9   : > { %v8504_v23 = vpop.f32.mrf.mxu1 }
 0x5bb   : > { %v5886_v9 = vpop.permute.xlu0 %5885  ;;  %v8500_v15 = vpop.xlane.xlu2 %2590 }
 0x5bc   : > { %v5888_v19 = vunpack.i.h.bf16 %v5886_v9  ;;  %v5887_v59 = vunpack.i.l.bf16 %v5886_v9  ;;  %3584 = vmatpush.bf16.msra.mxu2 %v5669_v10 }
 0x5bd   : > { %1602 = vadd.xlane.f32.xlu1 %v1601_v60 }
 0x5be   : > { %v8482_v50 = vsel %vm1346_vm1, %v1831_v34, %v5888_v19  ;;  %v8485_v31 = vsel %vm1346_vm1, %v1830_v36, %v5887_v59  ;;  %v3176_v19 = vpop.f32.mrf.mxu0 }
 0x5c0   : > { %3585 = vmatpush.bf16.msra.mxu2 %v5668_v11 }
 0x5c1   : > { %v3232_v9 = vpop.f32.mrf.mxu1 }
 0x5c3   : > { %v3046_v58 = vpop.xlane.xlu2 %3045 }
 0x5c4   : > { %3586 = vmatpush.bf16.msra.mxu2 %v5667_v2 }
 0x5c5   : > { %3069 = vadd.xlane.f32.xlu1 %v3068_v55 }
 0x5c8   : > { %3587 = vmatpush.bf16.msra.mxu2 %v5666_v43 }
 0x5c9   : > { %v3234_v55 = vpop.f32.mrf.mxu1 }
 0x5cb   : > { %v3058_v10 = vpop.xlane.xlu2 %3057 }
 0x5cc   : > { %3588 = vmatpush.bf16.msra.mxu2 %v5665_v18 }
 0x5cd   : > { %v3049_v38 = vpop.xlane.xlu1 %3048 }
 0x5ce   : > { %6229 = vrcp.f32 %v3049_v38  ;;  %v9157_v38 = vld [vmem:[#allocation30_spill] sm:$0xff] }
 0x5cf   : > { %6231 = vrcp.f32 %v3046_v58 }
 0x5d4   : > { %v6230_v57 = vpop.eup %6229 }
 0x5d5   : > { %v3052_v26 = vpop.xlane.xlu1 %3051  ;;  %v6232_v34 = vpop.eup %6231  ;;  %v3259_v24 = vmul.f32 %v6230_v57, %v3176_v19 }
 0x5d6   : > { %v3258_v14 = vmul.f32 %v6232_v34, %v3174_v17  ;;  %v5873_v17 = vunpack.i.h.bf16 %v8443_v1  ;;  %v9158_v34 = vld [vmem:[#allocation34_spill] sm:$0xff] }
 0x5d8   : > { %v5934_v13 = vpack.i.bf16 %v3259_v24, %v3258_v14 }
 0x5d9   : > { %v3237_v40 = vpop.f32.mrf.mxu1 }
 0x5da   : > { %2117 = vadd.xlane.f32.xlu2 %v2116_v30 }
 0x5dd   : > { %v8506_v60 = vpop.xlane.xlu1 %3063 }
 0x5de   : > { %5930 = vrot.lane.b32.xlu1 %v5929_v29, %s6638_s29 }
 0x5e1   : > { %3072 = vadd.xlane.f32.xlu0 %v3071_v37  ;;  %v3239_v24 = vpop.f32.mrf.mxu1 }
 0x5e6   : > { %v3055_v47 = vpop.xlane.xlu0 %3054 }
 0x5e7   : > { %6233 = vrcp.f32 %v3055_v47 }
 0x5e8   : > { %6235 = vrcp.f32 %v3052_v26  ;;  %v5891_v26 = vpop.permute.xlu2 %5890 }
 0x5e9   : > { %6237 = vrcp.f32 %v8450_v44  ;;  %v5893_v58 = vunpack.i.h.bf16 %v5891_v26  ;;  %v5892_v57 = vunpack.i.l.bf16 %v5891_v26 }
 0x5ed   : > { %v6234_v59 = vpop.eup %6233 }
 0x5ee   : > { %v3061_v36 = vpop.xlane.xlu0 %3060  ;;  %v6236_v12 = vpop.eup %6235  ;;  %v3261_v46 = vmul.f32 %v6234_v59, %v3234_v55 }
 0x5ef   : > { %v3260_v7 = vmul.f32 %v6236_v12, %v3232_v9  ;;  %v6238_v41 = vpop.eup %6237  ;;  %v5872_v9 = vunpack.i.l.bf16 %v8443_v1 }
 0x5f0   : > { %v2787_v37 = vmul.f32 %v6238_v41, %v8431_v5 }
 0x5f1   : > { %v5944_v35 = vpack.i.bf16 %v3261_v46, %v3260_v7  ;;  %v9159_v46 = vld [vmem:[#allocation24_spill] sm:$0xff] }
 0x5f2   : > { %5915 = vrot.lane.b32.xlu2 %v5914_v52, %s6640_s4  ;;  %v9156_v52 = vld [vmem:[#allocation28_spill] sm:$0xff]  ;;  %v5949_v5 = vpack.i.bf16 %v2787_v37, %v8416_v61 }
 0x5f3   : > { %6239 = vrcp.f32 %v9156_v52 }
 0x5f4   : > { %6241 = vrcp.f32 %v9157_v38 }
 0x5f5   : > { %5940 = vrot.lane.b32.xlu0 %v9155_v21, %s6640_s4  ;;  %v8516_v45 = vpop.permute.xlu1 %5895  ;;  %6243 = vrcp.f32 %v3061_v36 }
 0x5f6   : > { %v8522_v30 = vpop.xlane.xlu0 %1599  ;;  %6245 = vrcp.f32 %v3058_v10 }
 0x5f7   : > { %6247 = vrcp.f32 %v8500_v15 }
 0x5f9   : > { %v6240_v2 = vpop.eup %6239 }
 0x5fa   : > { %5935 = vrot.lane.b32.xlu2 %v5934_v13, %s6639_s20  ;;  %v6242_v18 = vpop.eup %6241  ;;  %v1824_v19 = vmul.f32 %v6240_v2, %v9158_v34 }
 0x5fb   : > { %v6244_v36 = vpop.eup %6243 }
 0x5fc   : > { %v3460_v1 = vsel %vm1346_vm1, %v1824_v19, %v5872_v9  ;;  %v3263_v10 = vmul.f32 %v6244_v36, %v3239_v24  ;;  %v6246_v13 = vpop.eup %6245  ;;  %v5897_v9 = vunpack.i.l.bf16 %v8516_v45  ;;  %v9162_v19 = vld [vmem:[#allocation23_spill] sm:$0xff] }
 0x5fd   : > { %v5906_v29 = vpop.permute.xlu1 %5905  ;;  %5945 = vrot.lane.b32.xlu0 %v5944_v35, %s6639_s20  ;;  %v3476_v61 = vsel %vm1477_vm5, %v3460_v1, %v5892_v57  ;;  %v3262_v38 = vmul.f32 %v6246_v13, %v3237_v40  ;;  %v5898_v40 = vunpack.i.h.bf16 %v8516_v45  ;;  %v5883_v1 = vunpack.i.h.bf16 %v8453_v28 }
 0x5fe   : > { %v5908_v44 = vunpack.i.h.bf16 %v5906_v29  ;;  %v5907_v11 = vunpack.i.l.bf16 %v5906_v29  ;;  %v8539_v59 = vpop.xlane.xlu0 %2120  ;;  %v3478_v45 = vsel %vm1477_vm5, %v8426_v51, %v5897_v9 }
 0x5ff   : > { %v5954_v41 = vpack.i.bf16 %v3263_v10, %v3262_v38 }
 0x600   : > { %v8528_v43 = vsel %vm1477_vm5, %v8485_v31, %v5907_v11  ;;  %v8532_v47 = vsel %vm1477_vm5, %v8482_v50, %v5908_v44  ;;  %v1825_v31 = vmul.f32 %v6242_v18, %v8059_v63  ;;  %v1607_v63 = vsel %vm1477_vm5, %v9159_v46, 0.0  ;;  %v6248_v44 = vpop.eup %6247  ;;  %v9160_v11 = vld [vmem:[#allocation31_spill] sm:$0xff] }
 0x601   : > { %6249 = vrcp.f32 %v9160_v11  ;;  %v2789_v26 = vmul.f32 %v6248_v44, %v8489_v32  ;;  %v5878_v18 = vunpack.i.h.bf16 %v8418_v62  ;;  %v1604_v62 = vsel %vm1477_vm5, %v9162_v19, 0.0  ;;  %v3242_v44 = vpop.f32.mrf.mxu1  ;;  %v9165_v11 = vld [vmem:[#allocation27_spill] sm:$0xff] }
 0x602   : > { %v3461_v55 = vsel %vm1346_vm1, %v1825_v31, %v5873_v17 }
 0x603   : > { %v3477_v14 = vsel %vm1477_vm5, %v3461_v55, %v5893_v58  ;;  %v5964_v58 = vpack.i.bf16 %v2789_v26, %v8438_v54  ;;  %v1616_v26 = vsel %vm1477_vm5, %v9165_v11, 0.0 }
 0x605   : > { %v5911_v50 = vpop.permute.xlu1 %5910  ;;  %5950 = vrot.lane.b32.xlu0 %v5949_v5, %s6638_s29  ;;  %v9161_v5 = vld [vmem:[#allocation32_spill] sm:$0xff] }
 0x606   : > { %v5913_v21 = vunpack.i.h.bf16 %v5911_v50  ;;  %v5912_v12 = vunpack.i.l.bf16 %v5911_v50  ;;  %v2594_v29 = vpop.xlane.xlu0 %2593  ;;  %6251 = vrcp.f32 %v9161_v5  ;;  %v9166_v5 = vld [vmem:[#allocation29_spill] sm:$0xff] }
 0x607   : > { %v6250_v17 = vpop.eup %6249 }
 0x608   : > { %v3493_v7 = vsel %vm3492_vm11, %v3476_v61, %v5912_v12  ;;  %v3494_v52 = vsel %vm3492_vm11, %v3477_v14, %v5913_v21  ;;  %1608 = vadd.xlane.f32.xlu1 %v1607_v63  ;;  %v1827_v57 = vmul.f32 %v6250_v17, %v8089_v53  ;;  %v9163_v63 = vld [vmem:[#allocation26_spill] sm:$0xff] }
 0x609   : > { %v3509_v35 = vpack.c.bf16 %v3494_v52, %v3493_v7  ;;  %v1613_v13 = vsel %vm1477_vm5, %v9163_v63, 0.0 }
 0x60a   : > { %v3463_v36 = vsel %vm1346_vm1, %v1827_v57, %v5878_v18  ;;  %v3244_v18 = vpop.f32.mrf.mxu1 }
 0x60b   : > { %3589 = vmatmul.bf16.vlgmr.msra.gmra.mxu2 %v3509_v35  ;;  %v3479_v31 = vsel %vm1477_vm5, %v3463_v36, %v5898_v40 }
 0x60c   : > { %v3067_v2 = vpop.xlane.xlu2 %3066  ;;  %v6252_v24 = vpop.eup %6251 }
 0x60d   : > { %5955 = vrot.lane.b32.xlu0 %v5954_v41, %s6639_s20  ;;  %v1829_v61 = vmul.f32 %v6252_v24, %v8135_v6  ;;  %v9164_v6 = vld [vmem:[#allocation25_spill] sm:$0xff]  ;;  %6253 = vrcp.f32 %v3067_v2 }
 0x60e   : > { %v2597_v37 = vpop.xlane.xlu0 %2596  ;;  %v1610_v41 = vsel %vm1477_vm5, %v9164_v6, 0.0  ;;  %6255 = vrcp.f32 %v8506_v60 }
 0x60f   : > { %v3465_v10 = vsel %vm1346_vm1, %v1829_v61, %v5883_v1  ;;  %6257 = vrcp.f32 %v2597_v37 }
 0x610   : > { %6259 = vrcp.f32 %v2594_v29 }
 0x611   : > { %6261 = vrcp.f32 %v8539_v59 }
 0x612   : > { %v3247_v37 = vpop.f32.mrf.mxu1 }
 0x614   : > { %v5901_v54 = vpop.permute.xlu2 %5900 }
 0x615   : > { %v5903_v21 = vunpack.i.h.bf16 %v5901_v54  ;;  %v5902_v12 = vunpack.i.l.bf16 %v5901_v54 }
 0x617   : > { %v3481_v7 = vsel %vm1477_vm5, %v3465_v10, %v5903_v21  ;;  %v3480_v52 = vsel %vm1477_vm5, %v8459_v22, %v5902_v12  ;;  %v6254_v22 = vpop.eup %6253 }
 0x618   : > { %v3265_v17 = vmul.f32 %v6254_v22, %v3244_v18  ;;  %v6256_v40 = vpop.eup %6255  ;;  %v6317_v18 = vld [vmem:[%s6849_s14] sm:$0xff] }
 0x619   : > { %v6258_v57 = vpop.eup %6257 }
 0x61a   : > { %v6260_v60 = vpop.eup %6259  ;;  %v2791_v16 = vmul.f32 %v6258_v57, %v8504_v23  ;;  %v3249_v54 = vpop.f32.mrf.mxu1 }
 0x621   : > { %5965 = vrot.lane.b32.xlu1 %v5964_v58, %s6638_s29  ;;  %v5921_v15 = vpop.permute.xlu0 %5920  ;;  %v3264_v58 = vmul.f32 %v6256_v40, %v3242_v44 }
 0x622   : > { %v5923_v34 = vunpack.i.h.bf16 %v5921_v15  ;;  %v5922_v32 = vunpack.i.l.bf16 %v5921_v15  ;;  %v1619_v15 = vsel %vm1477_vm5, %v9166_v5, 0.0  ;;  %v6318_v5 = vld [vmem:[%s6849_s14 + $0x8] sm:$0xff] }
 0x623   : > { %1605 = vadd.xlane.f32.xlu2 %v1604_v62  ;;  %v5969_v2 = vpack.i.bf16 %v3265_v17, %v3264_v58 }
 0x624   : > { %v3495_v53 = vsel %vm3492_vm11, %v3478_v45, %v5922_v32  ;;  %v3496_v50 = vsel %vm3492_vm11, %v3479_v31, %v5923_v34  ;;  %v6262_v34 = vpop.eup %6261 }
 0x625   : > { %v3510_v55 = vpack.c.bf16 %v3496_v50, %v3495_v53  ;;  %v2315_v62 = vmul.f32 %v6262_v34, %v8382_v3 }
 0x627   : > { %3594 = vmatmul.bf16.gmra.mxu2 %v3510_v55 }
 0x629   : > { %v5926_v14 = vpop.permute.xlu0 %5925 }
 0x62a   : > { %v5928_v46 = vunpack.i.h.bf16 %v5926_v14  ;;  %v5927_v51 = vunpack.i.l.bf16 %v5926_v14 }
 0x62b   : > { %1614 = vadd.xlane.f32.xlu2 %v1613_v13 }
 0x62c   : > { %v3497_v28 = vsel %vm3492_vm11, %v3480_v52, %v5927_v51  ;;  %v3498_v38 = vsel %vm3492_vm11, %v3481_v7, %v5928_v46 }
 0x62d   : > { %v3511_v35 = vpack.c.bf16 %v3498_v38, %v3497_v28 }
 0x630   : > { %v1603_v9 = vpop.xlane.xlu1 %1602 }
 0x637   : > { %1611 = vadd.xlane.f32.xlu0 %v1610_v41  ;;  %3599 = vmatmul.bf16.gmra.mxu2 %v3511_v35 }
 0x638   : > { %v3070_v29 = vpop.xlane.xlu1 %3069 }
 0x63f   : > { %1617 = vadd.xlane.f32.xlu0 %v1616_v26  ;;  %v8615_v26 = vld [vmem:[%s9083_s5] ss:$0 sm:$0xff] }
 0x643   : > { %5960 = vrot.lane.b32.xlu2 %v5959_v0, %s6640_s4  ;;  %v2790_v0 = vmul.f32 %v6260_v60, %v8494_v20 }
 0x645   : > { %v5979_v36 = vpack.i.bf16 %v2791_v16, %v2790_v0 }
 0x64b   : > { %1620 = vadd.xlane.f32.xlu1 %v1619_v15  ;;  %5970 = vrot.lane.b32.xlu2 %v5969_v2, %s6639_s20 }
 0x64d   : > { %v2118_v42 = vpop.xlane.xlu2 %2117 }
 0x64e   : > { %6263 = vrcp.f32 %v2118_v42 }
 0x64f   : > { %6265 = vrcp.f32 %v3070_v29 }
 0x653   : > { %5980 = vrot.lane.b32.xlu0 %v5979_v36, %s6638_s29  ;;  %s9168_s29 = sld [smem:[#allocation41_spill]] }
 0x654   : > { %v6264_v32 = vpop.eup %6263  ;;  %v3073_v19 = vpop.xlane.xlu0 %3072 }
 0x655   : > { %v2314_v31 = vmul.f32 %v6264_v32, %v8369_v56  ;;  %6267 = vrcp.f32 %v3073_v19  ;;  %v5916_v59 = vpop.permute.xlu2 %5915  ;;  %v6266_v45 = vpop.eup %6265 }
 0x656   : > { %v3266_v53 = vmul.f32 %v6266_v45, %v3247_v37  ;;  %6269 = vrcp.f32 %v8522_v30  ;;  %v5918_v46 = vunpack.i.h.bf16 %v5916_v59  ;;  %v5917_v51 = vunpack.i.l.bf16 %v5916_v59 }
 0x657   : > { %v5974_v23 = vpack.i.bf16 %v2315_v62, %v2314_v31  ;;  %6271 = vrcp.f32 %v1603_v9 }
 0x659   : > { %5975 = vrot.lane.b32.xlu2 %v5974_v23, %s6640_s4  ;;  %s6563_s25 = scalar_lea.hbm %s9168_s29, 256 }
 0x65b   : > { %v6268_v20 = vpop.eup %6267 }
 0x65c   : > { %v3267_v50 = vmul.f32 %v6268_v20, %v3249_v54  ;;  %v6270_v14 = vpop.eup %6269 }
 0x65d   : > { %v5936_v55 = vpop.permute.xlu2 %5935  ;;  %v6272_v10 = vpop.eup %6271  ;;  %v1832_v63 = vmul.f32 %v6270_v14, %v8183_v33 }
 0x65e   : > { %v5938_v1 = vunpack.i.h.bf16 %v5936_v55  ;;  %v5937_v24 = vunpack.i.l.bf16 %v5936_v55  ;;  %v5984_v21 = vpack.i.bf16 %v3267_v50, %v3266_v53  ;;  %v1833_v13 = vmul.f32 %v6272_v10, %v8201_v27 }
 0x660   : > { %v3499_v12 = vsel %vm3492_vm11, %v8528_v43, %v5937_v24  ;;  %v3500_v56 = vsel %vm3492_vm11, %v8532_v47, %v5938_v1  ;;  %v5931_v43 = vpop.permute.xlu1 %5930  ;;  %v3469_v7 = vsel %vm1346_vm1, %v1833_v13, %v5918_v46  ;;  %v3468_v47 = vsel %vm1346_vm1, %v1832_v63, %v5917_v51  ;;  %v6319_v24 = vld [vmem:[%s6849_s14 + $0x10] sm:$0xff] }
 0x661   : > { %5985 = vrot.lane.b32.xlu2 %v5984_v21, %s6639_s20  ;;  %v3512_v3 = vpack.c.bf16 %v3500_v56, %v3499_v12  ;;  %v5933_v52 = vunpack.i.h.bf16 %v5931_v43  ;;  %v5932_v28 = vunpack.i.l.bf16 %v5931_v43 }
 0x663   : > { %3604 = vmatmul.bf16.gmra.mxu2 %v3512_v3  ;;  %v3484_v6 = vsel %vm1477_vm5, %v3468_v47, %v5932_v28  ;;  %v3485_v41 = vsel %vm1477_vm5, %v3469_v7, %v5933_v52  ;;  %v6320_v52 = vld [vmem:[%s6849_s14 + $0x18] sm:$0xff] }
 0x667   : > { %v5941_v61 = vpop.permute.xlu0 %5940 }
 0x668   : > { %v5943_v42 = vunpack.i.h.bf16 %v5941_v61  ;;  %v5942_v34 = vunpack.i.l.bf16 %v5941_v61 }
 0x66f   : > { %v5946_v30 = vpop.permute.xlu0 %5945 }
 0x670   : > { %v5948_v38 = vunpack.i.h.bf16 %v5946_v30  ;;  %v5947_v35 = vunpack.i.l.bf16 %v5946_v30 }
 0x672   : > { %v3501_v44 = vsel %vm3492_vm11, %v3484_v6, %v5947_v35  ;;  %v3502_v33 = vsel %vm3492_vm11, %v3485_v41, %v5948_v38 }
 0x673   : > { %v3513_v27 = vpack.c.bf16 %v3502_v33, %v3501_v44 }
 0x675   : > { %3609 = vmatmul.bf16.gmra.mxu2 %v3513_v27 }
 0x677   : > { %v5951_v9 = vpop.permute.xlu0 %5950 }
 0x678   : > { %v5953_v37 = vunpack.i.h.bf16 %v5951_v9  ;;  %v5952_v62 = vunpack.i.l.bf16 %v5951_v9 }
 0x67b   : > { %v1609_v11 = vpop.xlane.xlu1 %1608 }
 0x67c   : > { %6273 = vrcp.f32 %v1609_v11 }
 0x67f   : > { %v5956_v36 = vpop.permute.xlu0 %5955 }
 0x680   : > { %v5957_v59 = vunpack.i.l.bf16 %v5956_v36 }
 0x682   : > { %v6274_v58 = vpop.eup %6273 }
 0x683   : > { %v1835_v60 = vmul.f32 %v6274_v58, %v8230_v4  ;;  %v5958_v4 = vunpack.i.h.bf16 %v5956_v36 }
 0x685   : > { %v3471_v0 = vsel %vm1346_vm1, %v1835_v60, %v5943_v42 }
 0x686   : > { %v3487_v31 = vsel %vm1477_vm5, %v3471_v0, %v5953_v37 }
 0x687   : > { %v3504_v54 = vsel %vm3492_vm11, %v3487_v31, %v5958_v4 }
 0x68e   : > { %v3590_v22 = vpop.f32.mrf.mxu2 }
 0x68f   : > { %v3630_v17 = vadd.f32 %v6317_v18, %v3590_v22  ;;  %v6321_v22 = vld [vmem:[%s6849_s14 + $0x20] sm:$0xff] }
 0x691   : > { %v8619_v40 = vadd.f32 %v8615_v26, %v3630_v17 }
 0x693   : > { %3668 = vadd.xlane.f32.xlu2 %v8619_v40  ;;  %v5966_v14 = vpop.permute.xlu1 %5965 }
 0x694   : > { %v5968_v7 = vunpack.i.h.bf16 %v5966_v14  ;;  %v5967_v47 = vunpack.i.l.bf16 %v5966_v14  ;;  %v6324_v14 = vld [vmem:[%s6849_s14 + $0x38] sm:$0xff] }
 0x696   : > { %v1606_v2 = vpop.xlane.xlu2 %1605  ;;  %v3592_v57 = vpop.f32.mrf.mxu2 }
 0x697   : > { %6275 = vrcp.f32 %v1606_v2  ;;  %v3631_v15 = vadd.f32 %v6318_v5, %v3592_v57  ;;  %v6322_v5 = vld [vmem:[%s6849_s14 + $0x28] sm:$0xff] }
 0x699   : > { %v8625_v16 = vadd.f32 %v8615_v26, %v3631_v15 }
 0x69b   : > { %3670 = vadd.xlane.f32.xlu0 %v8625_v16 }
 0x69d   : > { %v6276_v29 = vpop.eup %6275 }
 0x69e   : > { %v1834_v32 = vmul.f32 %v6276_v29, %v8217_v8  ;;  %v1615_v19 = vpop.xlane.xlu2 %1614 }
 0x69f   : > { %6277 = vrcp.f32 %v1615_v19 }
 0x6a0   : > { %v3470_v23 = vsel %vm1346_vm1, %v1834_v32, %v5942_v34 }
 0x6a1   : > { %v3486_v45 = vsel %vm1477_vm5, %v3470_v23, %v5952_v62 }
 0x6a2   : > { %v3503_v20 = vsel %vm3492_vm11, %v3486_v45, %v5957_v59 }
 0x6a3   : > { %v3514_v53 = vpack.c.bf16 %v3504_v54, %v3503_v20 }
 0x6a5   : > { %3614 = vmatmul.bf16.gmra.mxu2 %v3514_v53  ;;  %v6278_v1 = vpop.eup %6277  ;;  %v6323_v53 = vld [vmem:[%s6849_s14 + $0x30] sm:$0xff] }
 0x6a6   : > { %v5961_v50 = vpop.permute.xlu2 %5960  ;;  %v1837_v56 = vmul.f32 %v6278_v1, %v8259_v25  ;;  %v9167_v1 = vld [vmem:[#allocation20_spill] sm:$0xff] }
 0x6a7   : > { %v5963_v3 = vunpack.i.h.bf16 %v5961_v50  ;;  %v5962_v51 = vunpack.i.l.bf16 %v5961_v50 }
 0x6a9   : > { %v3473_v46 = vsel %vm1346_vm1, %v1837_v56, %v5963_v3 }
 0x6aa   : > { %v1612_v8 = vpop.xlane.xlu0 %1611  ;;  %v3595_v55 = vpop.f32.mrf.mxu2  ;;  %v3489_v6 = vsel %vm1477_vm5, %v3473_v46, %v5968_v7  ;;  %v6325_v7 = vld [vmem:[%s6849_s14 + $0x40] sm:$0xff] }
 0x6ab   : > { %6279 = vrcp.f32 %v1612_v8  ;;  %v3632_v21 = vadd.f32 %v6319_v24, %v3595_v55 }
 0x6ad   : > { %v8637_v12 = vadd.f32 %v8615_v26, %v3632_v21 }
 0x6ae   : > { %v5971_v61 = vpop.permute.xlu2 %5970 }
 0x6af   : > { %3672 = vadd.xlane.f32.xlu1 %v8637_v12  ;;  %v5973_v13 = vunpack.i.h.bf16 %v5971_v61  ;;  %v5972_v30 = vunpack.i.l.bf16 %v5971_v61 }
 0x6b1   : > { %v6280_v10 = vpop.eup %6279 }
 0x6b2   : > { %v1836_v63 = vmul.f32 %v6280_v10, %v8248_v39  ;;  %v3597_v43 = vpop.f32.mrf.mxu2  ;;  %v3506_v39 = vsel %vm3492_vm11, %v3489_v6, %v5973_v13  ;;  %v1618_v44 = vpop.xlane.xlu0 %1617 }
 0x6b3   : > { %v3633_v28 = vadd.f32 %v6320_v52, %v3597_v43  ;;  %6281 = vrcp.f32 %v1618_v44 }
 0x6b4   : > { %v3472_v25 = vsel %vm1346_vm1, %v1836_v63, %v5962_v51 }
 0x6b5   : > { %v8646_v38 = vadd.f32 %v8615_v26, %v3633_v28  ;;  %v3488_v35 = vsel %vm1477_vm5, %v3472_v25, %v5967_v47 }
 0x6b6   : > { %v3505_v41 = vsel %vm3492_vm11, %v3488_v35, %v5972_v30  ;;  %v5976_v27 = vpop.permute.xlu2 %5975 }
 0x6b7   : > { %3674 = vadd.xlane.f32.xlu1 %v8646_v38  ;;  %v3515_v33 = vpack.c.bf16 %v3506_v39, %v3505_v41  ;;  %v5977_v0 = vunpack.i.l.bf16 %v5976_v27  ;;  %v5978_v36 = vunpack.i.h.bf16 %v5976_v27  ;;  %v6326_v39 = vld [vmem:[%s6849_s14 + $0x48] sm:$0xff] }
 0x6b9   : > { %3619 = vmatmul.bf16.gmra.mxu2 %v3515_v33  ;;  %v6282_v58 = vpop.eup %6281 }
 0x6ba   : > { %v3600_v11 = vpop.f32.mrf.mxu2  ;;  %v1838_v57 = vmul.f32 %v6282_v58, %v8276_v49  ;;  %v6327_v58 = vld [vmem:[%s6849_s14 + $0x50] sm:$0xff] }
 0x6bb   : > { %v3634_v18 = vadd.f32 %v6321_v22, %v3600_v11 }
 0x6bc   : > { %v3474_v62 = vsel %vm1346_vm1, %v1838_v57, %v5977_v0 }
 0x6bd   : > { %v8655_v17 = vadd.f32 %v8615_v26, %v3634_v18 }
 0x6be   : > { %v1621_v9 = vpop.xlane.xlu1 %1620  ;;  %v5986_v60 = vpop.permute.xlu2 %5985 }
 0x6bf   : > { %6283 = vrcp.f32 %v1621_v9  ;;  %3676 = vadd.xlane.f32.xlu1 %v8655_v17  ;;  %v5987_v31 = vunpack.i.l.bf16 %v5986_v60  ;;  %v5988_v49 = vunpack.i.h.bf16 %v5986_v60 }
 0x6c2   : > { %v3602_v2 = vpop.f32.mrf.mxu2 }
 0x6c3   : > { %v3635_v15 = vadd.f32 %v6322_v5, %v3602_v2 }
 0x6c5   : > { %v6284_v42 = vpop.eup %6283  ;;  %v8661_v29 = vadd.f32 %v8615_v26, %v3635_v15  ;;  %v5981_v37 = vpop.permute.xlu0 %5980 }
 0x6c6   : > { %v1839_v34 = vmul.f32 %v6284_v42, %v8292_v48  ;;  %v5983_v32 = vunpack.i.h.bf16 %v5981_v37  ;;  %v5982_v19 = vunpack.i.l.bf16 %v5981_v37  ;;  %v6328_v37 = vld [vmem:[%s6849_s14 + $0x58] sm:$0xff] }
 0x6c7   : > { %3678 = vadd.xlane.f32.xlu2 %v8661_v29 }
 0x6c8   : > { %v3475_v4 = vsel %vm1346_vm1, %v1839_v34, %v5978_v36  ;;  %v3490_v59 = vsel %vm1477_vm5, %v3474_v62, %v5982_v19 }
 0x6c9   : > { %v3491_v23 = vsel %vm1477_vm5, %v3475_v4, %v5983_v32  ;;  %v3507_v45 = vsel %vm3492_vm11, %v3490_v59, %v5987_v31 }
 0x6ca   : > { %v3508_v20 = vsel %vm3492_vm11, %v3491_v23, %v5988_v49  ;;  %v6329_v49 = vld [vmem:[%s6849_s14 + $0x60] sm:$0xff] }
 0x6cb   : > { %v3516_v48 = vpack.c.bf16 %v3508_v20, %v3507_v45 }
 0x6cd   : > { %3624 = vmatmul.bf16.gmra.mxu2 %v3516_v48 }
 0x6e6   : > { %v3605_v54 = vpop.f32.mrf.mxu2 }
 0x6e7   : > { %v3636_v50 = vadd.f32 %v6323_v53, %v3605_v54  ;;  %v6330_v53 = vld [vmem:[%s6849_s14 + $0x68] sm:$0xff] }
 0x6e9   : > { %v8673_v8 = vadd.f32 %v8615_v26, %v3636_v50 }
 0x6eb   : > { %3680 = vadd.xlane.f32.xlu0 %v8673_v8 }
 0x6ee   : > { %v3607_v3 = vpop.f32.mrf.mxu2 }
 0x6ef   : > { %v3637_v10 = vadd.f32 %v6324_v14, %v3607_v3  ;;  %v5499_v14 = vld [vmem:[#allocation11 + $0xe8] sm:$0xf] }
 0x6f1   : > { %v8688_v63 = vadd.f32 %v8615_v26, %v3637_v10  ;;  %v5704_v10 = vld [vmem:[#allocation11 + $0xf4] sm:$0xf0] }
 0x6f8   : > { %v3610_v43 = vpop.f32.mrf.mxu2 }
 0x6f9   : > { %v3638_v47 = vadd.f32 %v6325_v7, %v3610_v43  ;;  %v5702_v43 = vld [vmem:[#allocation11 + $0xec] sm:$0xf]  ;;  %v5501_v7 = vld [vmem:[#allocation11 + $0xf8] sm:$0xf0] }
 0x6fb   : > { %v8695_v52 = vadd.f32 %v8615_v26, %v3638_v47  ;;  %v5504_v47 = vor.u32 %v5702_v43, %v5501_v7  ;;  %v5453_v43 = vld [vmem:[#allocation11 + $0x98] sm:$0xf0] }
 0x6fd   : > { %4383 = vmatpush.bf16.msrb.mxu2 %v5504_v47  ;;  %v5427_v47 = vld [vmem:[#allocation11 + $0x60] sm:$0xf] }
 0x700   : > { %v3612_v35 = vpop.f32.mrf.mxu2 }
 0x701   : > { %v3639_v44 = vadd.f32 %v6326_v39, %v3612_v35  ;;  %v5699_v35 = vld [vmem:[#allocation11 + $0xcc] sm:$0xf0] }
 0x703   : > { %v8710_v22 = vadd.f32 %v8615_v26, %v3639_v44  ;;  %v5477_v44 = vld [vmem:[#allocation11 + $0xd0] sm:$0xf0] }
 0x706   : > { %v3669_v55 = vpop.xlane.xlu2 %3668 }
 0x707   : > { %v3700_v24 = vmul.f32 %v3669_v55, %v9167_v1  ;;  %v5491_v55 = vld [vmem:[#allocation11 + $0xe0] sm:$0xf] }
 0x709   : > { %v8678_v21 = vsub.f32 %v8619_v40, %v3700_v24  ;;  %v5703_v24 = vld [vmem:[#allocation11 + $0xec] sm:$0xf0] }
 0x70a   : > { %v5492_v3 = vor.u32 %v5703_v24, %v5491_v55  ;;  %v5691_v55 = vld [vmem:[#allocation11 + $0x8c] sm:$0xf0]  ;;  %v5689_v24 = vld [vmem:[#allocation11 + $0x84] sm:$0xf] }
 0x70b   : > { %v3732_v56 = vmul.f32 %v8678_v21, %v8678_v21 }
 0x70c   : > { %4236 = vmatpush.bf16.msra.mxu3 %v5492_v3  ;;  %v5445_v3 = vld [vmem:[#allocation11 + $0x90] sm:$0xf0] }
 0x70d   : > { %3748 = vadd.xlane.f32.xlu1 %v3732_v56  ;;  %v5701_v56 = vld [vmem:[#allocation11 + $0xe4] sm:$0xf] }
 0x70e   : > { %v3671_v61 = vpop.xlane.xlu0 %3670 }
 0x70f   : > { %v3701_v46 = vmul.f32 %v3671_v61, %v9167_v1  ;;  %v5493_v61 = vld [vmem:[#allocation11 + $0xf0] sm:$0xf0] }
 0x711   : > { %v8685_v51 = vsub.f32 %v8625_v16, %v3701_v46  ;;  %v5496_v46 = vor.u32 %v5701_v56, %v5493_v61  ;;  %v5451_v61 = vld [vmem:[#allocation11 + $0x88] sm:$0xf] }
 0x713   : > { %v3733_v13 = vmul.f32 %v8685_v51, %v8685_v51  ;;  %4285 = vmatpush.bf16.msrb.mxu0 %v5496_v46 }
 0x715   : > { %3750 = vadd.xlane.f32.xlu2 %v3733_v13  ;;  %3682 = vadd.xlane.f32.xlu1 %v8688_v63  ;;  %v5500_v13 = vor.u32 %v5704_v10, %v5499_v14  ;;  %v5692_v14 = vld [vmem:[#allocation11 + $0x94] sm:$0xf0]  ;;  %v5448_v10 = vor.u32 %v5689_v24, %v5445_v3  ;;  %v5403_v24 = vld [vmem:[#allocation11 + $0x28] sm:$0xf] }
 0x716   : > { %v5452_v46 = vor.u32 %v5692_v14, %v5451_v61 }
 0x717   : > { %4334 = vmatpush.bf16.msrb.mxu1 %v5500_v13  ;;  %v5690_v13 = vld [vmem:[#allocation11 + $0x8c] sm:$0xf] }
 0x718   : > { %v5456_v7 = vor.u32 %v5690_v13, %v5453_v43 }
 0x71d   : > { %3684 = vadd.xlane.f32.xlu1 %v8695_v52 }
 0x722   : > { %v3673_v28 = vpop.xlane.xlu1 %3672 }
 0x723   : > { %v3702_v30 = vmul.f32 %v3673_v28, %v9167_v1 }
 0x725   : > { %v8700_v25 = vsub.f32 %v8637_v12, %v3702_v30  ;;  %v5475_v30 = vld [vmem:[#allocation11 + $0xc0] sm:$0xf] }
 0x726   : > { %v5476_v39 = vor.u32 %v5699_v35, %v5475_v30  ;;  %v5687_v30 = vld [vmem:[#allocation11 + $0x6c] sm:$0xf0]  ;;  %v5685_v35 = vld [vmem:[#allocation11 + $0x64] sm:$0xf] }
 0x727   : > { %v3734_v6 = vmul.f32 %v8700_v25, %v8700_v25 }
 0x728   : > { %v3615_v11 = vpop.f32.mrf.mxu2  ;;  %4237 = vmatpush.bf16.msra.mxu3 %v5476_v39  ;;  %v5435_v39 = vld [vmem:[#allocation11 + $0x68] sm:$0xf] }
 0x729   : > { %3752 = vadd.xlane.f32.xlu2 %v3734_v6  ;;  %v3640_v2 = vadd.f32 %v6327_v58, %v3615_v11  ;;  %v5697_v6 = vld [vmem:[#allocation11 + $0xc4] sm:$0xf]  ;;  %v5700_v11 = vld [vmem:[#allocation11 + $0xd4] sm:$0xf0]  ;;  %v5698_v58 = vld [vmem:[#allocation11 + $0xcc] sm:$0xf] }
 0x72a   : > { %v3675_v41 = vpop.xlane.xlu1 %3674 }
 0x72b   : > { %v3703_v33 = vmul.f32 %v3675_v41, %v9167_v1  ;;  %v8721_v15 = vadd.f32 %v8615_v26, %v3640_v2  ;;  %v5485_v2 = vld [vmem:[#allocation11 + $0xd8] sm:$0xf0] }
 0x72d   : > { %v8707_v27 = vsub.f32 %v8646_v38, %v3703_v33  ;;  %v5483_v33 = vld [vmem:[#allocation11 + $0xc8] sm:$0xf] }
 0x72f   : > { %v3735_v18 = vmul.f32 %v8707_v27, %v8707_v27 }
 0x730   : > { %v3617_v42 = vpop.f32.mrf.mxu2 }
 0x731   : > { %3754 = vadd.xlane.f32.xlu0 %v3735_v18  ;;  %3686 = vadd.xlane.f32.xlu2 %v8710_v22  ;;  %v3641_v36 = vadd.f32 %v6328_v37, %v3617_v42  ;;  %v5480_v18 = vor.u32 %v5697_v6, %v5477_v44  ;;  %v5695_v37 = vld [vmem:[#allocation11 + $0xac] sm:$0xf0]  ;;  %v5428_v6 = vor.u32 %v5687_v30, %v5427_v47  ;;  %v5688_v44 = vld [vmem:[#allocation11 + $0x74] sm:$0xf0] }
 0x732   : > { %v3677_v9 = vpop.xlane.xlu1 %3676  ;;  %v5675_v47 = vld [vmem:[#allocation11 + $0xc] sm:$0xf0] }
 0x733   : > { %v3704_v57 = vmul.f32 %v3677_v9, %v9167_v1  ;;  %v8732_v19 = vadd.f32 %v8615_v26, %v3641_v36  ;;  %v5484_v9 = vor.u32 %v5700_v11, %v5483_v33  ;;  %4286 = vmatpush.bf16.msrb.mxu0 %v5480_v18  ;;  %v5693_v36 = vld [vmem:[#allocation11 + $0xa4] sm:$0xf]  ;;  %v5436_v11 = vor.u32 %v5688_v44, %v5435_v39  ;;  %v5686_v18 = vld [vmem:[#allocation11 + $0x6c] sm:$0xf]  ;;  %v5676_v44 = vld [vmem:[#allocation11 + $0x14] sm:$0xf0] }
 0x735   : > { %v8718_v5 = vsub.f32 %v8655_v17, %v3704_v57  ;;  %v5488_v57 = vor.u32 %v5698_v58, %v5485_v2  ;;  %4335 = vmatpush.bf16.msrb.mxu1 %v5484_v9  ;;  %v5437_v9 = vld [vmem:[#allocation11 + $0x78] sm:$0xf0]  ;;  %v5411_v2 = vld [vmem:[#allocation11 + $0x40] sm:$0xf] }
 0x736   : > { %v5440_v58 = vor.u32 %v5686_v18, %v5437_v9 }
 0x737   : > { %v3736_v60 = vmul.f32 %v8718_v5, %v8718_v5  ;;  %4384 = vmatpush.bf16.msrb.mxu2 %v5488_v57  ;;  %v5683_v57 = vld [vmem:[#allocation11 + $0x4c] sm:$0xf0] }
 0x739   : > { %3756 = vadd.xlane.f32.xlu0 %v3736_v60  ;;  %3688 = vadd.xlane.f32.xlu2 %v8721_v15  ;;  %v6331_v60 = vld [vmem:[%s6849_s14 + $0x70] sm:$0xff] }
 0x73a   : > { %v3679_v0 = vpop.xlane.xlu2 %3678 }
 0x73b   : > { %v3705_v34 = vmul.f32 %v3679_v0, %v9167_v1  ;;  %v5459_v0 = vld [vmem:[#allocation11 + $0xa0] sm:$0xf] }
 0x73c   : > { %v3620_v31 = vpop.f32.mrf.mxu2 }
 0x73d   : > { %v8729_v32 = vsub.f32 %v8661_v29, %v3705_v34  ;;  %v3642_v4 = vadd.f32 %v6329_v49, %v3620_v31  ;;  %v5460_v34 = vor.u32 %v5695_v37, %v5459_v0  ;;  %v5467_v31 = vld [vmem:[#allocation11 + $0xa8] sm:$0xf]  ;;  %v5696_v49 = vld [vmem:[#allocation11 + $0xb4] sm:$0xf0]  ;;  %v5413_v0 = vld [vmem:[#allocation11 + $0x50] sm:$0xf0] }
 0x73e   : > { %v5419_v37 = vld [vmem:[#allocation11 + $0x48] sm:$0xf] }
 0x73f   : > { %v3737_v62 = vmul.f32 %v8729_v32, %v8729_v32  ;;  %v8739_v59 = vadd.f32 %v8615_v26, %v3642_v4  ;;  %4238 = vmatpush.bf16.msra.mxu3 %v5460_v34 }
 0x741   : > { %3758 = vadd.xlane.f32.xlu1 %v3737_v62  ;;  %3690 = vadd.xlane.f32.xlu0 %v8732_v19  ;;  %v5461_v62 = vld [vmem:[#allocation11 + $0xb0] sm:$0xf0] }
 0x742   : > { %v5464_v4 = vor.u32 %v5693_v36, %v5461_v62  ;;  %v5684_v36 = vld [vmem:[#allocation11 + $0x54] sm:$0xf0] }
 0x743   : > { %v5420_v62 = vor.u32 %v5684_v36, %v5419_v37 }
 0x744   : > { %v3622_v54 = vpop.f32.mrf.mxu2  ;;  %4287 = vmatpush.bf16.msrb.mxu0 %v5464_v4 }
 0x745   : > { %v3643_v50 = vadd.f32 %v6330_v53, %v3622_v54 }
 0x747   : > { %v8750_v28 = vadd.f32 %v8615_v26, %v3643_v50  ;;  %v5443_v50 = vld [vmem:[#allocation11 + $0x80] sm:$0xf] }
 0x748   : > { %v5444_v56 = vor.u32 %v5691_v55, %v5443_v50  ;;  %4288 = vmatpush.bf16.msrb.mxu0 %v5448_v10  ;;  %v5397_v55 = vld [vmem:[#allocation11 + $0x30] sm:$0xf0]  ;;  %v5678_v10 = vld [vmem:[#allocation11 + $0x2c] sm:$0xf] }
 0x749   : > { %3692 = vadd.xlane.f32.xlu0 %v8739_v59 }
 0x74a   : > { %4239 = vmatpush.bf16.msra.mxu3 %v5444_v56  ;;  %v5680_v56 = vld [vmem:[#allocation11 + $0x34] sm:$0xf0] }
 0x74b   : > { %v5404_v14 = vor.u32 %v5680_v56, %v5403_v24 }
 0x74e   : > { %4240 = vmatpush.bf16.msra.mxu3 %v5428_v6  ;;  %v5381_v6 = vld [vmem:[#allocation11 + $0x10] sm:$0xf0] }
 0x750   : > { %v3625_v41 = vpop.f32.mrf.mxu2 }
 0x751   : > { %v3644_v42 = vadd.f32 %v6331_v60, %v3625_v41  ;;  %v5429_v41 = vld [vmem:[#allocation11 + $0x70] sm:$0xf0]  ;;  %v5681_v60 = vld [vmem:[#allocation11 + $0x44] sm:$0xf] }
 0x752   : > { %v5432_v33 = vor.u32 %v5685_v35, %v5429_v41  ;;  %v5416_v34 = vor.u32 %v5681_v60, %v5413_v0  ;;  %v5673_v35 = vld [vmem:[#allocation11 + $0x4] sm:$0xf]  ;;  %v5387_v41 = vld [vmem:[#allocation11 + $0x8] sm:$0xf] }
 0x753   : > { %v8755_v53 = vadd.f32 %v8615_v26, %v3644_v42  ;;  %v5412_v42 = vor.u32 %v5683_v57, %v5411_v2  ;;  %v5384_v39 = vor.u32 %v5673_v35, %v5381_v6  ;;  %v5388_v18 = vor.u32 %v5676_v44, %v5387_v41  ;;  %v8783_v41 = vld [vmem:[#allocation10] ss:$0 sm:$0xff] }
 0x754   : > { %4289 = vmatpush.bf16.msrb.mxu0 %v5432_v33  ;;  %v5674_v33 = vld [vmem:[#allocation11 + $0xc] sm:$0xf] }
 0x755   : > { %4241 = vmatpush.bf16.msra.mxu3 %v5412_v42 }
 0x758   : > { %4290 = vmatpush.bf16.msrb.mxu0 %v5416_v34  ;;  %v3627_v24 = vpop.f32.mrf.mxu2 }
 0x75e   : > { %v3681_v23 = vpop.xlane.xlu0 %3680 }
 0x75f   : > { %v3706_v45 = vmul.f32 %v3681_v23, %v9167_v1  ;;  %v5468_v23 = vor.u32 %v5696_v49, %v5467_v31  ;;  %v5682_v31 = vld [vmem:[#allocation11 + $0x4c] sm:$0xf]  ;;  %v5421_v49 = vld [vmem:[#allocation11 + $0x58] sm:$0xf0] }
 0x760   : > { %v5424_v4 = vor.u32 %v5682_v31, %v5421_v49 }
 0x761   : > { %v8744_v20 = vsub.f32 %v8673_v8, %v3706_v45  ;;  %v5694_v45 = vld [vmem:[#allocation11 + $0xac] sm:$0xf]  ;;  %4336 = vmatpush.bf16.msrb.mxu1 %v5468_v23  ;;  %v5395_v23 = vld [vmem:[#allocation11 + $0x20] sm:$0xf] }
 0x763   : > { %v3738_v48 = vmul.f32 %v8744_v20, %v8744_v20 }
 0x765   : > { %3760 = vadd.xlane.f32.xlu1 %v3738_v48  ;;  %v5469_v48 = vld [vmem:[#allocation11 + $0xb8] sm:$0xf0]  ;;  %4337 = vmatpush.bf16.msrb.mxu1 %v5452_v46 }
 0x766   : > { %v5472_v54 = vor.u32 %v5694_v45, %v5469_v48  ;;  %v5679_v45 = vld [vmem:[#allocation11 + $0x2c] sm:$0xf0]  ;;  %v5677_v48 = vld [vmem:[#allocation11 + $0x24] sm:$0xf]  ;;  %v5405_v46 = vld [vmem:[#allocation11 + $0x38] sm:$0xf0] }
 0x767   : > { %v5396_v50 = vor.u32 %v5679_v45, %v5395_v23  ;;  %v5400_v61 = vor.u32 %v5677_v48, %v5397_v55  ;;  %v5408_v13 = vor.u32 %v5678_v10, %v5405_v46 }
 0x768   : > { %4385 = vmatpush.bf16.msrb.mxu2 %v5472_v54 }
 0x769   : > { %4338 = vmatpush.bf16.msrb.mxu1 %v5436_v11  ;;  %4242 = vmatpush.bf16.msra.mxu3 %v5396_v50  ;;  %v5389_v11 = vld [vmem:[#allocation11 + $0x18] sm:$0xf0] }
 0x76a   : > { %4291 = vmatpush.bf16.msrb.mxu0 %v5400_v61  ;;  %v5392_v9 = vor.u32 %v5674_v33, %v5389_v11 }
 0x76c   : > { %4386 = vmatpush.bf16.msrb.mxu2 %v5456_v7  ;;  %v5379_v7 = vld [vmem:[#allocation11] sm:$0xf] }
 0x76d   : > { %3694 = vadd.xlane.f32.xlu1 %v8750_v28  ;;  %4339 = vmatpush.bf16.msrb.mxu1 %v5420_v62  ;;  %v5380_v30 = vor.u32 %v5675_v47, %v5379_v7 }
 0x76e   : > { %4292 = vmatpush.bf16.msrb.mxu0 %v5384_v39 }
 0x76f   : > { %4243 = vmatpush.bf16.msra.mxu3 %v5380_v30 }
 0x770   : > { %4387 = vmatpush.bf16.msrb.mxu2 %v5440_v58 }
 0x771   : > { %4340 = vmatpush.bf16.msrb.mxu1 %v5404_v14  ;;  %v6332_v14 = vld [vmem:[%s6849_s14 + $0x78] sm:$0xff]  ;;  %s8997_s14 = scalar_lea.vmem [#allocation14], %s5177_s8  ;;  %s5738_s8 = sshll.u32 %s6733_s28, 7 }
 0x772   : > { %v3645_v10 = vadd.f32 %v6332_v14, %v3627_v24  ;;  %s5029_s20 = scalar_lea.hbm %s9168_s29, %s5738_s8  ;;  %s5030_s4 = sshll.u32 %s8997_s14, 4  ;;  %s5031_s4 = int_to_ptr.vmem [resolvable:$true] %s5030_s4 }
 0x773   : > { %s5032_s26 = sshll.u32 %s5029_s20, 4  ;;  %s5017_s28 = scalar_lea.sflag [#allocation4], %s6843_s15  ;;  %s5033_s26 = int_to_ptr.hbm [resolvable:$true] %s5032_s26 }
 0x774   : > { %4388 = vmatpush.bf16.msrb.mxu2 %v5424_v4  ;;  %s6557_s13 = sshra.s32 %s5033_s26, 4  ;;  %s6558_s13 = int_to_ptr.hbm [resolvable:$true] %s6557_s13 }
 0x775   : > { %3696 = vadd.xlane.f32.xlu1 %v8755_v53  ;;  %4341 = vmatpush.bf16.msrb.mxu1 %v5388_v18  ;;  %s6559_s16 = scalar_lea.hbm %s6558_s13, 128  ;;  %p6564_p12 = scmp.lt.s32.totalorder %s6558_s13, %s9168_s29 }
 0x776   : > { %p6560_p1 = scmp.ne.s32.totalorder %s6558_s13, %s6559_s16  ;;  %p6565_p7 = scmp.lt.s32.totalorder %s6563_s25, %s6559_s16 }
 0x778   : > { %4389 = vmatpush.bf16.msrb.mxu2 %v5408_v13  ;;  %v8776_v13 = vld [vmem:[%s9084_s6] ss:$0 sm:$0xff]  ;;  %p6561_p3 = pnand %p6560_p1, %p6812_p5  ;;  %p6566_p8 = por %p6565_p7, %p6564_p12 }
 0x77a   : > { %p6562_p4 = pneg %p6561_p3 }
 0x77c   : > { %4390 = vmatpush.bf16.msrb.mxu2 %v5392_v9  ;;  %p6567_p9 = pnand %p6566_p8, %p6562_p4 }
 0x780   : > { %v3749_v54 = vpop.xlane.xlu1 %3748 }
 0x781   : > { %v3780_v3 = vmul.f32 %v3749_v54, %v9167_v1 }
 0x783   : > { %v3796_v43 = vadd.f32 1e-05, %v3780_v3 }
 0x785   : > { %6285 = vrsqrt.f32 %v3796_v43  ;;  %vm3818_vm13 = vweird.f32 %v3796_v43 }
 0x788   : > { %v3751_v58 = vpop.xlane.xlu2 %3750  ;;  %v3683_v2 = vpop.xlane.xlu1 %3682 }
 0x789   : > { %v3781_v57 = vmul.f32 %v3751_v58, %v9167_v1  ;;  %v3707_v60 = vmul.f32 %v3683_v2, %v9167_v1 }
 0x78b   : > { %v6286_v42 = vpop.eup %6285  ;;  %v3797_v0 = vadd.f32 1e-05, %v3781_v57  ;;  %v8762_v37 = vsub.f32 %v8688_v63, %v3707_v60 }
 0x78c   : > { %v3813_v36 = vmul.f32 %v6286_v42, %v3796_v43  ;;  %vm3819_vm12 = vweird.f32 %v6286_v42  ;;  %v8780_v43 = vadd.f32 %v8615_v26, %v3645_v10 }
 0x78d   : > { %6287 = vrsqrt.f32 %v3797_v0  ;;  %v3739_v34 = vmul.f32 %v8762_v37, %v8762_v37  ;;  %vm3820_vm14 = vmor %vm3818_vm13, %vm3819_vm12  ;;  %vm3828_vm0 = vweird.f32 %v3797_v0 }
 0x78e   : > { %v3814_v62 = vmul.f32 %v6286_v42, %v3813_v36 }
 0x78f   : > { %3762 = vadd.xlane.f32.xlu2 %v3739_v34 }
 0x790   : > { %v3815_v31 = vmul.f32 0.5, %v3814_v62  ;;  %v3685_v49 = vpop.xlane.xlu1 %3684 }
 0x791   : > { %v3708_v4 = vmul.f32 %v3685_v49, %v9167_v1 }
 0x792   : > { %v3816_v23 = vsub.f32 1.5, %v3815_v31 }
 0x793   : > { %v6288_v45 = vpop.eup %6287  ;;  %v8768_v48 = vsub.f32 %v8695_v52, %v3708_v4 }
 0x794   : > { %v3817_v54 = vmul.f32 %v6286_v42, %v3816_v23  ;;  %v3823_v50 = vmul.f32 %v6288_v45, %v3797_v0  ;;  %vm3829_vm15 = vweird.f32 %v6288_v45 }
 0x795   : > { %v3740_v55 = vmul.f32 %v8768_v48, %v8768_v48  ;;  %vm3830_vm1 = vmor %vm3828_vm0, %vm3829_vm15 }
 0x796   : > { %v3824_v56 = vmul.f32 %v6288_v45, %v3823_v50  ;;  %v3821_v3 = vsel %vm3820_vm14, %v6286_v42, %v3817_v54 }
 0x797   : > { %3764 = vadd.xlane.f32.xlu2 %v3740_v55  ;;  %v3972_v7 = vmul.f32 %v3821_v3, %v8678_v21 }
 0x798   : > { %v3825_v61 = vmul.f32 0.5, %v3824_v56 }
 0x799   : > { %v3991_v39 = vmul.f32 %v8776_v13, %v3972_v7 }
 0x79a   : > { %v3826_v46 = vsub.f32 1.5, %v3825_v61 }
 0x79b   : > { %v4010_v11 = vadd.f32 %v8783_v41, %v3991_v39 }
 0x79c   : > { %v3827_v47 = vmul.f32 %v6288_v45, %v3826_v46  ;;  %v3753_v30 = vpop.xlane.xlu2 %3752 }
 0x79d   : > { %v3782_v35 = vmul.f32 %v3753_v30, %v9167_v1 }
 0x79e   : > { %v3831_v6 = vsel %vm3830_vm1, %v6288_v45, %v3827_v47 }
 0x79f   : > { %v3973_v44 = vmul.f32 %v3831_v6, %v8685_v51  ;;  %v3798_v33 = vadd.f32 1e-05, %v3782_v35  ;;  %3698 = vadd.xlane.f32.xlu2 %v8780_v43 }
 0x7a1   : > { %v3992_v21 = vmul.f32 %v8776_v13, %v3973_v44  ;;  %6289 = vrsqrt.f32 %v3798_v33  ;;  %vm3838_vm3 = vweird.f32 %v3798_v33 }
 0x7a3   : > { %v4011_v26 = vadd.f32 %v8783_v41, %v3992_v21 }
 0x7a4   : > { %v3755_v18 = vpop.xlane.xlu0 %3754  ;;  %v3687_v9 = vpop.xlane.xlu2 %3686 }
 0x7a5   : > { %v3783_v58 = vmul.f32 %v3755_v18, %v9167_v1  ;;  %v3709_v2 = vmul.f32 %v3687_v9, %v9167_v1  ;;  %v4026_v57 = vpack.c.bf16 %v4011_v26, %v4010_v11 }
 0x7a7   : > { %v6290_v60 = vpop.eup %6289  ;;  %v3799_v42 = vadd.f32 1e-05, %v3783_v58  ;;  %v8794_v51 = vsub.f32 %v8710_v22, %v3709_v2  ;;  %4244 = vmatmul.bf16.vlgmr.msra.gmra.mxu3 %v4026_v57  ;;  %4293 = vmatmul.bf16.vlgmr.msrb.gmra.mxu0 %v4026_v57 }
 0x7a8   : > { %v3833_v0 = vmul.f32 %v6290_v60, %v3798_v33  ;;  %4342 = vmatmul.bf16.vlgmr.msrb.gmra.mxu1 %v4026_v57  ;;  %4391 = vmatmul.bf16.vlgmr.msrb.gmra.mxu2 %v4026_v57  ;;  %vm3839_vm2 = vweird.f32 %v6290_v60 }
 0x7a9   : > { %6291 = vrsqrt.f32 %v3799_v42  ;;  %v3741_v36 = vmul.f32 %v8794_v51, %v8794_v51  ;;  %vm3840_vm4 = vmor %vm3838_vm3, %vm3839_vm2  ;;  %vm3848_vm6 = vweird.f32 %v3799_v42 }
 0x7aa   : > { %v3834_v34 = vmul.f32 %v6290_v60, %v3833_v0 }
 0x7ab   : > { %3766 = vadd.xlane.f32.xlu0 %v3741_v36 }
 0x7ac   : > { %v3835_v62 = vmul.f32 0.5, %v3834_v34  ;;  %v3757_v31 = vpop.xlane.xlu0 %3756  ;;  %v3689_v49 = vpop.xlane.xlu2 %3688 }
 0x7ad   : > { %v3784_v4 = vmul.f32 %v3757_v31, %v9167_v1  ;;  %v3710_v23 = vmul.f32 %v3689_v49, %v9167_v1 }
 0x7ae   : > { %v3836_v45 = vsub.f32 1.5, %v3835_v62 }
 0x7af   : > { %v6292_v54 = vpop.eup %6291  ;;  %v3800_v50 = vadd.f32 1e-05, %v3784_v4  ;;  %v8801_v55 = vsub.f32 %v8721_v15, %v3710_v23 }
 0x7b0   : > { %v3837_v24 = vmul.f32 %v6290_v60, %v3836_v45  ;;  %v3843_v56 = vmul.f32 %v6292_v54, %v3799_v42  ;;  %vm3849_vm5 = vweird.f32 %v6292_v54 }
 0x7b1   : > { %6293 = vrsqrt.f32 %v3800_v50  ;;  %v3742_v3 = vmul.f32 %v8801_v55, %v8801_v55  ;;  %vm3850_vm7 = vmor %vm3848_vm6, %vm3849_vm5  ;;  %vm3858_vm9 = vweird.f32 %v3800_v50 }
 0x7b2   : > { %v3844_v61 = vmul.f32 %v6292_v54, %v3843_v56  ;;  %v3841_v14 = vsel %vm3840_vm4, %v6290_v60, %v3837_v24 }
 0x7b3   : > { %3768 = vadd.xlane.f32.xlu0 %v3742_v3  ;;  %v3974_v39 = vmul.f32 %v3841_v14, %v8700_v25 }
 0x7b4   : > { %v3845_v10 = vmul.f32 0.5, %v3844_v61  ;;  %v3759_v46 = vpop.xlane.xlu1 %3758  ;;  %v3691_v7 = vpop.xlane.xlu0 %3690 }
 0x7b5   : > { %v3785_v47 = vmul.f32 %v3759_v46, %v9167_v1  ;;  %v3711_v30 = vmul.f32 %v3691_v7, %v9167_v1  ;;  %v3993_v2 = vmul.f32 %v8776_v13, %v3974_v39 }
 0x7b6   : > { %v3846_v35 = vsub.f32 1.5, %v3845_v10 }
 0x7b7   : > { %v6294_v6 = vpop.eup %6293  ;;  %v3801_v44 = vadd.f32 1e-05, %v3785_v47  ;;  %v8809_v21 = vsub.f32 %v8732_v19, %v3711_v30  ;;  %v4012_v62 = vadd.f32 %v8783_v41, %v3993_v2 }
 0x7b8   : > { %v3847_v33 = vmul.f32 %v6292_v54, %v3846_v35  ;;  %v3853_v11 = vmul.f32 %v6294_v6, %v3800_v50  ;;  %vm3859_vm8 = vweird.f32 %v6294_v6 }
 0x7b9   : > { %6295 = vrsqrt.f32 %v3801_v44  ;;  %v3743_v26 = vmul.f32 %v8809_v21, %v8809_v21  ;;  %vm3860_vm10 = vmor %vm3858_vm9, %vm3859_vm8  ;;  %vm3868_vm12 = vweird.f32 %v3801_v44 }
 0x7ba   : > { %v3851_v18 = vsel %vm3850_vm7, %v6292_v54, %v3847_v33  ;;  %v3854_v9 = vmul.f32 %v6294_v6, %v3853_v11 }
 0x7bb   : > { %v3975_v58 = vmul.f32 %v3851_v18, %v8707_v27  ;;  %3770 = vadd.xlane.f32.xlu1 %v3743_v26 }
 0x7bc   : > { %v3855_v25 = vmul.f32 0.5, %v3854_v9  ;;  %v3693_v57 = vpop.xlane.xlu0 %3692 }
 0x7bd   : > { %v3712_v60 = vmul.f32 %v3693_v57, %v9167_v1  ;;  %v3994_v0 = vmul.f32 %v8776_v13, %v3975_v58 }
 0x7be   : > { %v3856_v42 = vsub.f32 1.5, %v3855_v25 }
 0x7bf   : > { %v6296_v36 = vpop.eup %6295  ;;  %v8818_v34 = vsub.f32 %v8739_v59, %v3712_v60  ;;  %v4013_v31 = vadd.f32 %v8783_v41, %v3994_v0 }
 0x7c0   : > { %v3857_v49 = vmul.f32 %v6294_v6, %v3856_v42  ;;  %v3863_v27 = vmul.f32 %v6296_v36, %v3801_v44  ;;  %vm3869_vm11 = vweird.f32 %v6296_v36 }
 0x7c1   : > { %v4027_v4 = vpack.c.bf16 %v4013_v31, %v4012_v62  ;;  %v3744_v23 = vmul.f32 %v8818_v34, %v8818_v34  ;;  %vm3870_vm13 = vmor %vm3868_vm12, %vm3869_vm11 }
 0x7c2   : > { %v3864_v45 = vmul.f32 %v6296_v36, %v3863_v27  ;;  %v3861_v54 = vsel %vm3860_vm10, %v6294_v6, %v3857_v49 }
 0x7c3   : > { %4249 = vmatmul.bf16.gmra.mxu3 %v4027_v4  ;;  %4298 = vmatmul.bf16.gmra.mxu0 %v4027_v4  ;;  %v3976_v3 = vmul.f32 %v3861_v54, %v8718_v5 }
 0x7c4   : > { %v3865_v24 = vmul.f32 0.5, %v3864_v45  ;;  %4347 = vmatmul.bf16.gmra.mxu1 %v4027_v4  ;;  %4396 = vmatmul.bf16.gmra.mxu2 %v4027_v4 }
 0x7c5   : > { %3772 = vadd.xlane.f32.xlu2 %v3744_v23  ;;  %v3995_v50 = vmul.f32 %v8776_v13, %v3976_v3 }
 0x7c6   : > { %v3866_v56 = vsub.f32 1.5, %v3865_v24 }
 0x7c7   : > { %v4014_v7 = vadd.f32 %v8783_v41, %v3995_v50 }
 0x7c8   : > { %v3867_v61 = vmul.f32 %v6296_v36, %v3866_v56 }
 0x7ca   : > { %v3871_v14 = vsel %vm3870_vm13, %v6296_v36, %v3867_v61 }
 0x7cb   : > { %v3977_v10 = vmul.f32 %v3871_v14, %v8729_v32 }
 0x7cd   : > { %v3996_v46 = vmul.f32 %v8776_v13, %v3977_v10 }
 0x7cf   : > { %v4015_v47 = vadd.f32 %v8783_v41, %v3996_v46 }
 0x7d1   : > { %v4028_v30 = vpack.c.bf16 %v4015_v47, %v4014_v7 }
 0x7d3   : > { %4254 = vmatmul.bf16.gmra.mxu3 %v4028_v30  ;;  %4303 = vmatmul.bf16.gmra.mxu0 %v4028_v30 }
 0x7d4   : > { %4352 = vmatmul.bf16.gmra.mxu1 %v4028_v30  ;;  %4401 = vmatmul.bf16.gmra.mxu2 %v4028_v30 }
 0x7d8   : > { %v3761_v5 = vpop.xlane.xlu1 %3760 }
 0x7d9   : > { %v3786_v26 = vmul.f32 %v3761_v5, %v9167_v1 }
 0x7db   : > { %v3802_v9 = vadd.f32 1e-05, %v3786_v26 }
 0x7dd   : > { %6297 = vrsqrt.f32 %v3802_v9  ;;  %vm3878_vm15 = vweird.f32 %v3802_v9 }
 0x7e0   : > { %v3695_v35 = vpop.xlane.xlu1 %3694 }
 0x7e1   : > { %v3713_v6 = vmul.f32 %v3695_v35, %v9167_v1 }
 0x7e3   : > { %v8832_v39 = vsub.f32 %v8750_v28, %v3713_v6  ;;  %v6298_v58 = vpop.eup %6297 }
 0x7e4   : > { %v3873_v2 = vmul.f32 %v6298_v58, %v3802_v9  ;;  %vm3879_vm14 = vweird.f32 %v6298_v58 }
 0x7e5   : > { %v3745_v32 = vmul.f32 %v8832_v39, %v8832_v39  ;;  %vm3880_vm0 = vmor %vm3878_vm15, %vm3879_vm14 }
 0x7e6   : > { %v3874_v25 = vmul.f32 %v6298_v58, %v3873_v2 }
 0x7e7   : > { %3774 = vadd.xlane.f32.xlu0 %v3745_v32 }
 0x7e8   : > { %v3697_v44 = vpop.xlane.xlu1 %3696  ;;  %v3875_v42 = vmul.f32 0.5, %v3874_v25 }
 0x7e9   : > { %v3714_v33 = vmul.f32 %v3697_v44, %v9167_v1 }
 0x7ea   : > { %v3876_v36 = vsub.f32 1.5, %v3875_v42 }
 0x7eb   : > { %v8838_v11 = vsub.f32 %v8755_v53, %v3714_v33 }
 0x7ec   : > { %v3877_v4 = vmul.f32 %v6298_v58, %v3876_v36 }
 0x7ed   : > { %v3746_v18 = vmul.f32 %v8838_v11, %v8838_v11 }
 0x7ee   : > { %v3881_v54 = vsel %vm3880_vm0, %v6298_v58, %v3877_v4 }
 0x7ef   : > { %3776 = vadd.xlane.f32.xlu1 %v3746_v18  ;;  %v3978_v14 = vmul.f32 %v3881_v54, %v8744_v20 }
 0x7f1   : > { %v3997_v5 = vmul.f32 %v8776_v13, %v3978_v14 }
 0x7f3   : > { %v4016_v20 = vadd.f32 %v8783_v41, %v3997_v5 }
 0x802   : > { %v3763_v57 = vpop.xlane.xlu2 %3762 }
 0x803   : > { %v3787_v60 = vmul.f32 %v3763_v57, %v9167_v1 }
 0x805   : > { %v3803_v0 = vadd.f32 1e-05, %v3787_v60 }
 0x807   : > { %6299 = vrsqrt.f32 %v3803_v0  ;;  %vm3888_vm2 = vweird.f32 %v3803_v0 }
 0x80a   : > { %v3765_v62 = vpop.xlane.xlu2 %3764 }
 0x80b   : > { %v3788_v31 = vmul.f32 %v3765_v62, %v9167_v1 }
 0x80d   : > { %v6300_v49 = vpop.eup %6299  ;;  %v3804_v27 = vadd.f32 1e-05, %v3788_v31 }
 0x80e   : > { %v3883_v23 = vmul.f32 %v6300_v49, %v3803_v0  ;;  %vm3889_vm1 = vweird.f32 %v6300_v49 }
 0x80f   : > { %6301 = vrsqrt.f32 %v3804_v27  ;;  %vm3890_vm3 = vmor %vm3888_vm2, %vm3889_vm1  ;;  %vm3898_vm5 = vweird.f32 %v3804_v27 }
 0x810   : > { %v3884_v45 = vmul.f32 %v6300_v49, %v3883_v23 }
 0x812   : > { %v3885_v24 = vmul.f32 0.5, %v3884_v45  ;;  %v3699_v56 = vpop.xlane.xlu2 %3698 }
 0x813   : > { %v3715_v3 = vmul.f32 %v3699_v56, %v9167_v1 }
 0x814   : > { %v3886_v61 = vsub.f32 1.5, %v3885_v24 }
 0x815   : > { %v8848_v10 = vsub.f32 %v8780_v43, %v3715_v3  ;;  %v6302_v46 = vpop.eup %6301 }
 0x816   : > { %v3887_v50 = vmul.f32 %v6300_v49, %v3886_v61  ;;  %v3893_v35 = vmul.f32 %v6302_v46, %v3804_v27  ;;  %vm3899_vm4 = vweird.f32 %v6302_v46 }
 0x817   : > { %v3747_v7 = vmul.f32 %v8848_v10, %v8848_v10  ;;  %vm3900_vm6 = vmor %vm3898_vm5, %vm3899_vm4 }
 0x818   : > { %v3891_v47 = vsel %vm3890_vm3, %v6300_v49, %v3887_v50  ;;  %v3894_v44 = vmul.f32 %v6302_v46, %v3893_v35 }
 0x819   : > { %v3979_v30 = vmul.f32 %v3891_v47, %v8762_v37  ;;  %3778 = vadd.xlane.f32.xlu2 %v3747_v7 }
 0x81a   : > { %v3895_v58 = vmul.f32 0.5, %v3894_v44 }
 0x81b   : > { %v3998_v6 = vmul.f32 %v8776_v13, %v3979_v30 }
 0x81c   : > { %v3896_v37 = vsub.f32 1.5, %v3895_v58 }
 0x81d   : > { %v4017_v32 = vadd.f32 %v8783_v41, %v3998_v6 }
 0x81e   : > { %v3767_v33 = vpop.xlane.xlu0 %3766  ;;  %v3897_v0 = vmul.f32 %v6302_v46, %v3896_v37 }
 0x81f   : > { %v3789_v26 = vmul.f32 %v3767_v33, %v9167_v1  ;;  %v4029_v18 = vpack.c.bf16 %v4017_v32, %v4016_v20 }
 0x820   : > { %v3901_v62 = vsel %vm3900_vm6, %v6302_v46, %v3897_v0 }
 0x821   : > { %v3805_v9 = vadd.f32 1e-05, %v3789_v26  ;;  %4259 = vmatmul.bf16.gmra.mxu3 %v4029_v18  ;;  %4308 = vmatmul.bf16.gmra.mxu0 %v4029_v18  ;;  %v3980_v54 = vmul.f32 %v3901_v62, %v8768_v48 }
 0x822   : > { %4357 = vmatmul.bf16.gmra.mxu1 %v4029_v18  ;;  %4406 = vmatmul.bf16.gmra.mxu2 %v4029_v18 }
 0x823   : > { %6303 = vrsqrt.f32 %v3805_v9  ;;  %vm3908_vm8 = vweird.f32 %v3805_v9  ;;  %v3999_v50 = vmul.f32 %v8776_v13, %v3980_v54 }
 0x825   : > { %v4018_v5 = vadd.f32 %v8783_v41, %v3999_v50  ;;  %v5710_v50 = vld [vmem:[#allocation13 + $0x28] sm:$0xff] }
 0x826   : > { %v3769_v2 = vpop.xlane.xlu0 %3768 }
 0x827   : > { %v3790_v25 = vmul.f32 %v3769_v2, %v9167_v1 }
 0x829   : > { %v6304_v57 = vpop.eup %6303  ;;  %v3806_v60 = vadd.f32 1e-05, %v3790_v25 }
 0x82a   : > { %v3903_v42 = vmul.f32 %v6304_v57, %v3805_v9  ;;  %vm3909_vm7 = vweird.f32 %v6304_v57 }
 0x82b   : > { %6305 = vrsqrt.f32 %v3806_v60  ;;  %vm3910_vm9 = vmor %vm3908_vm8, %vm3909_vm7  ;;  %vm3918_vm11 = vweird.f32 %v3806_v60 }
 0x82c   : > { %v3904_v36 = vmul.f32 %v6304_v57, %v3903_v42 }
 0x82e   : > { %v3905_v31 = vmul.f32 0.5, %v3904_v36  ;;  %v3771_v49 = vpop.xlane.xlu1 %3770 }
 0x82f   : > { %v3791_v4 = vmul.f32 %v3771_v49, %v9167_v1  ;;  %v5720_v49 = vld [vmem:[#allocation13 + $0x78] sm:$0xff] }
 0x830   : > { %v3906_v23 = vsub.f32 1.5, %v3905_v31  ;;  %v5736_v31 = vld [vmem:[#allocation13 + $0xf8] sm:$0xff]  ;;  %4837 = vmatpush.bf16.msra.mxu0 %v5720_v49 }
 0x831   : > { %v6306_v45 = vpop.eup %6305  ;;  %v3807_v24 = vadd.f32 1e-05, %v3791_v4  ;;  %4935 = vmatpush.bf16.msra.mxu2 %v5736_v31 }
 0x832   : > { %v3907_v56 = vmul.f32 %v6304_v57, %v3906_v23  ;;  %v3913_v3 = vmul.f32 %v6306_v45, %v3806_v60  ;;  %vm3919_vm10 = vweird.f32 %v6306_v45 }
 0x833   : > { %6307 = vrsqrt.f32 %v3807_v24  ;;  %vm3920_vm12 = vmor %vm3918_vm11, %vm3919_vm10  ;;  %vm3928_vm14 = vweird.f32 %v3807_v24 }
 0x834   : > { %v3911_v61 = vsel %vm3910_vm9, %v6304_v57, %v3907_v56  ;;  %v3914_v27 = vmul.f32 %v6306_v45, %v3913_v3  ;;  %v5735_v56 = vld [vmem:[#allocation13 + $0xf0] sm:$0xff] }
 0x835   : > { %v3981_v14 = vmul.f32 %v3911_v61, %v8794_v51  ;;  %v5719_v3 = vld [vmem:[#allocation13 + $0x70] sm:$0xff]  ;;  %4936 = vmatpush.bf16.msra.mxu2 %v5735_v56 }
 0x836   : > { %v3915_v46 = vmul.f32 0.5, %v3914_v27  ;;  %v5727_v61 = vld [vmem:[#allocation13 + $0xb0] sm:$0xff]  ;;  %4838 = vmatpush.bf16.msra.mxu0 %v5719_v3 }
 0x837   : > { %v4000_v7 = vmul.f32 %v8776_v13, %v3981_v14  ;;  %v5707_v3 = vld [vmem:[#allocation13 + $0x10] sm:$0xff] }
 0x838   : > { %v3916_v47 = vsub.f32 1.5, %v3915_v46  ;;  %v3773_v9 = vpop.xlane.xlu2 %3772 }
 0x839   : > { %v6308_v30 = vpop.eup %6307  ;;  %v4019_v48 = vadd.f32 %v8783_v41, %v4000_v7  ;;  %v3792_v2 = vmul.f32 %v3773_v9, %v9167_v1 }
 0x83a   : > { %v3917_v35 = vmul.f32 %v6306_v45, %v3916_v47  ;;  %v3923_v6 = vmul.f32 %v6308_v30, %v3807_v24  ;;  %vm3929_vm13 = vweird.f32 %v6308_v30  ;;  %v5711_v24 = vld [vmem:[#allocation13 + $0x30] sm:$0xff] }
 0x83b   : > { %v4030_v20 = vpack.c.bf16 %v4019_v48, %v4018_v5  ;;  %vm3930_vm15 = vmor %vm3928_vm14, %vm3929_vm13  ;;  %v3808_v60 = vadd.f32 1e-05, %v3792_v2 }
 0x83c   : > { %v3924_v32 = vmul.f32 %v6308_v30, %v3923_v6  ;;  %v3921_v51 = vsel %vm3920_vm12, %v6306_v45, %v3917_v35  ;;  %v5728_v45 = vld [vmem:[#allocation13 + $0xb8] sm:$0xff] }
 0x83d   : > { %4264 = vmatmul.bf16.gmra.mxu3 %v4030_v20  ;;  %4313 = vmatmul.bf16.gmra.mxu0 %v4030_v20  ;;  %v3982_v26 = vmul.f32 %v3921_v51, %v8801_v55  ;;  %6309 = vrsqrt.f32 %v3808_v60  ;;  %vm3938_vm1 = vweird.f32 %v3808_v60 }
 0x83e   : > { %v3925_v44 = vmul.f32 0.5, %v3924_v32  ;;  %4362 = vmatmul.bf16.gmra.mxu1 %v4030_v20  ;;  %4411 = vmatmul.bf16.gmra.mxu2 %v4030_v20 }
 0x83f   : > { %v4001_v25 = vmul.f32 %v8776_v13, %v3982_v26  ;;  %4886 = vmatpush.bf16.msra.mxu1 %v5728_v45  ;;  %v5732_v45 = vld [vmem:[#allocation13 + $0xd8] sm:$0xff] }
 0x840   : > { %v3926_v33 = vsub.f32 1.5, %v3925_v44 }
 0x841   : > { %v4020_v0 = vadd.f32 %v8783_v41, %v4001_v25  ;;  %v5718_v25 = vld [vmem:[#allocation13 + $0x68] sm:$0xff] }
 0x842   : > { %v3927_v18 = vmul.f32 %v6308_v30, %v3926_v33  ;;  %4839 = vmatpush.bf16.msra.mxu0 %v5718_v25 }
 0x843   : > { %v6310_v55 = vpop.eup %6309  ;;  %4887 = vmatpush.bf16.msra.mxu1 %v5727_v61  ;;  %v5715_v61 = vld [vmem:[#allocation13 + $0x50] sm:$0xff] }
 0x844   : > { %v3931_v58 = vsel %vm3930_vm15, %v6308_v30, %v3927_v18  ;;  %v3933_v62 = vmul.f32 %v6310_v55, %v3808_v60  ;;  %vm3939_vm0 = vweird.f32 %v6310_v55  ;;  %v5709_v60 = vld [vmem:[#allocation13 + $0x20] sm:$0xff] }
 0x845   : > { %v3983_v37 = vmul.f32 %v3931_v58, %v8809_v21  ;;  %v5712_v21 = vld [vmem:[#allocation13 + $0x38] sm:$0xff]  ;;  %vm3940_vm2 = vmor %vm3938_vm1, %vm3939_vm0 }
 0x846   : > { %v3934_v4 = vmul.f32 %v6310_v55, %v3933_v62  ;;  %4788 = vmatpush.bf16.msrb.mxu3 %v5712_v21  ;;  %v5708_v21 = vld [vmem:[#allocation13 + $0x18] sm:$0xff] }
 0x847   : > { %v4002_v57 = vmul.f32 %v8776_v13, %v3983_v37 }
 0x848   : > { %v3935_v14 = vmul.f32 0.5, %v3934_v4  ;;  %v5716_v4 = vld [vmem:[#allocation13 + $0x58] sm:$0xff] }
 0x849   : > { %v4021_v42 = vadd.f32 %v8783_v41, %v4002_v57  ;;  %v5726_v57 = vld [vmem:[#allocation13 + $0xa8] sm:$0xff] }
 0x84a   : > { %4789 = vmatpush.bf16.msrb.mxu3 %v5711_v24  ;;  %v3936_v46 = vsub.f32 1.5, %v3935_v14  ;;  %4888 = vmatpush.bf16.msra.mxu1 %v5726_v57  ;;  %v5731_v14 = vld [vmem:[#allocation13 + $0xd0] sm:$0xff] }
 0x84b   : > { %v4031_v36 = vpack.c.bf16 %v4021_v42, %v4020_v0  ;;  %v5733_v42 = vld [vmem:[#allocation13 + $0xe0] sm:$0xff] }
 0x84c   : > { %v3937_v47 = vmul.f32 %v6310_v55, %v3936_v46  ;;  %v5714_v46 = vld [vmem:[#allocation13 + $0x48] sm:$0xff] }
 0x84d   : > { %4269 = vmatmul.bf16.gmra.mxu3 %v4031_v36  ;;  %4318 = vmatmul.bf16.gmra.mxu0 %v4031_v36 }
 0x84e   : > { %4367 = vmatmul.bf16.gmra.mxu1 %v4031_v36  ;;  %4416 = vmatmul.bf16.gmra.mxu2 %v4031_v36  ;;  %v3941_v48 = vsel %vm3940_vm2, %v6310_v55, %v3937_v47  ;;  %v5717_v36 = vld [vmem:[#allocation13 + $0x60] sm:$0xff]  ;;  %v5730_v47 = vld [vmem:[#allocation13 + $0xc8] sm:$0xff] }
 0x84f   : > { %4790 = vmatpush.bf16.msrb.mxu3 %v5710_v50  ;;  %v3984_v20 = vmul.f32 %v3941_v48, %v8818_v34  ;;  %v5725_v55 = vld [vmem:[#allocation13 + $0xa0] sm:$0xff]  ;;  %4840 = vmatpush.bf16.msra.mxu0 %v5717_v36  ;;  %v5706_v50 = vld [vmem:[#allocation13 + $0x8] sm:$0xff]  ;;  %v8894_v48 = vpop.f32.mrf.mxu1 }
 0x850   : > { %4889 = vmatpush.bf16.msra.mxu1 %v5725_v55 }
 0x851   : > { %v4003_v33 = vmul.f32 %v8776_v13, %v3984_v20  ;;  %v5713_v20 = vld [vmem:[#allocation13 + $0x40] sm:$0xff] }
 0x853   : > { %v4022_v9 = vadd.f32 %v8783_v41, %v4003_v33  ;;  %4791 = vmatpush.bf16.msrb.mxu3 %v5709_v60  ;;  %4841 = vmatpush.bf16.msra.mxu0 %v5716_v4 }
 0x857   : > { %4792 = vmatpush.bf16.msrb.mxu3 %v5708_v21  ;;  %4842 = vmatpush.bf16.msra.mxu0 %v5715_v61  ;;  %v4345_v25 = vpop.f32.mrf.mxu1 }
 0x85a   : > { %v3775_v23 = vpop.xlane.xlu0 %3774 }
 0x85b   : > { %v3793_v54 = vmul.f32 %v3775_v23, %v9167_v1  ;;  %v5724_v23 = vld [vmem:[#allocation13 + $0x98] sm:$0xff]  ;;  %4793 = vmatpush.bf16.msrb.mxu3 %v5707_v3  ;;  %4843 = vmatpush.bf16.msra.mxu0 %v5714_v46 }
 0x85c   : > { %4890 = vmatpush.bf16.msra.mxu1 %v5724_v23 }
 0x85d   : > { %v3809_v27 = vadd.f32 1e-05, %v3793_v54 }
 0x85f   : > { %6311 = vrsqrt.f32 %v3809_v27  ;;  %vm3948_vm4 = vweird.f32 %v3809_v27  ;;  %4794 = vmatpush.bf16.msrb.mxu3 %v5706_v50  ;;  %4844 = vmatpush.bf16.msra.mxu0 %v5713_v20 }
 0x862   : > { %v3777_v18 = vpop.xlane.xlu1 %3776 }
 0x863   : > { %v3794_v37 = vmul.f32 %v3777_v18, %v9167_v1 }
 0x865   : > { %v6312_v7 = vpop.eup %6311  ;;  %v8881_v34 = vadd.f32 1e-05, %v3794_v37 }
 0x866   : > { %v3943_v30 = vmul.f32 %v6312_v7, %v3809_v27  ;;  %vm3949_vm3 = vweird.f32 %v6312_v7  ;;  %v5723_v27 = vld [vmem:[#allocation13 + $0x90] sm:$0xff] }
 0x867   : > { %vm3950_vm5 = vmor %vm3948_vm4, %vm3949_vm3  ;;  %6313 = vrsqrt.f32 %v8881_v34  ;;  %4891 = vmatpush.bf16.msra.mxu1 %v5723_v27  ;;  %vm3958_vm7 = vweird.f32 %v8881_v34 }
 0x868   : > { %v3944_v5 = vmul.f32 %v6312_v7, %v3943_v30  ;;  %v8890_v30 = vpop.f32.mrf.mxu0 }
 0x86a   : > { %v3945_v35 = vmul.f32 0.5, %v3944_v5 }
 0x86c   : > { %v3946_v6 = vsub.f32 1.5, %v3945_v35  ;;  %v8896_v35 = vpop.f32.mrf.mxu2 }
 0x86d   : > { %v8884_v0 = vpop.eup %6313 }
 0x86e   : > { %v3947_v32 = vmul.f32 %v6312_v7, %v3946_v6  ;;  %v3953_v62 = vmul.f32 %v8884_v0, %v8881_v34  ;;  %v5705_v6 = vld [vmem:[#allocation13] sm:$0xff]  ;;  %vm3959_vm6 = vweird.f32 %v8884_v0 }
 0x86f   : > { %4795 = vmatpush.bf16.msrb.mxu3 %v5705_v6  ;;  %vm3960_vm8 = vmor %vm3958_vm7, %vm3959_vm6 }
 0x870   : > { %v3951_v51 = vsel %vm3950_vm5, %v6312_v7, %v3947_v32  ;;  %v3954_v31 = vmul.f32 %v8884_v0, %v3953_v62  ;;  %v5722_v7 = vld [vmem:[#allocation13 + $0x88] sm:$0xff]  ;;  %v4296_v37 = vpop.f32.mrf.mxu0 }
 0x871   : > { %v3985_v44 = vmul.f32 %v3951_v51, %v8832_v39  ;;  %v5734_v39 = vld [vmem:[#allocation13 + $0xe8] sm:$0xff]  ;;  %4892 = vmatpush.bf16.msra.mxu1 %v5722_v7  ;;  %v5721_v51 = vld [vmem:[#allocation13 + $0x80] sm:$0xff] }
 0x872   : > { %4937 = vmatpush.bf16.msra.mxu2 %v5734_v39  ;;  %v3955_v56 = vmul.f32 0.5, %v3954_v31  ;;  %v4348_v31 = vpop.f32.mrf.mxu1 }
 0x873   : > { %v4004_v26 = vmul.f32 %v8776_v13, %v3985_v44  ;;  %v5729_v44 = vld [vmem:[#allocation13 + $0xc0] sm:$0xff] }
 0x874   : > { %v3956_v5 = vsub.f32 1.5, %v3955_v56  ;;  %v4394_v57 = vpop.f32.mrf.mxu2 }
 0x875   : > { %v4023_v58 = vadd.f32 %v8783_v41, %v4004_v26  ;;  %4893 = vmatpush.bf16.msra.mxu1 %v5721_v51 }
 0x876   : > { %4938 = vmatpush.bf16.msra.mxu2 %v5733_v42  ;;  %v3957_v33 = vmul.f32 %v8884_v0, %v3956_v5 }
 0x877   : > { %v4032_v2 = vpack.c.bf16 %v4023_v58, %v4022_v9 }
 0x878   : > { %v3961_v9 = vsel %vm3960_vm8, %v8884_v0, %v3957_v33  ;;  %v4299_v0 = vpop.f32.mrf.mxu0 }
 0x879   : > { %4274 = vmatmul.bf16.gmra.mxu3 %v4032_v2  ;;  %4323 = vmatmul.bf16.gmra.mxu0 %v4032_v2  ;;  %v3986_v60 = vmul.f32 %v3961_v9, %v8838_v11  ;;  %v4066_v11 = vld [vmem:[%s9087_s9] sm:$0xf] }
 0x87a   : > { %4372 = vmatmul.bf16.gmra.mxu1 %v4032_v2  ;;  %4421 = vmatmul.bf16.gmra.mxu2 %v4032_v2  ;;  %v4350_v27 = vpop.f32.mrf.mxu1 }
 0x87b   : > { %4939 = vmatpush.bf16.msra.mxu2 %v5732_v45  ;;  %v4005_v55 = vmul.f32 %v8776_v13, %v3986_v60 }
 0x87d   : > { %v4024_v4 = vadd.f32 %v8783_v41, %v4005_v55 }
 0x87f   : > { %4940 = vmatpush.bf16.msra.mxu2 %v5731_v14 }
 0x880   : > { %v4301_v56 = vpop.f32.mrf.mxu0 }
 0x883   : > { %4941 = vmatpush.bf16.msra.mxu2 %v5730_v47 }
 0x887   : > { %4942 = vmatpush.bf16.msra.mxu2 %v5729_v44 }
 0x88c   : > { %v3779_v49 = vpop.xlane.xlu2 %3778 }
 0x88d   : > { %v3795_v54 = vmul.f32 %v3779_v49, %v9167_v1  ;;  %v8892_v1 = vpop.f32.mrf.mxu3  ;;  %v4397_v49 = vpop.f32.mrf.mxu2 }
 0x88f   : > { %v3811_v24 = vadd.f32 1e-05, %v3795_v54  ;;  %v8915_v54 = vperm.slane %v4066_v11, 2 }
 0x891   : > { %6315 = vrsqrt.f32 %v3811_v24  ;;  %vm3968_vm10 = vweird.f32 %v3811_v24  ;;  %v4346_v50 = vadd.f32 %v4345_v25, %v8915_v54  ;;  %v4344_v5 = vadd.f32 %v8894_v48, %v8915_v54  ;;  %v4353_v25 = vpop.f32.mrf.mxu1 }
 0x892   : > { %v4351_v60 = vadd.f32 %v4350_v27, %v8915_v54  ;;  %v4349_v55 = vadd.f32 %v4348_v31, %v8915_v54 }
 0x893   : > { %v4438_v51 = vmax.f32 %v4346_v50, 0.0 }
 0x895   : > { %v4247_v2 = vpop.f32.mrf.mxu3  ;;  %v4399_v14 = vpop.f32.mrf.mxu2 }
 0x897   : > { %v6316_v32 = vpop.eup %6315 }
 0x898   : > { %v3963_v26 = vmul.f32 %v6316_v32, %v3811_v24  ;;  %vm3969_vm9 = vweird.f32 %v6316_v32  ;;  %v8917_v24 = vperm.slane %v4066_v11, 3 }
 0x899   : > { %vm3970_vm11 = vmor %vm3968_vm10, %vm3969_vm9 }
 0x89a   : > { %v3964_v18 = vmul.f32 %v6316_v32, %v3963_v26  ;;  %v4395_v46 = vadd.f32 %v4394_v57, %v8917_v24  ;;  %v4393_v6 = vadd.f32 %v8896_v35, %v8917_v24 }
 0x89c   : > { %v3965_v58 = vmul.f32 0.5, %v3964_v18  ;;  %v4439_v44 = vmax.f32 %v4395_v46, 0.0  ;;  %v4434_v18 = vmax.f32 %v4344_v5, 0.0  ;;  %v4435_v9 = vmax.f32 %v4393_v6, 0.0 }
 0x89d   : > { %v4250_v21 = vpop.f32.mrf.mxu3  ;;  %v4402_v57 = vpop.f32.mrf.mxu2  ;;  %v4442_v46 = vmax.f32 %v4349_v55, 0.0 }
 0x89e   : > { %v3966_v39 = vsub.f32 1.5, %v3965_v58 }
 0x8a0   : > { %v3967_v42 = vmul.f32 %v6316_v32, %v3966_v39  ;;  %v4304_v39 = vpop.f32.mrf.mxu0 }
 0x8a2   : > { %v3971_v34 = vsel %vm3970_vm11, %v6316_v32, %v3967_v42  ;;  %v4400_v42 = vadd.f32 %v4399_v14, %v8917_v24 }
 0x8a3   : > { %v3987_v36 = vmul.f32 %v3971_v34, %v8848_v10  ;;  %v8911_v10 = vperm.slane %v4066_v11, 1 }
 0x8a5   : > { %v4006_v62 = vmul.f32 %v8776_v13, %v3987_v36  ;;  %v8913_v13 = vperm.slane %v4066_v11, 0  ;;  %v4252_v3 = vpop.f32.mrf.mxu3  ;;  %v4295_v7 = vadd.f32 %v8890_v30, %v8911_v10  ;;  %v4498_v30 = vpack.c.bf16 %v4438_v51, %v4434_v18 }
 0x8a6   : > { %v4302_v48 = vadd.f32 %v4301_v56, %v8911_v10  ;;  %v4300_v34 = vadd.f32 %v4299_v0, %v8911_v10  ;;  %v4404_v56 = vpop.f32.mrf.mxu2  ;;  %v4354_v18 = vadd.f32 %v4353_v25, %v8915_v54 }
 0x8a7   : > { %v4025_v23 = vadd.f32 %v8783_v41, %v4006_v62  ;;  %v4297_v41 = vadd.f32 %v4296_v37, %v8911_v10  ;;  %v4248_v61 = vadd.f32 %v4247_v2, %v8913_v13  ;;  %v4246_v47 = vadd.f32 %v8892_v1, %v8913_v13 }
 0x8a8   : > { %v4433_v33 = vmax.f32 %v4295_v7, 0.0  ;;  %v4499_v2 = vpack.c.bf16 %v4439_v44, %v4435_v9  ;;  %v4253_v35 = vadd.f32 %v4252_v3, %v8913_v13  ;;  %v4251_v36 = vadd.f32 %v4250_v21, %v8913_v13 }
 0x8a9   : > { %v4033_v45 = vpack.c.bf16 %v4025_v23, %v4024_v4  ;;  %v4437_v20 = vmax.f32 %v4297_v41, 0.0  ;;  %v4436_v32 = vmax.f32 %v4248_v61, 0.0  ;;  %v4432_v26 = vmax.f32 %v4246_v47, 0.0  ;;  %v4306_v4 = vpop.f32.mrf.mxu0  ;;  %v4355_v41 = vpop.f32.mrf.mxu1 }
 0x8aa   : > { %v4398_v62 = vadd.f32 %v4397_v49, %v8917_v24  ;;  %v4444_v11 = vmax.f32 %v4253_v35, 0.0  ;;  %v4446_v61 = vmax.f32 %v4351_v60, 0.0  ;;  %v4447_v3 = vmax.f32 %v4400_v42, 0.0 }
 0x8ab   : > { %4279 = vmatmul.bf16.gmra.mxu3 %v4033_v45  ;;  %4328 = vmatmul.bf16.gmra.mxu0 %v4033_v45  ;;  %v4497_v58 = vpack.c.bf16 %v4437_v20, %v4433_v33  ;;  %v4496_v37 = vpack.c.bf16 %v4436_v32, %v4432_v26  ;;  %v4441_v50 = vmax.f32 %v4300_v34, 0.0  ;;  %v4440_v27 = vmax.f32 %v4251_v36, 0.0 }
 0x8ac   : > { %4377 = vmatmul.bf16.gmra.mxu1 %v4033_v45  ;;  %4426 = vmatmul.bf16.gmra.mxu2 %v4033_v45  ;;  %v4445_v45 = vmax.f32 %v4302_v48, 0.0  ;;  %v4443_v14 = vmax.f32 %v4398_v62, 0.0  ;;  %v4502_v47 = vpack.c.bf16 %v4446_v61, %v4442_v46  ;;  %v4307_v20 = vadd.f32 %v4306_v4, %v8911_v10 }
 0x8ad   : > { %v4255_v1 = vpop.f32.mrf.mxu3  ;;  %v4500_v7 = vpack.c.bf16 %v4444_v11, %v4440_v27  ;;  %v4356_v51 = vadd.f32 %v4355_v41, %v8915_v54  ;;  %v4405_v44 = vadd.f32 %v4404_v56, %v8917_v24  ;;  %v4305_v33 = vadd.f32 %v4304_v39, %v8911_v10 }
 0x8ae   : > { %v4501_v0 = vpack.c.bf16 %v4445_v45, %v4441_v50  ;;  %v4503_v21 = vpack.c.bf16 %v4447_v3, %v4443_v14  ;;  %v4407_v6 = vpop.f32.mrf.mxu2  ;;  %v4256_v26 = vadd.f32 %v4255_v1, %v8913_v13  ;;  %v4403_v9 = vadd.f32 %v4402_v57, %v8917_v24 }
 0x8af   : > { %v4449_v60 = vmax.f32 %v4305_v33, 0.0  ;;  %v4450_v55 = vmax.f32 %v4354_v18, 0.0  ;;  %v4408_v14 = vadd.f32 %v4407_v6, %v8917_v24 }
 0x8b0   : > { %v4448_v42 = vmax.f32 %v4256_v26, 0.0  ;;  %v4451_v62 = vmax.f32 %v4403_v9, 0.0 }
 0x8b1   : > { %v4309_v31 = vpop.f32.mrf.mxu0  ;;  %v4358_v5 = vpop.f32.mrf.mxu1 }
 0x8b2   : > { %v4310_v50 = vadd.f32 %v4309_v31, %v8911_v10  ;;  %v4359_v46 = vadd.f32 %v4358_v5, %v8915_v54 }
 0x8b5   : > { %v4257_v23 = vpop.f32.mrf.mxu3 }
 0x8b6   : > { %v4258_v32 = vadd.f32 %v4257_v23, %v8913_v13  ;;  %v4409_v36 = vpop.f32.mrf.mxu2 }
 0x8b7   : > { %v4410_v3 = vadd.f32 %v4409_v36, %v8917_v24 }
 0x8b9   : > { %v4311_v48 = vpop.f32.mrf.mxu0  ;;  %v4360_v34 = vpop.f32.mrf.mxu1 }
 0x8ba   : > { %v4312_v41 = vadd.f32 %v4311_v48, %v8911_v10  ;;  %v4361_v61 = vadd.f32 %v4360_v34, %v8915_v54 }
 0x8bb   : > { %4796 = vmatmul.bf16.vlgmr.msrb.gmra.mxu3 %v4496_v37  ;;  %4845 = vmatmul.bf16.vlgmr.msra.gmra.mxu0 %v4497_v58  ;;  %v4453_v58 = vmax.f32 %v4307_v20, 0.0  ;;  %v4452_v37 = vmax.f32 %v4258_v32, 0.0  ;;  %v4457_v20 = vmax.f32 %v4310_v50, 0.0 }
 0x8bc   : > { %4894 = vmatmul.bf16.vlgmr.msra.gmra.mxu1 %v4498_v30  ;;  %4943 = vmatmul.bf16.vlgmr.msra.gmra.mxu2 %v4499_v2  ;;  %v4454_v30 = vmax.f32 %v4356_v51, 0.0  ;;  %v4455_v2 = vmax.f32 %v4405_v44, 0.0  ;;  %v4458_v51 = vmax.f32 %v4359_v46, 0.0  ;;  %v4459_v44 = vmax.f32 %v4408_v14, 0.0 }
 0x8bd   : > { %v4260_v49 = vpop.f32.mrf.mxu3  ;;  %v4504_v4 = vpack.c.bf16 %v4452_v37, %v4448_v42  ;;  %v4505_v39 = vpack.c.bf16 %v4453_v58, %v4449_v60 }
 0x8be   : > { %v4506_v23 = vpack.c.bf16 %v4454_v30, %v4450_v55  ;;  %v4507_v1 = vpack.c.bf16 %v4455_v2, %v4451_v62  ;;  %v4261_v27 = vadd.f32 %v4260_v49, %v8913_v13 }
 0x8c0   : > { %v4456_v32 = vmax.f32 %v4261_v27, 0.0 }
 0x8c1   : > { %v4314_v25 = vpop.f32.mrf.mxu0  ;;  %v4363_v45 = vpop.f32.mrf.mxu1 }
 0x8c2   : > { %v4412_v11 = vpop.f32.mrf.mxu2  ;;  %v4315_v60 = vadd.f32 %v4314_v25, %v8911_v10  ;;  %v4364_v55 = vadd.f32 %v4363_v45, %v8915_v54 }
 0x8c3   : > { %v4413_v62 = vadd.f32 %v4412_v11, %v8917_v24 }
 0x8c5   : > { %v4262_v35 = vpop.f32.mrf.mxu3 }
 0x8c6   : > { %v4263_v56 = vadd.f32 %v4262_v35, %v8913_v13 }
 0x8c9   : > { %v4316_v33 = vpop.f32.mrf.mxu0  ;;  %v4365_v18 = vpop.f32.mrf.mxu1 }
 0x8ca   : > { %v4414_v9 = vpop.f32.mrf.mxu2  ;;  %v4317_v5 = vadd.f32 %v4316_v33, %v8911_v10  ;;  %v4366_v30 = vadd.f32 %v4365_v18, %v8915_v54 }
 0x8cb   : > { %4801 = vmatmul.bf16.gmra.mxu3 %v4500_v7  ;;  %4850 = vmatmul.bf16.gmra.mxu0 %v4501_v0  ;;  %v4461_v7 = vmax.f32 %v4312_v41, 0.0  ;;  %v4460_v0 = vmax.f32 %v4263_v56, 0.0  ;;  %v4415_v2 = vadd.f32 %v4414_v9, %v8917_v24  ;;  %v4465_v41 = vmax.f32 %v4315_v60, 0.0 }
 0x8cc   : > { %4899 = vmatmul.bf16.gmra.mxu1 %v4502_v47  ;;  %4948 = vmatmul.bf16.gmra.mxu2 %v4503_v21  ;;  %v4462_v47 = vmax.f32 %v4361_v61, 0.0  ;;  %v4463_v21 = vmax.f32 %v4410_v3, 0.0  ;;  %v4466_v61 = vmax.f32 %v4364_v55, 0.0  ;;  %v4467_v3 = vmax.f32 %v4413_v62, 0.0 }
 0x8cd   : > { %v4265_v57 = vpop.f32.mrf.mxu3  ;;  %v4508_v58 = vpack.c.bf16 %v4460_v0, %v4456_v32  ;;  %v4509_v31 = vpack.c.bf16 %v4461_v7, %v4457_v20 }
 0x8ce   : > { %v4510_v37 = vpack.c.bf16 %v4462_v47, %v4458_v51  ;;  %v4511_v49 = vpack.c.bf16 %v4463_v21, %v4459_v44  ;;  %v4266_v42 = vadd.f32 %v4265_v57, %v8913_v13 }
 0x8d0   : > { %v4464_v56 = vmax.f32 %v4266_v42, 0.0 }
 0x8d1   : > { %v4319_v48 = vpop.f32.mrf.mxu0  ;;  %v4368_v34 = vpop.f32.mrf.mxu1 }
 0x8d2   : > { %v4417_v36 = vpop.f32.mrf.mxu2  ;;  %v4320_v20 = vadd.f32 %v4319_v48, %v8911_v10  ;;  %v4369_v51 = vadd.f32 %v4368_v34, %v8915_v54 }
 0x8d3   : > { %v4418_v44 = vadd.f32 %v4417_v36, %v8917_v24 }
 0x8d5   : > { %v4267_v26 = vpop.f32.mrf.mxu3 }
 0x8d6   : > { %v4268_v6 = vadd.f32 %v4267_v26, %v8913_v13 }
 0x8d9   : > { %v4321_v57 = vpop.f32.mrf.mxu0  ;;  %v4370_v45 = vpop.f32.mrf.mxu1 }
 0x8da   : > { %v4419_v11 = vpop.f32.mrf.mxu2  ;;  %v4322_v7 = vadd.f32 %v4321_v57, %v8911_v10  ;;  %v4371_v47 = vadd.f32 %v4370_v45, %v8915_v54 }
 0x8db   : > { %4806 = vmatmul.bf16.gmra.mxu3 %v4504_v4  ;;  %4855 = vmatmul.bf16.gmra.mxu0 %v4505_v39  ;;  %v4469_v4 = vmax.f32 %v4317_v5, 0.0  ;;  %v4468_v39 = vmax.f32 %v4268_v6, 0.0  ;;  %v4420_v21 = vadd.f32 %v4419_v11, %v8917_v24  ;;  %v4473_v5 = vmax.f32 %v4320_v20, 0.0 }
 0x8dc   : > { %4904 = vmatmul.bf16.gmra.mxu1 %v4506_v23  ;;  %4953 = vmatmul.bf16.gmra.mxu2 %v4507_v1  ;;  %v4470_v23 = vmax.f32 %v4366_v30, 0.0  ;;  %v4471_v1 = vmax.f32 %v4415_v2, 0.0  ;;  %v4477_v18 = vmax.f32 %v4322_v7, 0.0  ;;  %v4474_v30 = vmax.f32 %v4369_v51, 0.0 }
 0x8dd   : > { %v4270_v35 = vpop.f32.mrf.mxu3  ;;  %v4513_v50 = vpack.c.bf16 %v4469_v4, %v4465_v41  ;;  %v4512_v27 = vpack.c.bf16 %v4468_v39, %v4464_v56  ;;  %v4475_v2 = vmax.f32 %v4418_v44, 0.0 }
 0x8de   : > { %v4514_v46 = vpack.c.bf16 %v4470_v23, %v4466_v61  ;;  %v4515_v25 = vpack.c.bf16 %v4471_v1, %v4467_v3  ;;  %v4271_v32 = vadd.f32 %v4270_v35, %v8913_v13  ;;  %v4517_v60 = vpack.c.bf16 %v4477_v18, %v4473_v5 }
 0x8e0   : > { %v4472_v6 = vmax.f32 %v4271_v32, 0.0 }
 0x8e5   : > { %v4272_v14 = vpop.f32.mrf.mxu3 }
 0x8e6   : > { %v4273_v0 = vadd.f32 %v4272_v14, %v8913_v13 }
 0x8e8   : > { %v4476_v9 = vmax.f32 %v4273_v0, 0.0 }
 0x8ea   : > { %v4516_v48 = vpack.c.bf16 %v4476_v9, %v4472_v6 }
 0x8eb   : > { %4811 = vmatmul.bf16.gmra.mxu3 %v4508_v58  ;;  %4860 = vmatmul.bf16.gmra.mxu0 %v4509_v31 }
 0x8ec   : > { %4909 = vmatmul.bf16.gmra.mxu1 %v4510_v37  ;;  %4958 = vmatmul.bf16.gmra.mxu2 %v4511_v49  ;;  %v4478_v37 = vmax.f32 %v4371_v47, 0.0  ;;  %v4479_v49 = vmax.f32 %v4420_v21, 0.0 }
 0x8ee   : > { %v4518_v42 = vpack.c.bf16 %v4478_v37, %v4474_v30  ;;  %v4519_v35 = vpack.c.bf16 %v4479_v49, %v4475_v2 }
 0x8f6   : > { %v4324_v33 = vpop.f32.mrf.mxu0 }
 0x8f7   : > { %v4373_v58 = vpop.f32.mrf.mxu1  ;;  %v4325_v41 = vadd.f32 %v4324_v33, %v8911_v10 }
 0x8f8   : > { %v4374_v61 = vadd.f32 %v4373_v58, %v8915_v54 }
 0x8f9   : > { %v4481_v57 = vmax.f32 %v4325_v41, 0.0 }
 0x8fa   : > { %v4482_v45 = vmax.f32 %v4374_v61, 0.0 }
 0x8fb   : > { %4816 = vmatmul.bf16.gmra.mxu3 %v4512_v27  ;;  %4865 = vmatmul.bf16.gmra.mxu0 %v4513_v50 }
 0x8fc   : > { %4914 = vmatmul.bf16.gmra.mxu1 %v4514_v46  ;;  %4963 = vmatmul.bf16.gmra.mxu2 %v4515_v25  ;;  %v4275_v26 = vpop.f32.mrf.mxu3 }
 0x8fd   : > { %v4422_v31 = vpop.f32.mrf.mxu2  ;;  %v4276_v56 = vadd.f32 %v4275_v26, %v8913_v13 }
 0x8fe   : > { %v4326_v34 = vpop.f32.mrf.mxu0  ;;  %v4423_v3 = vadd.f32 %v4422_v31, %v8917_v24 }
 0x8ff   : > { %v4375_v55 = vpop.f32.mrf.mxu1  ;;  %v4327_v4 = vadd.f32 %v4326_v34, %v8911_v10  ;;  %v4480_v14 = vmax.f32 %v4276_v56, 0.0 }
 0x900   : > { %v4376_v23 = vadd.f32 %v4375_v55, %v8915_v54  ;;  %v4483_v11 = vmax.f32 %v4423_v3, 0.0 }
 0x901   : > { %v4485_v50 = vmax.f32 %v4327_v4, 0.0 }
 0x902   : > { %v4486_v46 = vmax.f32 %v4376_v23, 0.0 }
 0x903   : > { %v4521_v7 = vpack.c.bf16 %v4485_v50, %v4481_v57 }
 0x904   : > { %v4277_v36 = vpop.f32.mrf.mxu3  ;;  %v4522_v47 = vpack.c.bf16 %v4486_v46, %v4482_v45 }
 0x905   : > { %v4424_v62 = vpop.f32.mrf.mxu2  ;;  %v4278_v39 = vadd.f32 %v4277_v36, %v8913_v13 }
 0x906   : > { %v4425_v1 = vadd.f32 %v4424_v62, %v8917_v24 }
 0x907   : > { %v4484_v27 = vmax.f32 %v4278_v39, 0.0 }
 0x908   : > { %v4487_v25 = vmax.f32 %v4425_v1, 0.0  ;;  %v8990_v1 = vld [vmem:[%s9089_s11] ss:$0 sm:$0xff] }
 0x909   : > { %v4520_v0 = vpack.c.bf16 %v4484_v27, %v4480_v14 }
 0x90a   : > { %v4523_v21 = vpack.c.bf16 %v4487_v25, %v4483_v11 }
 0x90b   : > { %4821 = vmatmul.bf16.gmra.mxu3 %v4516_v48  ;;  %4870 = vmatmul.bf16.gmra.mxu0 %v4517_v60 }
 0x90c   : > { %4919 = vmatmul.bf16.gmra.mxu1 %v4518_v42  ;;  %4968 = vmatmul.bf16.gmra.mxu2 %v4519_v35 }
 0x91b   : > { %4826 = vmatmul.bf16.gmra.mxu3 %v4520_v0  ;;  %4875 = vmatmul.bf16.gmra.mxu0 %v4521_v7 }
 0x91c   : > { %4924 = vmatmul.bf16.gmra.mxu1 %v4522_v47  ;;  %4973 = vmatmul.bf16.gmra.mxu2 %v4523_v21 }
 0x928   : > { %v4329_v20 = vpop.f32.mrf.mxu0 }
 0x929   : > { %v4378_v32 = vpop.f32.mrf.mxu1  ;;  %v4330_v44 = vadd.f32 %v4329_v20, %v8911_v10 }
 0x92a   : > { %v4379_v26 = vadd.f32 %v4378_v32, %v8915_v54 }
 0x92b   : > { %v4489_v37 = vmax.f32 %v4330_v44, 0.0 }
 0x92c   : > { %v4490_v5 = vmax.f32 %v4379_v26, 0.0 }
 0x92e   : > { %v4280_v51 = vpop.f32.mrf.mxu3 }
 0x92f   : > { %v4427_v33 = vpop.f32.mrf.mxu2  ;;  %v4281_v30 = vadd.f32 %v4280_v51, %v8913_v13 }
 0x930   : > { %v4331_v18 = vpop.f32.mrf.mxu0  ;;  %v4428_v60 = vadd.f32 %v4427_v33, %v8917_v24 }
 0x931   : > { %v4332_v9 = vadd.f32 %v4331_v18, %v8911_v10  ;;  %v4380_v58 = vpop.f32.mrf.mxu1 }
 0x932   : > { %v4381_v31 = vadd.f32 %v4380_v58, %v8915_v54  ;;  %v4488_v54 = vmax.f32 %v4281_v30, 0.0  ;;  %v4491_v4 = vmax.f32 %v4428_v60, 0.0 }
 0x933   : > { %v4493_v49 = vmax.f32 %v4332_v9, 0.0 }
 0x934   : > { %v4494_v6 = vmax.f32 %v4381_v31, 0.0 }
 0x935   : > { %v4525_v2 = vpack.c.bf16 %v4493_v49, %v4489_v37 }
 0x936   : > { %v4526_v48 = vpack.c.bf16 %v4494_v6, %v4490_v5  ;;  %v4282_v42 = vpop.f32.mrf.mxu3 }
 0x937   : > { %v4283_v35 = vadd.f32 %v4282_v42, %v8913_v13  ;;  %v4429_v34 = vpop.f32.mrf.mxu2  ;;  %4880 = vmatmul.bf16.gmra.mxu0 %v4525_v2 }
 0x938   : > { %v4430_v10 = vadd.f32 %v4429_v34, %v8917_v24  ;;  %4929 = vmatmul.bf16.gmra.mxu1 %v4526_v48  ;;  %v4846_v36 = vpop.f32.mrf.mxu0 }
 0x939   : > { %v4492_v55 = vmax.f32 %v4283_v35, 0.0  ;;  %v4895_v62 = vpop.f32.mrf.mxu1 }
 0x93a   : > { %v4495_v39 = vmax.f32 %v4430_v10, 0.0 }
 0x93b   : > { %v4524_v23 = vpack.c.bf16 %v4492_v55, %v4488_v54 }
 0x93c   : > { %v4527_v41 = vpack.c.bf16 %v4495_v39, %v4491_v4 }
 0x93d   : > { %4831 = vmatmul.bf16.gmra.mxu3 %v4524_v23 }
 0x93e   : > { %4978 = vmatmul.bf16.gmra.mxu2 %v4527_v41  ;;  %v4797_v13 = vpop.f32.mrf.mxu3 }
 0x93f   : > { %v4798_v24 = vadd.f32 %v8990_v1, %v4797_v13  ;;  %v4944_v56 = vpop.f32.mrf.mxu2 }
 0x940   : > { %v4848_v61 = vpop.f32.mrf.mxu0 }
 0x941   : > { %v4847_v3 = vadd.f32 %v4846_v36, %v4798_v24  ;;  %v4897_v50 = vpop.f32.mrf.mxu1 }
 0x943   : > { %v4896_v27 = vadd.f32 %v4895_v62, %v4847_v3 }
 0x945   : > { %v4945_v46 = vadd.f32 %v4944_v56, %v4896_v27 }
 0x946   : > { %v4799_v25 = vpop.f32.mrf.mxu3 }
 0x947   : > { %v4984_v57 = vadd.f32 %v4945_v46, %v8619_v40  ;;  %v4800_v14 = vadd.f32 %v8990_v1, %v4799_v25  ;;  %v4946_v45 = vpop.f32.mrf.mxu2 }
 0x948   : > { %v4851_v11 = vpop.f32.mrf.mxu0 }
 0x949   : > { %5000 = vst [vmem:[%s8997_s14] sm:$0xff] %v4984_v57  ;;  %v4849_v7 = vadd.f32 %v4848_v61, %v4800_v14  ;;  %v4900_v0 = vpop.f32.mrf.mxu1 }
 0x94b   : > { %v4898_v47 = vadd.f32 %v4897_v50, %v4849_v7 }
 0x94d   : > { %v4947_v21 = vadd.f32 %v4946_v45, %v4898_v47 }
 0x94e   : > { %v4802_v20 = vpop.f32.mrf.mxu3 }
 0x94f   : > { %v4985_v32 = vadd.f32 %v4947_v21, %v8625_v16  ;;  %v4803_v40 = vadd.f32 %v8990_v1, %v4802_v20  ;;  %v4949_v51 = vpop.f32.mrf.mxu2 }
 0x950   : > { %v4853_v44 = vpop.f32.mrf.mxu0 }
 0x951   : > { %5001 = vst [vmem:[%s8997_s14 + $0x8] sm:$0xff] %v4985_v32  ;;  %v4852_v33 = vadd.f32 %v4851_v11, %v4803_v40  ;;  %v4902_v26 = vpop.f32.mrf.mxu1 }
 0x953   : > { %v4901_v18 = vadd.f32 %v4900_v0, %v4852_v33 }
 0x955   : > { %v4950_v9 = vadd.f32 %v4949_v51, %v4901_v18 }
 0x956   : > { %v4804_v58 = vpop.f32.mrf.mxu3 }
 0x957   : > { %v4986_v31 = vadd.f32 %v4950_v9, %v8637_v12  ;;  %v4805_v37 = vadd.f32 %v8990_v1, %v4804_v58  ;;  %v4951_v49 = vpop.f32.mrf.mxu2 }
 0x958   : > { %v4856_v5 = vpop.f32.mrf.mxu0 }
 0x959   : > { %5002 = vst [vmem:[%s8997_s14 + $0x10] sm:$0xff] %v4986_v31  ;;  %v4854_v6 = vadd.f32 %v4853_v44, %v4805_v37  ;;  %v4905_v16 = vpop.f32.mrf.mxu1 }
 0x95b   : > { %v4903_v30 = vadd.f32 %v4902_v26, %v4854_v6 }
 0x95d   : > { %v4952_v2 = vadd.f32 %v4951_v49, %v4903_v30 }
 0x95e   : > { %v4807_v60 = vpop.f32.mrf.mxu3 }
 0x95f   : > { %v4987_v48 = vadd.f32 %v4952_v2, %v8646_v38  ;;  %v4808_v42 = vadd.f32 %v8990_v1, %v4807_v60  ;;  %v4954_v35 = vpop.f32.mrf.mxu2 }
 0x960   : > { %v4858_v34 = vpop.f32.mrf.mxu0 }
 0x961   : > { %5003 = vst [vmem:[%s8997_s14 + $0x18] sm:$0xff] %v4987_v48  ;;  %v4857_v10 = vadd.f32 %v4856_v5, %v4808_v42  ;;  %v4907_v12 = vpop.f32.mrf.mxu1 }
 0x963   : > { %v4906_v36 = vadd.f32 %v4905_v16, %v4857_v10 }
 0x965   : > { %v4955_v54 = vadd.f32 %v4954_v35, %v4906_v36 }
 0x966   : > { %v4809_v55 = vpop.f32.mrf.mxu3 }
 0x967   : > { %v4988_v62 = vadd.f32 %v4955_v54, %v8655_v17  ;;  %v4810_v4 = vadd.f32 %v8990_v1, %v4809_v55  ;;  %v4956_v39 = vpop.f32.mrf.mxu2 }
 0x968   : > { %v4861_v23 = vpop.f32.mrf.mxu0 }
 0x969   : > { %5004 = vst [vmem:[%s8997_s14 + $0x20] sm:$0xff] %v4988_v62  ;;  %v4859_v41 = vadd.f32 %v4858_v34, %v4810_v4  ;;  %v4910_v38 = vpop.f32.mrf.mxu1 }
 0x96b   : > { %v4908_v13 = vadd.f32 %v4907_v12, %v4859_v41 }
 0x96d   : > { %v4957_v24 = vadd.f32 %v4956_v39, %v4908_v13 }
 0x96e   : > { %v4812_v56 = vpop.f32.mrf.mxu3 }
 0x96f   : > { %v4989_v61 = vadd.f32 %v4957_v24, %v8661_v29  ;;  %v4813_v3 = vadd.f32 %v8990_v1, %v4812_v56  ;;  %v4959_v50 = vpop.f32.mrf.mxu2 }
 0x970   : > { %v4863_v27 = vpop.f32.mrf.mxu0 }
 0x971   : > { %5005 = vst [vmem:[%s8997_s14 + $0x28] sm:$0xff] %v4989_v61  ;;  %v4862_v46 = vadd.f32 %v4861_v23, %v4813_v3  ;;  %v4912_v17 = vpop.f32.mrf.mxu1 }
 0x973   : > { %v4911_v25 = vadd.f32 %v4910_v38, %v4862_v46 }
 0x975   : > { %v4960_v57 = vadd.f32 %v4959_v50, %v4911_v25 }
 0x976   : > { %v4814_v14 = vpop.f32.mrf.mxu3 }
 0x977   : > { %v4990_v45 = vadd.f32 %v4960_v57, %v8673_v8  ;;  %v4815_v11 = vadd.f32 %v8990_v1, %v4814_v14  ;;  %v4961_v7 = vpop.f32.mrf.mxu2 }
 0x978   : > { %v4866_v0 = vpop.f32.mrf.mxu0 }
 0x979   : > { %5006 = vst [vmem:[%s8997_s14 + $0x30] sm:$0xff] %v4990_v45  ;;  %v4864_v47 = vadd.f32 %v4863_v27, %v4815_v11  ;;  %v4915_v29 = vpop.f32.mrf.mxu1 }
 0x97b   : > { %v4913_v21 = vadd.f32 %v4912_v17, %v4864_v47 }
 0x97d   : > { %v4962_v20 = vadd.f32 %v4961_v7, %v4913_v21 }
 0x97e   : > { %v4817_v32 = vpop.f32.mrf.mxu3 }
 0x97f   : > { %v4991_v40 = vadd.f32 %v4962_v20, %v8688_v63  ;;  %v4818_v51 = vadd.f32 %v8990_v1, %v4817_v32  ;;  %v4964_v44 = vpop.f32.mrf.mxu2 }
 0x980   : > { %v4868_v33 = vpop.f32.mrf.mxu0 }
 0x981   : > { %5007 = vst [vmem:[%s8997_s14 + $0x38] sm:$0xff] %v4991_v40  ;;  %v4867_v26 = vadd.f32 %v4866_v0, %v4818_v51  ;;  %v4917_v8 = vpop.f32.mrf.mxu1 }
 0x983   : > { %v4916_v18 = vadd.f32 %v4915_v29, %v4867_v26 }
 0x985   : > { %v4965_v9 = vadd.f32 %v4964_v44, %v4916_v18 }
 0x986   : > { %v4819_v58 = vpop.f32.mrf.mxu3 }
 0x987   : > { %v4992_v31 = vadd.f32 %v4965_v9, %v8695_v52  ;;  %v4820_v37 = vadd.f32 %v8990_v1, %v4819_v58  ;;  %v4966_v49 = vpop.f32.mrf.mxu2 }
 0x988   : > { %v4871_v6 = vpop.f32.mrf.mxu0 }
 0x989   : > { %5008 = vst [vmem:[%s8997_s14 + $0x40] sm:$0xff] %v4992_v31  ;;  %v4869_v5 = vadd.f32 %v4868_v33, %v4820_v37  ;;  %v4920_v16 = vpop.f32.mrf.mxu1 }
 0x98b   : > { %v4918_v63 = vadd.f32 %v4917_v8, %v4869_v5 }
 0x98d   : > { %v4967_v30 = vadd.f32 %v4966_v49, %v4918_v63 }
 0x98e   : > { %v4822_v2 = vpop.f32.mrf.mxu3 }
 0x98f   : > { %v4993_v60 = vadd.f32 %v4967_v30, %v8710_v22  ;;  %v4823_v48 = vadd.f32 %v8990_v1, %v4822_v2  ;;  %v4969_v42 = vpop.f32.mrf.mxu2 }
 0x990   : > { %v4873_v52 = vpop.f32.mrf.mxu0 }
 0x991   : > { %5009 = vst [vmem:[%s8997_s14 + $0x48] sm:$0xff] %v4993_v60  ;;  %v4872_v35 = vadd.f32 %v4871_v6, %v4823_v48  ;;  %v4922_v12 = vpop.f32.mrf.mxu1 }
 0x993   : > { %v4921_v34 = vadd.f32 %v4920_v16, %v4872_v35 }
 0x995   : > { %v4970_v10 = vadd.f32 %v4969_v42, %v4921_v34 }
 0x996   : > { %v4824_v36 = vpop.f32.mrf.mxu3 }
 0x997   : > { %v4994_v54 = vadd.f32 %v4970_v10, %v8721_v15  ;;  %v4825_v55 = vadd.f32 %v8990_v1, %v4824_v36  ;;  %v4971_v62 = vpop.f32.mrf.mxu2 }
 0x998   : > { %v4876_v23 = vpop.f32.mrf.mxu0 }
 0x999   : > { %5010 = vst [vmem:[%s8997_s14 + $0x50] sm:$0xff] %v4994_v54  ;;  %v4874_v4 = vadd.f32 %v4873_v52, %v4825_v55  ;;  %v4925_v24 = vpop.f32.mrf.mxu1 }
 0x99b   : > { %v4923_v39 = vadd.f32 %v4922_v12, %v4874_v4 }
 0x99d   : > { %v4972_v22 = vadd.f32 %v4971_v62, %v4923_v39 }
 0x99e   : > { %v4827_v41 = vpop.f32.mrf.mxu3 }
 0x99f   : > { %v4995_v38 = vadd.f32 %v4972_v22, %v8732_v19  ;;  %v4828_v13 = vadd.f32 %v8990_v1, %v4827_v41  ;;  %v4974_v61 = vpop.f32.mrf.mxu2 }
 0x9a0   : > { %v4878_v17 = vpop.f32.mrf.mxu0 }
 0x9a1   : > { %5011 = vst [vmem:[%s8997_s14 + $0x58] sm:$0xff] %v4995_v38  ;;  %v4877_v56 = vadd.f32 %v4876_v23, %v4828_v13  ;;  %v4927_v57 = vpop.f32.mrf.mxu1 }
 0x9a3   : > { %v4926_v15 = vadd.f32 %v4925_v24, %v4877_v56 }
 0x9a5   : > { %v4975_v3 = vadd.f32 %v4974_v61, %v4926_v15 }
 0x9a6   : > { %v4829_v50 = vpop.f32.mrf.mxu3 }
 0x9a7   : > { %v4996_v27 = vadd.f32 %v4975_v3, %v8739_v59  ;;  %v4830_v46 = vadd.f32 %v8990_v1, %v4829_v50  ;;  %v4976_v14 = vpop.f32.mrf.mxu2 }
 0x9a9   : > { %5012 = vst [vmem:[%s8997_s14 + $0x60] sm:$0xff] %v4996_v27  ;;  %v4879_v25 = vadd.f32 %v4878_v17, %v4830_v46 }
 0x9ab   : > { %v4928_v19 = vadd.f32 %v4927_v57, %v4879_v25 }
 0x9ad   : > { %v4977_v45 = vadd.f32 %v4976_v14, %v4928_v19 }
 0x9af   : > { %v4997_v11 = vadd.f32 %v4977_v45, %v8750_v28 }
 0x9b1   : > { %5013 = vst [vmem:[%s8997_s14 + $0x68] sm:$0xff] %v4997_v11 }
 0x9b4   : > { %v4881_v7 = vpop.f32.mrf.mxu0 }
 0x9b5   : > { %v4930_v59 = vpop.f32.mrf.mxu1 }
 0x9bc   : > { %v4883_v44 = vpop.f32.mrf.mxu0 }
 0x9bd   : > { %v4932_v26 = vpop.f32.mrf.mxu1 }
 0x9c0   : > { %v4832_v0 = vpop.f32.mrf.mxu3 }
 0x9c1   : > { %v4833_v47 = vadd.f32 %v8990_v1, %v4832_v0  ;;  %v4979_v21 = vpop.f32.mrf.mxu2 }
 0x9c3   : > { %v4882_v29 = vadd.f32 %v4881_v7, %v4833_v47 }
 0x9c5   : > { %v4931_v20 = vadd.f32 %v4930_v59, %v4882_v29 }
 0x9c7   : > { %v4980_v32 = vadd.f32 %v4979_v21, %v4931_v20 }
 0x9c8   : > { %v4834_v40 = vpop.f32.mrf.mxu3 }
 0x9c9   : > { %v4998_v51 = vadd.f32 %v4980_v32, %v8755_v53  ;;  %v4835_v28 = vadd.f32 %v8990_v1, %v4834_v40  ;;  %v4981_v18 = vpop.f32.mrf.mxu2 }
 0x9cb   : > { %5014 = vst [vmem:[%s8997_s14 + $0x70] sm:$0xff] %v4998_v51  ;;  %v4884_v33 = vadd.f32 %v4883_v44, %v4835_v28 }
 0x9cd   : > { %v4933_v8 = vadd.f32 %v4932_v26, %v4884_v33 }
 0x9cf   : > { %v4982_v9 = vadd.f32 %v4981_v18, %v4933_v8 }
 0x9d1   : > { %v4999_v53 = vadd.f32 %v4982_v9, %v8780_v43 }
 0x9d3   : > { %5015 = vst [vmem:[%s8997_s14 + $0x78] sm:$0xff] %v4999_v53 }
 0x9d4   : > { %6570 = shalt.err (!%p6567_p9)
}
 0x9d5   : > { %s6642_s15 = smov 128   ;;  %s6643_s14 = smov 8  }
 0x9d6   : > { %5773 = dma.vmem_to_hbm [thread:$0]  (%p6812_p5), %s5031_s4, 2048, %s5033_s26, %s5017_s28, %s6642_s15, %s6642_s15, %s6643_s14  }
 0x9d7 PF: > { %s5047_s8 = sand.u32 1, %s6609_s21   ;;  %p9169_p10 = scmp.ge.s32.totalorder %s6621_s24, 2 }
 0x9d8   : > { %s5048_s3 = scalar_lea.sflag [#allocation4], %s5047_s8 }
 0x9d9   : > { %p5799_p13 = pnand %p9169_p10, %p6816_p6 }
 0x9db   : > { %p5800_p11 = pneg %p5799_p13 }
 0x9dd   : > { %6604 = dma.done.wait (%p5800_p11), %s5048_s3, 2048  }
 0x9de   : > { %6606 = vsyncadd (%p5800_p11), %s5048_s3, 4294965248  ;;  %p28_p0 = scmp.ge.s32.totalorder %s6786_s30, 4   ;;  %s9170_s21 = smov %s6613_s22 }
 0x9df   : > { %s9171_s22 = smov %s6617_s23  ;;  %s9172_s23 = smov %s6797_s18 }
 0x9e0   : > { %s9173_s24 = smov %s6786_s30  ;;  %30 = sbr.rel (!%p28_p0) target bundleno = 16 (0x10), region = 137 }
 0x9e5   :  { %5054 = vsyncpa [#allocation3], 1 }
 0x9e6   :  { %5056 = vsyncpa [#allocation3 + $0x1], 1 }
 0x9e7   :  { %5057 = vsyncpa [#allocation6], 1 }
 0x9e8   :  { %5058 = vsyncpa [#allocation9], 1 }
 0x9e9   :  { %5059 = vsyncpa [#allocation12], 1 }
 0x9ea   :  { %5060 = vsyncpa [#allocation4], 1 }
 0x9eb   :  { %5062 = vsyncpa [#allocation4 + $0x1], 1 }

</bundles_post_ra>
